<compile_context>
chip_gen: v7x
topology: tpu7x:2x2x1
jax: 0.10.0
libtpu: 0.0.40
codegen_flags: <defaults>
</compile_context>

<pallas_src>
import functools
import math

import jax
import jax.numpy as jnp
from jax.experimental import pallas as pl
from jax.experimental.pallas import tpu as pltpu


# ------------------------------ Pallas kernel ------------------------------

def _conv_block_kernel(x_ref, w1_ref, b1_ref, w2_ref, b2_ref, o_ref,
                       mid_ref, acc_ref, *fold_scratch,
                       pad, wpad, c1h, c1w, c2h, activation, fold_conv1):
    """Fused ConvBlock for one batch element.

    All spatial dims are flattened row-major with the *padded* row stride
    `wpad`; channels live in lanes (output channels padded to a multiple of
    128 by the wrapper).

    x_ref  : ((hpad+1)*wpad, cin) bf16   zero-padded input (+1 slack zero row)
    w1_ref : (9*cin, cp) bf16 if fold_conv1 else (9, cin, cp)   conv1 taps
    b1_ref : (1, cp) f32
    w2_ref : (9, cp, cp) bf16            conv2 taps, tap index = dy*3 + dx
    b2_ref : (1, cp) f32
    o_ref  : (c2h*wpad, cp)              conv2 output on the padded-width grid
                                         (cols >= c2w / chans >= c sliced off
                                          by the wrapper)
    mid_ref: ((c1h+2*pad+1)*wpad, cp)    VMEM scratch: conv1 activation staged
                                         (zero-padded) for conv2
    acc_ref: (c1h*wpad, cp) f32          VMEM accumulator (keeps the full-size
                                         f32 accumulator out of vregs)
    fold_scratch = (p1_ref,) iff fold_conv1:
    p1_ref : (c1h*wpad, 9*cin) bf16      VMEM im2col slab for the single
                                         folded-K conv1 matmul
    """
    f32 = jnp.float32
    cp = o_ref.shape[-1]
    cin = x_ref.shape[-1]
    m1 = c1h * wpad               # conv1 output rows on the padded-width grid
    m2 = c2h * wpad               # conv2 output rows on the padded-width grid
    off = pad * (wpad + 1)        # top-left offset of conv1 output in mid_ref
    mm = mid_ref.shape[0]

    # ------------------------------ conv1 -----------------------------------
    if fold_conv1:
        # Taps folded along K: stage an (m1, 9*cin) im2col slab in VMEM with
        # 9 shifted-window copies, then ONE matmul with K = 9*cin instead of
        # 9 matmuls with K = cin (9x fewer MXU pushes for small channels).
        p1_ref, = fold_scratch
        for t in range(9):
            dy, dx = divmod(t, 3)
            shift = dy * wpad + dx
            p1_ref[:, t * cin:(t + 1) * cin] = x_ref[shift:shift + m1, :]
        mid = jnp.dot(p1_ref[...], w1_ref[...], preferred_element_type=f32)
    else:
        # Larger cin: per-tap matmuls accumulated in the f32 VMEM scratch so
        # the (m1, cp) accumulator never has to stay live in vregs.
        for t in range(9):
            dy, dx = divmod(t, 3)
            shift = dy * wpad + dx
            d = jnp.dot(x_ref[shift:shift + m1, :], w1_ref[t],
                        preferred_element_type=f32)
            if t == 0:
                acc_ref[...] = d
            else:
                acc_ref[...] += d
        mid = acc_ref[...]

    # f32 epilogue (v5e VPU has no bf16): bias + activation, applied once on
    # the producer instead of on a 9x-expanded consumer input.
    mid = mid + b1_ref[...]
    if activation == "relu":
        mid = jnp.maximum(mid, 0.0)
    else:  # swish = x * sigmoid(x); the divide rides the EUP via approx recip.
        mid = mid * pl.reciprocal(1.0 + jnp.exp(-mid), approx=True)

    if pad:
        # Zero wrap-around garbage columns (padded-grid column >= c1w) so they
        # act as conv2's zero padding.  Kept per-step (narrow iota/mod/cmp +
        # one full-tile select) rather than a pl.when(pid==0)-built mask, which
        # would be unsafe under megacore grid partitioning (per-core scratch).
        col = jax.lax.broadcasted_iota(jnp.int32, (m1, 1), 0) % wpad
        mid = jnp.where(col < c1w, mid, 0.0)

    # -------- stage conv1 activation in VMEM (never round-trips HBM) --------
    # Zero only the thin pad bands above/below the stored block (conv2's
    # top/bottom zero padding); the interior is fully rewritten every step.
    if off > 0:
        mid_ref[:off, :] = jnp.zeros((off, cp), mid_ref.dtype)
    if mm - (off + m1) > 0:
        mid_ref[off + m1:, :] = jnp.zeros((mm - off - m1, cp), mid_ref.dtype)
    mid_ref[off:off + m1, :] = mid.astype(mid_ref.dtype)

    # --------------- conv2: 9 shifted-window matmuls into VMEM acc ----------
    # Not K-folded: channels are lane-padded to cp >= 128, so K per tap already
    # fills the MXU K dim; folding would only add an (m2, 3*cp) staging copy.
    for t in range(9):
        dy, dx = divmod(t, 3)
        shift = dy * wpad + dx
        d = jnp.dot(mid_ref[shift:shift + m2, :], w2_ref[t],
                    preferred_element_type=f32)
        if t == 0:
            acc_ref[:m2, :] = d
        else:
            acc_ref[:m2, :] += d

    o_ref[...] = (acc_ref[:m2, :] + b2_ref[...]).astype(o_ref.dtype)  # no act


# ------------------------------ wrapper ------------------------------------

def _vmem_bytes(shape, dtype):
    """Per-buffer VMEM footprint including (sublane, lane) tile padding."""
    shape = tuple(shape)
    if len(shape) == 1:
        shape = (1,) + shape
    itemsize = jnp.dtype(dtype).itemsize
    sub = 8 * max(1, 4 // itemsize)            # sublane packing for sub-32-bit
    rows = math.prod(shape[:-1])
    rows_p = -(-rows // sub) * sub
    lanes_p = -(-shape[-1] // 128) * 128
    return rows_p * lanes_p * itemsize


def conv_block_forward(x, params, *, pad=1, activation="relu",
                       out_dtype=jnp.bfloat16, data_format="NCHW",
                       mid_dtype=jnp.bfloat16, fold_k_max=256):
    """ConvBlock forward: conv2(act(conv1(x))).  NCHW (default) or NHWC I/O."""
    assert pad in (0, 1), "only pad in {0, 1} is supported"
    assert activation in ("relu", "swish")
    assert data_format in ("NCHW", "NHWC")

    if data_format == "NCHW":
        n, cin, h, w = x.shape
        x_nhwc = jnp.transpose(x, (0, 2, 3, 1))
    else:
        n, h, w, cin = x.shape
        x_nhwc = x
    c = params["w1"].shape[-1]
    assert h + 2 * pad >= 5 and w + 2 * pad >= 5, "spatial too small"

    lane = 128
    cp = -(-c // lane) * lane                         # lane-dense out channels
    hpad, wpad = h + 2 * pad, w + 2 * pad             # conv1 (padded) grid
    c1h, c1w = hpad - 2, wpad - 2                     # conv1 output grid
    c2h, c2w = c1h + 2 * pad - 2, c1w + 2 * pad - 2   # conv2 output grid
    mx = (hpad + 1) * wpad                            # flat input rows (+slack)
    m1 = c1h * wpad
    m2 = c2h * wpad
    mm = (c1h + 2 * pad + 1) * wpad                   # mid scratch rows
    k1 = 9 * cin
    fold_conv1 = k1 <= fold_k_max

    # bf16 activations; zero-pad spatially (+1 slack bottom row) and flatten.
    # The pad fuses with the NCHW->NHWC relayout pass in XLA, so for NCHW input
    # it is not an extra HBM round trip beyond the unavoidable transpose.
    xq = x_nhwc.astype(jnp.bfloat16)
    xp = jnp.pad(xq, ((0, 0), (pad, pad + 1), (pad, pad), (0, 0)))
    xf = xp.reshape(n, mx, cin)

    # Weights/biases: taps flattened, output channels zero-padded to cp so all
    # matmul outputs / the mid scratch / the HBM output store are lane-dense.
    w1 = params["w1"].astype(jnp.bfloat16)            # (3, 3, cin, c)
    w2 = params["w2"].astype(jnp.bfloat16)            # (3, 3, c,   c)
    if fold_conv1:
        w1m = jnp.pad(w1.reshape(k1, c), ((0, 0), (0, cp - c)))
    else:
        w1m = jnp.pad(w1.reshape(9, cin, c), ((0, 0), (0, 0), (0, cp - c)))
    w2m = jnp.pad(w2.reshape(9, c, c), ((0, 0), (0, cp - c), (0, cp - c)))
    b1m = jnp.pad(params["b1"].astype(jnp.float32).reshape(1, c),
                  ((0, 0), (0, cp - c)))
    b2m = jnp.pad(params["b2"].astype(jnp.float32).reshape(1, c),
                  ((0, 0), (0, cp - c)))

    # Explicit scoped-VMEM budget (padded footprints, weights single-buffered,
    # input/output double-buffered).  Capped at 64 MiB so the same number is
    # valid on v7x as well as v5e/v6e.
    vmem_needed = (
        2 * _vmem_bytes((mx, cin), jnp.bfloat16)
        + _vmem_bytes(w1m.shape, jnp.bfloat16) + _vmem_bytes(w2m.shape, jnp.bfloat16)
        + _vmem_bytes(b1m.shape, jnp.float32) + _vmem_bytes(b2m.shape, jnp.float32)
        + 2 * _vmem_bytes((m2, cp), out_dtype)
        + _vmem_bytes((mm, cp), mid_dtype)
        + _vmem_bytes((m1, cp), jnp.float32)
        + (_vmem_bytes((m1, k1), jnp.bfloat16) if fold_conv1 else 0))
    vmem_limit = int(min(max(1.5 * vmem_needed + (8 << 20), 16 << 20), 64 << 20))

    flops = 2 * n * (m1 * k1 * cp + 9 * m2 * cp * cp)
    transcendentals = n * m1 * cp if activation == "swish" else 0
    bytes_accessed = (n * (mx * cin * 2 + m2 * cp * jnp.dtype(out_dtype).itemsize)
                      + w1m.size * 2 + w2m.size * 2
                      + (b1m.size + b2m.size) * 4)

    kernel = functools.partial(
        _conv_block_kernel, pad=pad, wpad=wpad, c1h=c1h, c1w=c1w, c2h=c2h,
        activation=activation, fold_conv1=fold_conv1)

    scratch_shapes = [pltpu.VMEM((mm, cp), mid_dtype),
                      pltpu.VMEM((m1, cp), jnp.float32)]
    if fold_conv1:
        scratch_shapes.append(pltpu.VMEM((m1, k1), jnp.bfloat16))

    if fold_conv1:
        w1_spec = pl.BlockSpec((k1, cp), lambda i: (0, 0),
                               pipeline_mode=pl.Buffered(1))
    else:
        w1_spec = pl.BlockSpec((9, cin, cp), lambda i: (0, 0, 0),
                               pipeline_mode=pl.Buffered(1))

    out_flat = pl.pallas_call(
        kernel,
        out_shape=jax.ShapeDtypeStruct((n, m2, cp), out_dtype),
        grid=(n,),
        in_specs=[
            pl.BlockSpec((None, mx, cin), lambda i: (i, 0, 0)),
            w1_spec,
            pl.BlockSpec((1, cp), lambda i: (0, 0), pipeline_mode=pl.Buffered(1)),
            pl.BlockSpec((9, cp, cp), lambda i: (0, 0, 0),
                         pipeline_mode=pl.Buffered(1)),
            pl.BlockSpec((1, cp), lambda i: (0, 0), pipeline_mode=pl.Buffered(1)),
        ],
        out_specs=pl.BlockSpec((None, m2, cp), lambda i: (i, 0, 0)),
        scratch_shapes=scratch_shapes,
        compiler_params=pltpu.CompilerParams(
            dimension_semantics=("parallel",),
            vmem_limit_bytes=vmem_limit),
        cost_estimate=pl.CostEstimate(flops=flops,
                                      transcendentals=transcendentals,
                                      bytes_accessed=bytes_accessed),
    )(xf, w1m, b1m, w2m, b2m)

    # Drop the padded-width garbage columns and the lane-pad channels.
    out = out_flat.reshape(n, c2h, wpad, cp)[:, :, :c2w, :c]
    if data_format == "NCHW":
        out = jnp.transpose(out, (0, 3, 1, 2))
    return out


# ------------------------------ params & reference --------------------------

def init_conv_block_params(key, in_channel, out_channel):
    """PyTorch-default Conv2d init (uniform +-1/sqrt(fan_in)); weights bf16."""
    ks = jax.random.split(key, 4)

    def conv_init(kw, kb, ci, co):
        bound = 1.0 / math.sqrt(ci * 9)
        wgt = jax.random.uniform(kw, (3, 3, ci, co), jnp.float32, -bound, bound)
        b = jax.random.uniform(kb, (co,), jnp.float32, -bound, bound)
        return wgt.astype(jnp.bfloat16), b

    w1, b1 = conv_init(ks[0], ks[1], in_channel, out_channel)
    w2, b2 = conv_init(ks[2], ks[3], out_channel, out_channel)
    return dict(w1=w1, b1=b1, w2=w2, b2=b2)


def _conv_block_ref(x_nchw, params, pad, activation):
    """Pure-JAX (XLA conv) reference, f32 math on bf16-quantized inputs."""
    dn = ("NHWC", "HWIO", "NHWC")
    hi = jax.lax.Precision.HIGHEST
    x = jnp.transpose(x_nchw, (0, 2, 3, 1)).astype(jnp.bfloat16).astype(jnp.float32)
    w1 = params["w1"].astype(jnp.float32)
    w2 = params["w2"].astype(jnp.float32)
    y = jax.lax.conv_general_dilated(x, w1, (1, 1), [(pad, pad)] * 2,
                                     dimension_numbers=dn, precision=hi)
    y = y + params["b1"].astype(jnp.float32)
    y = jnp.maximum(y, 0.0) if activation == "relu" else y * jax.nn.sigmoid(y)
    y = jax.lax.conv_general_dilated(y, w2, (1, 1), [(pad, pad)] * 2,
                                     dimension_numbers=dn, precision=hi)
    y = y + params["b2"].astype(jnp.float32)
    return jnp.transpose(y, (0, 3, 1, 2))


# ------------------------------ demo ----------------------------------------

if __name__ == "__main__":
    key = jax.random.PRNGKey(0)
    kx, kp = jax.random.split(key)
    N, CIN, COUT, H, W = 2, 4, 8, 16, 16

    x = jax.random.normal(kx, (N, CIN, H, W), jnp.float32)
    params = init_conv_block_params(kp, CIN, COUT)

    # pad=1, relu.
    fwd = jax.jit(functools.partial(conv_block_forward, pad=1, activation="relu"))
    y = fwd(x, params)
    jax.block_until_ready(y)
    assert y.shape == (N, COUT, H, W), y.shape
    y32 = y.astype(jnp.float32)
    assert bool(jnp.isfinite(y32).all())
    y_ref = _conv_block_ref(x, params, 1, "relu")
    err = float(jnp.max(jnp.abs(y32 - y_ref)))
    assert err < 6e-2, f"pad=1/relu: max abs error vs reference: {err}"

    # pad=0 (module default), swish — exercises the unpadded path + EUP recip.
    fwd0 = jax.jit(functools.partial(conv_block_forward, pad=0, activation="swish"))
    y0 = fwd0(x, params)
    jax.block_until_ready(y0)
    assert y0.shape == (N, COUT, H - 4, W - 4), y0.shape
    y0_32 = y0.astype(jnp.float32)
    assert bool(jnp.isfinite(y0_32).all())
    y0_ref = _conv_block_ref(x, params, 0, "swish")
    err0 = float(jnp.max(jnp.abs(y0_32 - y0_ref)))
    assert err0 < 6e-2, f"pad=0/swish: max abs error vs reference: {err0}"

    print("KERNEL_OK")
</pallas_src>

<mosaic_0001>
module attributes {stable_mosaic.version = 11 : i64} {
  func.func @_conv_block_kernel(%arg0: i32, %arg1: memref<1x342x4xbf16, #tpu.memory_space<vmem>>, %arg2: memref<36x128xbf16, #tpu.memory_space<vmem>>, %arg3: memref<1x128xf32, #tpu.memory_space<vmem>>, %arg4: memref<9x128x128xbf16, #tpu.memory_space<vmem>>, %arg5: memref<1x128xf32, #tpu.memory_space<vmem>>, %arg6: memref<1x288x128xbf16, #tpu.memory_space<vmem>>, %arg7: memref<342x128xbf16, #tpu.memory_space<vmem>>, %arg8: memref<288x128xf32, #tpu.memory_space<vmem>>, %arg9: memref<288x36xbf16, #tpu.memory_space<vmem>>) attributes {dimension_semantics = [#tpu.dimension_semantics<parallel>], iteration_bounds = array<i64: 2>, scalar_prefetch = 0 : i64, scratch_operands = 3 : i64, tpu.core_type = #tpu.core_type<tc>, window_params = [{transform_indices = @transform_0, window_bounds = array<i64: 1, 342, 4>}, {pipeline_mode = #tpu.pipeline_mode<synchronous>, transform_indices = @transform_1, window_bounds = array<i64: 36, 128>}, {pipeline_mode = #tpu.pipeline_mode<synchronous>, transform_indices = @transform_2, window_bounds = array<i64: 1, 128>}, {pipeline_mode = #tpu.pipeline_mode<synchronous>, transform_indices = @transform_3, window_bounds = array<i64: 9, 128, 128>}, {pipeline_mode = #tpu.pipeline_mode<synchronous>, transform_indices = @transform_4, window_bounds = array<i64: 1, 128>}, {transform_indices = @transform_5, window_bounds = array<i64: 1, 288, 128>}]} {
    %c0 = arith.constant 0 : index
    %c0_0 = arith.constant 0 : index
    %c0_1 = arith.constant 0 : index
    %0 = vector.load %arg1[%c0, %c0_0, %c0_1] : memref<1x342x4xbf16, #tpu.memory_space<vmem>>, vector<1x288x4xbf16>
    %1 = vector.shape_cast %0 : vector<1x288x4xbf16> to vector<288x4xbf16>
    %c0_2 = arith.constant 0 : index
    %c0_3 = arith.constant 0 : index
    %2 = vector.load %arg9[%c0_2, %c0_3] : memref<288x36xbf16, #tpu.memory_space<vmem>>, vector<288x4xbf16>
    tpu.vector_store %arg9[%c0_2, %c0_3], %1 {strides = array<i32>} : memref<288x36xbf16, #tpu.memory_space<vmem>>, vector<288x4xbf16>,
    %c0_4 = arith.constant 0 : index
    %c1 = arith.constant 1 : index
    %c0_5 = arith.constant 0 : index
    %3 = vector.load %arg1[%c0_4, %c1, %c0_5] : memref<1x342x4xbf16, #tpu.memory_space<vmem>>, vector<1x288x4xbf16>
    %4 = vector.shape_cast %3 : vector<1x288x4xbf16> to vector<288x4xbf16>
    %c0_6 = arith.constant 0 : index
    %c4 = arith.constant 4 : index
    %5 = vector.load %arg9[%c0_6, %c4] : memref<288x36xbf16, #tpu.memory_space<vmem>>, vector<288x4xbf16>
    tpu.vector_store %arg9[%c0_6, %c4], %4 {strides = array<i32>} : memref<288x36xbf16, #tpu.memory_space<vmem>>, vector<288x4xbf16>,
    %c0_7 = arith.constant 0 : index
    %c2 = arith.constant 2 : index
    %c0_8 = arith.constant 0 : index
    %6 = vector.load %arg1[%c0_7, %c2, %c0_8] : memref<1x342x4xbf16, #tpu.memory_space<vmem>>, vector<1x288x4xbf16>
    %7 = vector.shape_cast %6 : vector<1x288x4xbf16> to vector<288x4xbf16>
    %c0_9 = arith.constant 0 : index
    %c8 = arith.constant 8 : index
    %8 = vector.load %arg9[%c0_9, %c8] : memref<288x36xbf16, #tpu.memory_space<vmem>>, vector<288x4xbf16>
    tpu.vector_store %arg9[%c0_9, %c8], %7 {strides = array<i32>} : memref<288x36xbf16, #tpu.memory_space<vmem>>, vector<288x4xbf16>,
    %c0_10 = arith.constant 0 : index
    %c18 = arith.constant 18 : index
    %c0_11 = arith.constant 0 : index
    %9 = vector.load %arg1[%c0_10, %c18, %c0_11] : memref<1x342x4xbf16, #tpu.memory_space<vmem>>, vector<1x288x4xbf16>
    %10 = vector.shape_cast %9 : vector<1x288x4xbf16> to vector<288x4xbf16>
    %c0_12 = arith.constant 0 : index
    %c12 = arith.constant 12 : index
    %11 = vector.load %arg9[%c0_12, %c12] : memref<288x36xbf16, #tpu.memory_space<vmem>>, vector<288x4xbf16>
    tpu.vector_store %arg9[%c0_12, %c12], %10 {strides = array<i32>} : memref<288x36xbf16, #tpu.memory_space<vmem>>, vector<288x4xbf16>,
    %c0_13 = arith.constant 0 : index
    %c19 = arith.constant 19 : index
    %c0_14 = arith.constant 0 : index
    %12 = vector.load %arg1[%c0_13, %c19, %c0_14] : memref<1x342x4xbf16, #tpu.memory_space<vmem>>, vector<1x288x4xbf16>
    %13 = vector.shape_cast %12 : vector<1x288x4xbf16> to vector<288x4xbf16>
    %c0_15 = arith.constant 0 : index
    %c16 = arith.constant 16 : index
    %14 = vector.load %arg9[%c0_15, %c16] : memref<288x36xbf16, #tpu.memory_space<vmem>>, vector<288x4xbf16>
    tpu.vector_store %arg9[%c0_15, %c16], %13 {strides = array<i32>} : memref<288x36xbf16, #tpu.memory_space<vmem>>, vector<288x4xbf16>,
    %c0_16 = arith.constant 0 : index
    %c20 = arith.constant 20 : index
    %c0_17 = arith.constant 0 : index
    %15 = vector.load %arg1[%c0_16, %c20, %c0_17] : memref<1x342x4xbf16, #tpu.memory_space<vmem>>, vector<1x288x4xbf16>
    %16 = vector.shape_cast %15 : vector<1x288x4xbf16> to vector<288x4xbf16>
    %c0_18 = arith.constant 0 : index
    %c20_19 = arith.constant 20 : index
    %17 = vector.load %arg9[%c0_18, %c20_19] : memref<288x36xbf16, #tpu.memory_space<vmem>>, vector<288x4xbf16>
    tpu.vector_store %arg9[%c0_18, %c20_19], %16 {strides = array<i32>} : memref<288x36xbf16, #tpu.memory_space<vmem>>, vector<288x4xbf16>,
    %c0_20 = arith.constant 0 : index
    %c36 = arith.constant 36 : index
    %c0_21 = arith.constant 0 : index
    %18 = vector.load %arg1[%c0_20, %c36, %c0_21] : memref<1x342x4xbf16, #tpu.memory_space<vmem>>, vector<1x288x4xbf16>
    %19 = vector.shape_cast %18 : vector<1x288x4xbf16> to vector<288x4xbf16>
    %c0_22 = arith.constant 0 : index
    %c24 = arith.constant 24 : index
    %20 = vector.load %arg9[%c0_22, %c24] : memref<288x36xbf16, #tpu.memory_space<vmem>>, vector<288x4xbf16>
    tpu.vector_store %arg9[%c0_22, %c24], %19 {strides = array<i32>} : memref<288x36xbf16, #tpu.memory_space<vmem>>, vector<288x4xbf16>,
    %c0_23 = arith.constant 0 : index
    %c37 = arith.constant 37 : index
    %c0_24 = arith.constant 0 : index
    %21 = vector.load %arg1[%c0_23, %c37, %c0_24] : memref<1x342x4xbf16, #tpu.memory_space<vmem>>, vector<1x288x4xbf16>
    %22 = vector.shape_cast %21 : vector<1x288x4xbf16> to vector<288x4xbf16>
    %c0_25 = arith.constant 0 : index
    %c28 = arith.constant 28 : index
    %23 = vector.load %arg9[%c0_25, %c28] : memref<288x36xbf16, #tpu.memory_space<vmem>>, vector<288x4xbf16>
    tpu.vector_store %arg9[%c0_25, %c28], %22 {strides = array<i32>} : memref<288x36xbf16, #tpu.memory_space<vmem>>, vector<288x4xbf16>,
    %c0_26 = arith.constant 0 : index
    %c38 = arith.constant 38 : index
    %c0_27 = arith.constant 0 : index
    %24 = vector.load %arg1[%c0_26, %c38, %c0_27] : memref<1x342x4xbf16, #tpu.memory_space<vmem>>, vector<1x288x4xbf16>
    %25 = vector.shape_cast %24 : vector<1x288x4xbf16> to vector<288x4xbf16>
    %c0_28 = arith.constant 0 : index
    %c32 = arith.constant 32 : index
    %26 = vector.load %arg9[%c0_28, %c32] : memref<288x36xbf16, #tpu.memory_space<vmem>>, vector<288x4xbf16>
    tpu.vector_store %arg9[%c0_28, %c32], %25 {strides = array<i32>} : memref<288x36xbf16, #tpu.memory_space<vmem>>, vector<288x4xbf16>,
    %c0_29 = arith.constant 0 : index
    %c0_30 = arith.constant 0 : index
    %27 = vector.load %arg9[%c0_29, %c0_30] : memref<288x36xbf16, #tpu.memory_space<vmem>>, vector<288x36xbf16>
    %c0_31 = arith.constant 0 : index
    %c0_32 = arith.constant 0 : index
    %28 = vector.load %arg2[%c0_31, %c0_32] : memref<36x128xbf16, #tpu.memory_space<vmem>>, vector<36x128xbf16>
    %cst = arith.constant dense<0.000000e+00> : vector<288x128xf32>
    %29 = tpu.matmul %27, %28, %cst {dimension_numbers = #tpu.dot_dimension_numbers<[1], [0], [0], [1], [0, 0, 1, 1], [], []>} : vector<288x36xbf16>, vector<36x128xbf16>, vector<288x128xf32> -> vector<288x128xf32>
    %c0_33 = arith.constant 0 : index
    %c0_34 = arith.constant 0 : index
    %30 = vector.load %arg3[%c0_33, %c0_34] : memref<1x128xf32, #tpu.memory_space<vmem>>, vector<1x128xf32>
    %31 = vector.broadcast %30 : vector<1x128xf32> to vector<288x128xf32>
    %32 = arith.addf %29, %31 : vector<288x128xf32>
    %cst_35 = arith.constant 0.000000e+00 : f32
    %33 = vector.broadcast %cst_35 : f32 to vector<288x128xf32>
    %34 = arith.maximumf %32, %33 : vector<288x128xf32>
    %35 = tpu.iota {dimensions = array<i32: 0>} : vector<288x1xi32>
    %c18_i32 = arith.constant 18 : i32
    %c0_i32 = arith.constant 0 : i32
    %36 = arith.cmpi eq, %c18_i32, %c0_i32 : i32
    %c1_i32 = arith.constant 1 : i32
    %37 = arith.select %36, %c1_i32, %c18_i32 : i32
    %38 = vector.broadcast %37 : i32 to vector<288x1xi32>
    %39 = arith.remsi %35, %38 : vector<288x1xi32>
    %c0_i32_36 = arith.constant 0 : i32
    %40 = vector.broadcast %c0_i32_36 : i32 to vector<288x1xi32>
    %41 = arith.cmpi ne, %39, %40 : vector<288x1xi32>
    %c0_i32_37 = arith.constant 0 : i32
    %42 = vector.broadcast %c0_i32_37 : i32 to vector<288x1xi32>
    %43 = arith.cmpi slt, %39, %42 : vector<288x1xi32>
    %c0_i32_38 = arith.constant 0 : i32
    %44 = arith.cmpi slt, %37, %c0_i32_38 : i32
    %45 = vector.broadcast %44 : i1 to vector<288x1xi1>
    %46 = vector.broadcast %45 : vector<288x1xi1> to vector<288x1xi1>
    %47 = arith.xori %43, %46 : vector<288x1xi1>
    %48 = arith.andi %47, %41 : vector<288x1xi1>
    %49 = vector.broadcast %37 : i32 to vector<288x1xi32>
    %50 = arith.addi %39, %49 : vector<288x1xi32>
    %51 = arith.select %48, %50, %39 : vector<288x1xi1>, vector<288x1xi32>
    %c16_i32 = arith.constant 16 : i32
    %52 = vector.broadcast %c16_i32 : i32 to vector<288x1xi32>
    %53 = arith.cmpi slt, %51, %52 : vector<288x1xi32>
    %cst_39 = arith.constant 0.000000e+00 : f32
    %54 = vector.shape_cast %53 : vector<288x1xi1> to vector<288x1xi1>
    %55 = vector.broadcast %54 : vector<288x1xi1> to vector<288x128xi1>
    %56 = vector.broadcast %cst_39 : f32 to vector<288x128xf32>
    %57 = arith.select %55, %34, %56 : vector<288x128xi1>, vector<288x128xf32>
    %cst_40 = arith.constant 0.000000e+00 : bf16
    %58 = vector.broadcast %cst_40 : bf16 to vector<19x128xbf16>
    %c0_41 = arith.constant 0 : index
    %c0_42 = arith.constant 0 : index
    %59 = vector.load %arg7[%c0_41, %c0_42] : memref<342x128xbf16, #tpu.memory_space<vmem>>, vector<19x128xbf16>
    tpu.vector_store %arg7[%c0_41, %c0_42], %58 {strides = array<i32>} : memref<342x128xbf16, #tpu.memory_space<vmem>>, vector<19x128xbf16>,
    %cst_43 = arith.constant 0.000000e+00 : bf16
    %60 = vector.broadcast %cst_43 : bf16 to vector<35x128xbf16>
    %c307 = arith.constant 307 : index
    %c0_44 = arith.constant 0 : index
    %61 = vector.load %arg7[%c307, %c0_44] : memref<342x128xbf16, #tpu.memory_space<vmem>>, vector<35x128xbf16>
    tpu.vector_store %arg7[%c307, %c0_44], %60 {strides = array<i32>} : memref<342x128xbf16, #tpu.memory_space<vmem>>, vector<35x128xbf16>,
    %62 = arith.truncf %57 : vector<288x128xf32> to vector<288x128xbf16>
    %c19_45 = arith.constant 19 : index
    %c0_46 = arith.constant 0 : index
    %63 = vector.load %arg7[%c19_45, %c0_46] : memref<342x128xbf16, #tpu.memory_space<vmem>>, vector<288x128xbf16>
    tpu.vector_store %arg7[%c19_45, %c0_46], %62 {strides = array<i32>} : memref<342x128xbf16, #tpu.memory_space<vmem>>, vector<288x128xbf16>,
    %c0_47 = arith.constant 0 : index
    %c0_48 = arith.constant 0 : index
    %64 = vector.load %arg7[%c0_47, %c0_48] : memref<342x128xbf16, #tpu.memory_space<vmem>>, vector<288x128xbf16>
    %c0_49 = arith.constant 0 : index
    %c0_50 = arith.constant 0 : index
    %c0_51 = arith.constant 0 : index
    %65 = vector.load %arg4[%c0_49, %c0_50, %c0_51] : memref<9x128x128xbf16, #tpu.memory_space<vmem>>, vector<1x128x128xbf16>
    %66 = vector.shape_cast %65 : vector<1x128x128xbf16> to vector<128x128xbf16>
    %cst_52 = arith.constant dense<0.000000e+00> : vector<288x128xf32>
    %67 = tpu.matmul %64, %66, %cst_52 {dimension_numbers = #tpu.dot_dimension_numbers<[1], [0], [0], [1], [0, 0, 1, 1], [], []>} : vector<288x128xbf16>, vector<128x128xbf16>, vector<288x128xf32> -> vector<288x128xf32>
    %c0_53 = arith.constant 0 : index
    %c0_54 = arith.constant 0 : index
    %68 = vector.load %arg8[%c0_53, %c0_54] : memref<288x128xf32, #tpu.memory_space<vmem>>, vector<288x128xf32>
    tpu.vector_store %arg8[%c0_53, %c0_54], %67 {strides = array<i32>} : memref<288x128xf32, #tpu.memory_space<vmem>>, vector<288x128xf32>,
    %c1_55 = arith.constant 1 : index
    %c0_56 = arith.constant 0 : index
    %69 = vector.load %arg7[%c1_55, %c0_56] : memref<342x128xbf16, #tpu.memory_space<vmem>>, vector<288x128xbf16>
    %c1_57 = arith.constant 1 : index
    %c0_58 = arith.constant 0 : index
    %c0_59 = arith.constant 0 : index
    %70 = vector.load %arg4[%c1_57, %c0_58, %c0_59] : memref<9x128x128xbf16, #tpu.memory_space<vmem>>, vector<1x128x128xbf16>
    %71 = vector.shape_cast %70 : vector<1x128x128xbf16> to vector<128x128xbf16>
    %cst_60 = arith.constant dense<0.000000e+00> : vector<288x128xf32>
    %72 = tpu.matmul %69, %71, %cst_60 {dimension_numbers = #tpu.dot_dimension_numbers<[1], [0], [0], [1], [0, 0, 1, 1], [], []>} : vector<288x128xbf16>, vector<128x128xbf16>, vector<288x128xf32> -> vector<288x128xf32>
    %c0_61 = arith.constant 0 : index
    %c0_62 = arith.constant 0 : index
    %73 = vector.load %arg8[%c0_61, %c0_62] : memref<288x128xf32, #tpu.memory_space<vmem>>, vector<288x128xf32>
    %74 = arith.addf %73, %72 : vector<288x128xf32>
    %c0_63 = arith.constant 0 : index
    %c0_64 = arith.constant 0 : index
    %75 = vector.load %arg8[%c0_63, %c0_64] : memref<288x128xf32, #tpu.memory_space<vmem>>, vector<288x128xf32>
    tpu.vector_store %arg8[%c0_63, %c0_64], %74 {strides = array<i32>} : memref<288x128xf32, #tpu.memory_space<vmem>>, vector<288x128xf32>,
    %c2_65 = arith.constant 2 : index
    %c0_66 = arith.constant 0 : index
    %76 = vector.load %arg7[%c2_65, %c0_66] : memref<342x128xbf16, #tpu.memory_space<vmem>>, vector<288x128xbf16>
    %c2_67 = arith.constant 2 : index
    %c0_68 = arith.constant 0 : index
    %c0_69 = arith.constant 0 : index
    %77 = vector.load %arg4[%c2_67, %c0_68, %c0_69] : memref<9x128x128xbf16, #tpu.memory_space<vmem>>, vector<1x128x128xbf16>
    %78 = vector.shape_cast %77 : vector<1x128x128xbf16> to vector<128x128xbf16>
    %cst_70 = arith.constant dense<0.000000e+00> : vector<288x128xf32>
    %79 = tpu.matmul %76, %78, %cst_70 {dimension_numbers = #tpu.dot_dimension_numbers<[1], [0], [0], [1], [0, 0, 1, 1], [], []>} : vector<288x128xbf16>, vector<128x128xbf16>, vector<288x128xf32> -> vector<288x128xf32>
    %c0_71 = arith.constant 0 : index
    %c0_72 = arith.constant 0 : index
    %80 = vector.load %arg8[%c0_71, %c0_72] : memref<288x128xf32, #tpu.memory_space<vmem>>, vector<288x128xf32>
    %81 = arith.addf %80, %79 : vector<288x128xf32>
    %c0_73 = arith.constant 0 : index
    %c0_74 = arith.constant 0 : index
    %82 = vector.load %arg8[%c0_73, %c0_74] : memref<288x128xf32, #tpu.memory_space<vmem>>, vector<288x128xf32>
    tpu.vector_store %arg8[%c0_73, %c0_74], %81 {strides = array<i32>} : memref<288x128xf32, #tpu.memory_space<vmem>>, vector<288x128xf32>,
    %c18_75 = arith.constant 18 : index
    %c0_76 = arith.constant 0 : index
    %83 = vector.load %arg7[%c18_75, %c0_76] : memref<342x128xbf16, #tpu.memory_space<vmem>>, vector<288x128xbf16>
    %c3 = arith.constant 3 : index
    %c0_77 = arith.constant 0 : index
    %c0_78 = arith.constant 0 : index
    %84 = vector.load %arg4[%c3, %c0_77, %c0_78] : memref<9x128x128xbf16, #tpu.memory_space<vmem>>, vector<1x128x128xbf16>
    %85 = vector.shape_cast %84 : vector<1x128x128xbf16> to vector<128x128xbf16>
    %cst_79 = arith.constant dense<0.000000e+00> : vector<288x128xf32>
    %86 = tpu.matmul %83, %85, %cst_79 {dimension_numbers = #tpu.dot_dimension_numbers<[1], [0], [0], [1], [0, 0, 1, 1], [], []>} : vector<288x128xbf16>, vector<128x128xbf16>, vector<288x128xf32> -> vector<288x128xf32>
    %c0_80 = arith.constant 0 : index
    %c0_81 = arith.constant 0 : index
    %87 = vector.load %arg8[%c0_80, %c0_81] : memref<288x128xf32, #tpu.memory_space<vmem>>, vector<288x128xf32>
    %88 = arith.addf %87, %86 : vector<288x128xf32>
    %c0_82 = arith.constant 0 : index
    %c0_83 = arith.constant 0 : index
    %89 = vector.load %arg8[%c0_82, %c0_83] : memref<288x128xf32, #tpu.memory_space<vmem>>, vector<288x128xf32>
    tpu.vector_store %arg8[%c0_82, %c0_83], %88 {strides = array<i32>} : memref<288x128xf32, #tpu.memory_space<vmem>>, vector<288x128xf32>,
    %c19_84 = arith.constant 19 : index
    %c0_85 = arith.constant 0 : index
    %90 = vector.load %arg7[%c19_84, %c0_85] : memref<342x128xbf16, #tpu.memory_space<vmem>>, vector<288x128xbf16>
    %c4_86 = arith.constant 4 : index
    %c0_87 = arith.constant 0 : index
    %c0_88 = arith.constant 0 : index
    %91 = vector.load %arg4[%c4_86, %c0_87, %c0_88] : memref<9x128x128xbf16, #tpu.memory_space<vmem>>, vector<1x128x128xbf16>
    %92 = vector.shape_cast %91 : vector<1x128x128xbf16> to vector<128x128xbf16>
    %cst_89 = arith.constant dense<0.000000e+00> : vector<288x128xf32>
    %93 = tpu.matmul %90, %92, %cst_89 {dimension_numbers = #tpu.dot_dimension_numbers<[1], [0], [0], [1], [0, 0, 1, 1], [], []>} : vector<288x128xbf16>, vector<128x128xbf16>, vector<288x128xf32> -> vector<288x128xf32>
    %c0_90 = arith.constant 0 : index
    %c0_91 = arith.constant 0 : index
    %94 = vector.load %arg8[%c0_90, %c0_91] : memref<288x128xf32, #tpu.memory_space<vmem>>, vector<288x128xf32>
    %95 = arith.addf %94, %93 : vector<288x128xf32>
    %c0_92 = arith.constant 0 : index
    %c0_93 = arith.constant 0 : index
    %96 = vector.load %arg8[%c0_92, %c0_93] : memref<288x128xf32, #tpu.memory_space<vmem>>, vector<288x128xf32>
    tpu.vector_store %arg8[%c0_92, %c0_93], %95 {strides = array<i32>} : memref<288x128xf32, #tpu.memory_space<vmem>>, vector<288x128xf32>,
    %c20_94 = arith.constant 20 : index
    %c0_95 = arith.constant 0 : index
    %97 = vector.load %arg7[%c20_94, %c0_95] : memref<342x128xbf16, #tpu.memory_space<vmem>>, vector<288x128xbf16>
    %c5 = arith.constant 5 : index
    %c0_96 = arith.constant 0 : index
    %c0_97 = arith.constant 0 : index
    %98 = vector.load %arg4[%c5, %c0_96, %c0_97] : memref<9x128x128xbf16, #tpu.memory_space<vmem>>, vector<1x128x128xbf16>
    %99 = vector.shape_cast %98 : vector<1x128x128xbf16> to vector<128x128xbf16>
    %cst_98 = arith.constant dense<0.000000e+00> : vector<288x128xf32>
    %100 = tpu.matmul %97, %99, %cst_98 {dimension_numbers = #tpu.dot_dimension_numbers<[1], [0], [0], [1], [0, 0, 1, 1], [], []>} : vector<288x128xbf16>, vector<128x128xbf16>, vector<288x128xf32> -> vector<288x128xf32>
    %c0_99 = arith.constant 0 : index
    %c0_100 = arith.constant 0 : index
    %101 = vector.load %arg8[%c0_99, %c0_100] : memref<288x128xf32, #tpu.memory_space<vmem>>, vector<288x128xf32>
    %102 = arith.addf %101, %100 : vector<288x128xf32>
    %c0_101 = arith.constant 0 : index
    %c0_102 = arith.constant 0 : index
    %103 = vector.load %arg8[%c0_101, %c0_102] : memref<288x128xf32, #tpu.memory_space<vmem>>, vector<288x128xf32>
    tpu.vector_store %arg8[%c0_101, %c0_102], %102 {strides = array<i32>} : memref<288x128xf32, #tpu.memory_space<vmem>>, vector<288x128xf32>,
    %c36_103 = arith.constant 36 : index
    %c0_104 = arith.constant 0 : index
    %104 = vector.load %arg7[%c36_103, %c0_104] : memref<342x128xbf16, #tpu.memory_space<vmem>>, vector<288x128xbf16>
    %c6 = arith.constant 6 : index
    %c0_105 = arith.constant 0 : index
    %c0_106 = arith.constant 0 : index
    %105 = vector.load %arg4[%c6, %c0_105, %c0_106] : memref<9x128x128xbf16, #tpu.memory_space<vmem>>, vector<1x128x128xbf16>
    %106 = vector.shape_cast %105 : vector<1x128x128xbf16> to vector<128x128xbf16>
    %cst_107 = arith.constant dense<0.000000e+00> : vector<288x128xf32>
    %107 = tpu.matmul %104, %106, %cst_107 {dimension_numbers = #tpu.dot_dimension_numbers<[1], [0], [0], [1], [0, 0, 1, 1], [], []>} : vector<288x128xbf16>, vector<128x128xbf16>, vector<288x128xf32> -> vector<288x128xf32>
    %c0_108 = arith.constant 0 : index
    %c0_109 = arith.constant 0 : index
    %108 = vector.load %arg8[%c0_108, %c0_109] : memref<288x128xf32, #tpu.memory_space<vmem>>, vector<288x128xf32>
    %109 = arith.addf %108, %107 : vector<288x128xf32>
    %c0_110 = arith.constant 0 : index
    %c0_111 = arith.constant 0 : index
    %110 = vector.load %arg8[%c0_110, %c0_111] : memref<288x128xf32, #tpu.memory_space<vmem>>, vector<288x128xf32>
    tpu.vector_store %arg8[%c0_110, %c0_111], %109 {strides = array<i32>} : memref<288x128xf32, #tpu.memory_space<vmem>>, vector<288x128xf32>,
    %c37_112 = arith.constant 37 : index
    %c0_113 = arith.constant 0 : index
    %111 = vector.load %arg7[%c37_112, %c0_113] : memref<342x128xbf16, #tpu.memory_space<vmem>>, vector<288x128xbf16>
    %c7 = arith.constant 7 : index
    %c0_114 = arith.constant 0 : index
    %c0_115 = arith.constant 0 : index
    %112 = vector.load %arg4[%c7, %c0_114, %c0_115] : memref<9x128x128xbf16, #tpu.memory_space<vmem>>, vector<1x128x128xbf16>
    %113 = vector.shape_cast %112 : vector<1x128x128xbf16> to vector<128x128xbf16>
    %cst_116 = arith.constant dense<0.000000e+00> : vector<288x128xf32>
    %114 = tpu.matmul %111, %113, %cst_116 {dimension_numbers = #tpu.dot_dimension_numbers<[1], [0], [0], [1], [0, 0, 1, 1], [], []>} : vector<288x128xbf16>, vector<128x128xbf16>, vector<288x128xf32> -> vector<288x128xf32>
    %c0_117 = arith.constant 0 : index
    %c0_118 = arith.constant 0 : index
    %115 = vector.load %arg8[%c0_117, %c0_118] : memref<288x128xf32, #tpu.memory_space<vmem>>, vector<288x128xf32>
    %116 = arith.addf %115, %114 : vector<288x128xf32>
    %c0_119 = arith.constant 0 : index
    %c0_120 = arith.constant 0 : index
    %117 = vector.load %arg8[%c0_119, %c0_120] : memref<288x128xf32, #tpu.memory_space<vmem>>, vector<288x128xf32>
    tpu.vector_store %arg8[%c0_119, %c0_120], %116 {strides = array<i32>} : memref<288x128xf32, #tpu.memory_space<vmem>>, vector<288x128xf32>,
    %c38_121 = arith.constant 38 : index
    %c0_122 = arith.constant 0 : index
    %118 = vector.load %arg7[%c38_121, %c0_122] : memref<342x128xbf16, #tpu.memory_space<vmem>>, vector<288x128xbf16>
    %c8_123 = arith.constant 8 : index
    %c0_124 = arith.constant 0 : index
    %c0_125 = arith.constant 0 : index
    %119 = vector.load %arg4[%c8_123, %c0_124, %c0_125] : memref<9x128x128xbf16, #tpu.memory_space<vmem>>, vector<1x128x128xbf16>
    %120 = vector.shape_cast %119 : vector<1x128x128xbf16> to vector<128x128xbf16>
    %cst_126 = arith.constant dense<0.000000e+00> : vector<288x128xf32>
    %121 = tpu.matmul %118, %120, %cst_126 {dimension_numbers = #tpu.dot_dimension_numbers<[1], [0], [0], [1], [0, 0, 1, 1], [], []>} : vector<288x128xbf16>, vector<128x128xbf16>, vector<288x128xf32> -> vector<288x128xf32>
    %c0_127 = arith.constant 0 : index
    %c0_128 = arith.constant 0 : index
    %122 = vector.load %arg8[%c0_127, %c0_128] : memref<288x128xf32, #tpu.memory_space<vmem>>, vector<288x128xf32>
    %123 = arith.addf %122, %121 : vector<288x128xf32>
    %c0_129 = arith.constant 0 : index
    %c0_130 = arith.constant 0 : index
    %124 = vector.load %arg8[%c0_129, %c0_130] : memref<288x128xf32, #tpu.memory_space<vmem>>, vector<288x128xf32>
    tpu.vector_store %arg8[%c0_129, %c0_130], %123 {strides = array<i32>} : memref<288x128xf32, #tpu.memory_space<vmem>>, vector<288x128xf32>,
    %c0_131 = arith.constant 0 : index
    %c0_132 = arith.constant 0 : index
    %125 = vector.load %arg8[%c0_131, %c0_132] : memref<288x128xf32, #tpu.memory_space<vmem>>, vector<288x128xf32>
    %c0_133 = arith.constant 0 : index
    %c0_134 = arith.constant 0 : index
    %126 = vector.load %arg5[%c0_133, %c0_134] : memref<1x128xf32, #tpu.memory_space<vmem>>, vector<1x128xf32>
    %127 = vector.broadcast %126 : vector<1x128xf32> to vector<288x128xf32>
    %128 = arith.addf %125, %127 : vector<288x128xf32>
    %129 = arith.truncf %128 : vector<288x128xf32> to vector<288x128xbf16>
    %c0_135 = arith.constant 0 : index
    %c0_136 = arith.constant 0 : index
    %c0_137 = arith.constant 0 : index
    %130 = vector.load %arg6[%c0_135, %c0_136, %c0_137] : memref<1x288x128xbf16, #tpu.memory_space<vmem>>, vector<1x288x128xbf16>
    %131 = vector.shape_cast %130 : vector<1x288x128xbf16> to vector<288x128xbf16>
    %132 = vector.shape_cast %129 : vector<288x128xbf16> to vector<1x288x128xbf16>
    tpu.vector_store %arg6[%c0_135, %c0_136, %c0_137], %132 {strides = array<i32>} : memref<1x288x128xbf16, #tpu.memory_space<vmem>>, vector<1x288x128xbf16>,
    return
  }
  func.func @transform_0(%arg0: i32) -> (i32, i32, i32) {
    %c0_i32 = arith.constant 0 : i32
    %c0_i32_0 = arith.constant 0 : i32
    %c0_i32_1 = arith.constant 0 : i32
    return %arg0, %c0_i32, %c0_i32_0 : i32, i32, i32
  }
  func.func @transform_1(%arg0: i32) -> (i32, i32) {
    %c0_i32 = arith.constant 0 : i32
    %c0_i32_0 = arith.constant 0 : i32
    %c0_i32_1 = arith.constant 0 : i32
    return %c0_i32, %c0_i32_0 : i32, i32
  }
  func.func @transform_2(%arg0: i32) -> (i32, i32) {
    %c0_i32 = arith.constant 0 : i32
    %c0_i32_0 = arith.constant 0 : i32
    %c0_i32_1 = arith.constant 0 : i32
    return %c0_i32, %c0_i32_0 : i32, i32
  }
  func.func @transform_3(%arg0: i32) -> (i32, i32, i32) {
    %c0_i32 = arith.constant 0 : i32
    %c0_i32_0 = arith.constant 0 : i32
    %c0_i32_1 = arith.constant 0 : i32
    %c0_i32_2 = arith.constant 0 : i32
    return %c0_i32, %c0_i32_0, %c0_i32_1 : i32, i32, i32
  }
  func.func @transform_4(%arg0: i32) -> (i32, i32) {
    %c0_i32 = arith.constant 0 : i32
    %c0_i32_0 = arith.constant 0 : i32
    %c0_i32_1 = arith.constant 0 : i32
    return %c0_i32, %c0_i32_0 : i32, i32
  }
  func.func @transform_5(%arg0: i32) -> (i32, i32, i32) {
    %c0_i32 = arith.constant 0 : i32
    %c0_i32_0 = arith.constant 0 : i32
    %c0_i32_1 = arith.constant 0 : i32
    return %arg0, %c0_i32, %c0_i32_0 : i32, i32, i32
  }
}

</mosaic_0001>

<bundles_post_ra>
// kernel: conv_block_forward.1
= control target key start
LH: loop header
LB: loop body
LE: loop exit
PB: predicated region body
PF: predicated region fallthrough
CT: control target
= control target key end

     0   :  { %s12180_s18 = smov 0   ;;  %s14990_s0 = inlined_call_operand.vmem [shape: bf16[2,342,4], index: 0, kind: input, shape index: {}]   ;;  %s14991_s1 = inlined_call_operand.vmem [shape: bf16[36,128], index: 1, kind: input, shape index: {}]   ;;  %s14992_s2 = inlined_call_operand.vmem [shape: f32[1,128], index: 2, kind: input, shape index: {}]   ;;  %s14993_s3 = inlined_call_operand.vmem [shape: bf16[9,128,128], index: 3, kind: input, shape index: {}]   ;;  %s14994_s4 = inlined_call_operand.vmem [shape: f32[1,128], index: 4, kind: input, shape index: {}]   ;;  %s14995_s5 = inlined_call_operand.vmem [shape: bf16[2,288,128], index: 5, kind: output, shape index: {}]  }
   0x1 LB: > { %s9723_s19 = sadd.s32 4294967295, %s12139_s18   ;;  %p9727_p0 = scmp.ge.s32.totalorder %s12139_s18, 1  ;;  %s12139_s18 = sphi %s12180_s18, %s15_s18  }
   0x2   : > { %p187_p1 = scmp.lt.s32.totalorder %s12139_s18, 3 }
   0x4   : > { %p188_p2 = pnand %p9727_p0, %p187_p1 }
   0x5   : > { %p215_p3 = scmp.lt.s32.totalorder (!%p188_p2), %s9723_s19, 1  ;;  %vm15006_vm0 = vcmask (!%p188_p2), 1046528   ;;  %vm15009_vm1 = vcmask (!%p188_p2), 1045504   ;;  %s12141_s24 = smov (!%p188_p2), 12   ;;  %vm15010_vm2 = vsmask.f32 (!%p188_p2), 7424 }
   0x6   : > { %191 = sbr.rel (%p188_p2) target bundleno = 1192 (0x4a8), region = 40  ;;  %s12142_s25 = smov (!%p188_p2), 8   ;;  %vm14999_vm3 = vsmask.f32 (!%p188_p2), 6400  ;;  %vm15008_vm4 = vsmask.f32 (!%p188_p2), 5376 }
   0x7   : > { %s12143_s26 = smov (!%p188_p2), 20   ;;  %s12144_s27 = smov (!%p188_p2), 4   ;;  %vm15007_vm5 = vcmask (!%p188_p2), 1044480   ;;  %vm370_vm6 = vcmask (!%p188_p2), 31744   ;;  %vm2792_vm7 = vcmask (!%p188_p2), 1041408   ;;  %vm722_vm10 = vcmask (!%p188_p2), 64544  }
   0x8   : > { %s12145_s28 = smov (!%p188_p2), 16   ;;  %s12146_s29 = smov (!%p188_p2), 24   ;;  %vm14996_vm8 = vsmask.f32 (!%p188_p2), 1280  ;;  %vm15012_vm11 = vcmask (!%p188_p2), 97344   ;;  %vm15005_vm12 = vcmask (!%p188_p2), 130144  }
   0x9   : > { %s12147_s30 = smov (!%p188_p2), 28   ;;  %s12148_s6 = smov (!%p188_p2), 32   ;;  %vm12537_vm9 = vmand (!%p188_p2), %vm2792_vm7, %vm14996_vm8  ;;  %vm15004_vm13 = vcmask (!%p188_p2), 162944   ;;  %vm15003_vm14 = vcmask (!%p188_p2), 195744   ;;  %vm14998_vm15 = vcmask (!%p188_p2), 228544   ;;  %vm15013_vm8 = vcmask (!%p188_p2), 294144  }
   0xd   : > { %s15385_s19 = smov (!%p215_p3, %s9723_s19), 1 }
   0xe   : > { %s11616_s20 = smul.u32 172, %s15385_s19 }
  0x10   : > { %s12194_s23 = scalar_lea.vmem %s14990_s0, %s11616_s20 }
  0x11   : > { %v11707_v0 = vld [vmem:[%s12194_s23 + $0x8] sm:$0xfe]   ;;  %v11708_v1 = vld [vmem:[%s12194_s23 + $0x10] sm:$0xff]   ;;  %v11709_v4 = vld [vmem:[%s12194_s23] sm:$0xfe]  }
  0x12   : > { %v1112_v2 = vrot.slane %v11707_v0, 1  ;;  %v1113_v3 = vrot.slane %v11708_v1, 1  ;;  %v11710_v5 = vld [vmem:[%s12194_s23 + $0x8] sm:$0xff]   ;;  %v872_v7 = vrot.slane %v11709_v4, 1  ;;  %v11712_v8 = vld [vmem:[%s12194_s23 + $0x10] sm:$0xff]   ;;  %v12208_v13 = vld [vmem:[%s12194_s23 + $0x18] sm:$0xff]  }
  0x13   : > { %v873_v9 = vrot.slane %v11710_v5, 1  ;;  %v11711_v10 = vld [vmem:[%s12194_s23 + $0x8] sm:$0xfc]   ;;  %v12205_v11 = vld [vmem:[%s12194_s23 + $0x10] sm:$0xff]   ;;  %v1728_v12 = vrot.slane %v11712_v8, 2  ;;  %v11715_v17 = vld [vmem:[%s12194_s23] sm:$0xff]  }
  0x14   : > { %v1114_v6 = vsel %vm15006_vm0, %v1112_v2, %v1113_v3  ;;  %v1727_v15 = vrot.slane %v11711_v10, 2  ;;  %v875_v16 = vrot.slane %v12205_v11, 1  ;;  %v1115_v20 = vrot.slane %v12208_v13, 1  ;;  %v11716_v21 = vld [vmem:[%s12194_s23 + $0x8] sm:$0xff]   ;;  %v12222_v24 = vld [vmem:[%s12194_s23 + $0x18] sm:$0xff]   ;;  %v12225_v25 = vld [vmem:[%s12194_s23 + $0x10] sm:$0xff]  }
  0x15   : > { %1149 = vrot.lane.b32.xlu0 %v1114_v6, %s12141_s24  ;;  %v874_v14 = vsel %vm15006_vm0, %v872_v7, %v873_v9  ;;  %v521_v22 = vshrl.u32 %v11715_v17, 16  ;;  %v523_v23 = vshll.u32 %v11715_v17, 16  ;;  %v528_v26 = vshll.u32 %v11716_v21, 16  ;;  %v11719_v31 = vld [vmem:[%s12194_s23 + $0x10] sm:$0xff]   ;;  %v11720_v34 = vld [vmem:[%s12194_s23 + $0x18] sm:$0xff]   ;;  %v12242_v46 = vld [vmem:[%s12194_s23 + $0x20] sm:$0xff]  }
  0x16   : > { %909 = vrot.lane.b32.xlu1 %v874_v14, %s12142_s25  ;;  %v1729_v18 = vsel %vm15009_vm1, %v1727_v15, %v1728_v12  ;;  %v876_v19 = vsel %vm15006_vm0, %v873_v9, %v875_v16  ;;  %v532_v27 = vshrl.u32 %v11716_v21, 16  ;;  %v1730_v29 = vrot.slane %v12222_v24, 2  ;;  %v11723_v42 = vld [vmem:[%s12194_s23 + $0x18] sm:$0xff]   ;;  %v11721_v45 = vld [vmem:[%s12194_s23 + $0x8] sm:$0xfe]   ;;  %v11727_v4 = vld [vmem:[%s12194_s23 + $0x20] sm:$0xff]  }
  0x17   : > { %v525_v28 = vrot.slane %v523_v23, 1  ;;  %v536_v30 = vshll.u32 %v12225_v25, 16  ;;  %v1116_v32 = vsel %vm15006_vm0, %v1113_v3, %v1115_v20  ;;  %v530_v33 = vrot.slane %v528_v26, 1  ;;  %v11726_v51 = vld [vmem:[%s12194_s23 + $0x18] sm:$0xff]   ;;  %v11722_v57 = vld [vmem:[%s12194_s23 + $0x10] sm:$0xfc]  }
  0x18   : > { %v1362_v37 = vshrl.u32 %v11719_v31, 16  ;;  %v1365_v39 = vshll.u32 %v11719_v31, 16  ;;  %v1371_v40 = vshrl.u32 %v11720_v34, 16  ;;  %v1374_v41 = vshll.u32 %v11720_v34, 16  ;;  %v11725_v2 = vld [vmem:[%s12194_s23 + $0x10] sm:$0xfc]  }
  0x19   : > { %1764 = vrot.lane.b32.xlu0 %v1729_v18, %s12143_s26  ;;  %v526_v35 = vor.u32 %v525_v28, %v521_v22  ;;  %v12235_v36 = vrot.slane %v536_v30, 1  ;;  %v534_v38 = vor.u32 %v532_v27, %v530_v33  ;;  %v1731_v47 = vsel %vm15009_vm1, %v1728_v12, %v1730_v29  ;;  %v12262_v6 = vld [vmem:[%s12194_s23 + $0x18] sm:$0xff]   ;;  %v11728_v23 = vld [vmem:[%s12194_s23 + $0x10] sm:$0xf8]  }
  0x1a   : > { %911 = vrot.lane.b32.xlu1 %v876_v19, %s12142_s25  ;;  %v1364_v44 = vrot.slane %v1362_v37, 1  ;;  %v1367_v48 = vrot.slane %v1365_v39, 2  ;;  %v1373_v49 = vrot.slane %v1371_v40, 1  ;;  %v1376_v50 = vrot.slane %v1374_v41, 2  ;;  %v11730_v12 = vld [vmem:[%s12194_s23 + $0x18] sm:$0xff]   ;;  %v12281_v37 = vld [vmem:[%s12194_s23 + $0x20] sm:$0xff]  }
  0x1b   : > { %v531_v43 = vsel %vm15010_vm2, %v526_v35, %v530_v33  ;;  %v539_v52 = vsel %vm15010_vm2, %v534_v38, %v12235_v36  ;;  %v1354_v53 = vshrl.u32 %v11721_v45, 16  ;;  %v1357_v54 = vshll.u32 %v11721_v45, 16  ;;  %v12285_v40 = vld [vmem:[%s12194_s23 + $0x20] sm:$0xff]  }
  0x1c   : > { %v1368_v55 = vor.u32 %v1367_v48, %v1364_v44  ;;  %v12251_v56 = vor.u32 %v1376_v50, %v1373_v49  ;;  %v1968_v58 = vrot.slane %v11723_v42, 2  ;;  %v1970_v59 = vrot.slane %v12242_v46, 2  ;;  %v11733_v42 = vld [vmem:[%s12194_s23 + $0x18] sm:$0xff]  }
  0x1d   : > { %668 = vrot.lane.b32.xlu0 %v531_v43, %s12144_s27  ;;  %v1356_v60 = vrot.slane %v1354_v53, 1  ;;  %v1359_v61 = vrot.slane %v1357_v54, 2  ;;  %v1967_v63 = vrot.slane %v11722_v57, 2  ;;  %v2217_v0 = vshrl.u32 %v11726_v51, 16  ;;  %v12293_v43 = vld [vmem:[%s12194_s23 + $0x20] sm:$0xff]   ;;  %v11738_v54 = vld [vmem:[%s12194_s23 + $0x28] sm:$0xff]  }
  0x1e   : > { %1151 = vrot.lane.b32.xlu1 %v1116_v32, %s12141_s24  ;;  %v1378_v62 = vsel %vm14999_vm3, %v1368_v55, %v12251_v56  ;;  %v2220_v3 = vshll.u32 %v11726_v51, 16  ;;  %v2209_v8 = vshrl.u32 %v11725_v2, 16  ;;  %v2212_v9 = vshll.u32 %v11725_v2, 16  ;;  %v12303_v51 = vld [vmem:[%s12194_s23 + $0x28] sm:$0xff]  }
  0x1f   : > { %v1360_v1 = vor.u32 %v1359_v61, %v1356_v60  ;;  %v2219_v5 = vrot.slane %v2217_v0, 2  ;;  %v1971_v14 = vsel %vm15009_vm1, %v1968_v58, %v1970_v59  ;;  %v2226_v15 = vshrl.u32 %v11727_v4, 16 }
  0x20   : > { %v2222_v10 = vrot.slane %v2220_v3, 3  ;;  %v2229_v17 = vshll.u32 %v11727_v4, 16  ;;  %v1969_v18 = vsel %vm15009_vm1, %v1967_v63, %v1968_v58  ;;  %v2211_v19 = vrot.slane %v2209_v8, 2  ;;  %v11739_v8 = vld [vmem:[%s12194_s23 + $0x20] sm:$0xff]  }
  0x21   : > { %670 = vrot.lane.b32.xlu0 %v539_v52, %s12144_s27  ;;  %v1369_v7 = vsel %vm14999_vm3, %v1360_v1, %v1368_v55  ;;  %v2214_v21 = vrot.slane %v2212_v9, 3  ;;  %v2228_v26 = vrot.slane %v2226_v15, 2  ;;  %v2583_v28 = vrot.slane %v12262_v6, 3  ;;  %v11737_v52 = vld [vmem:[%s12194_s23 + $0x20] sm:$0xff]   ;;  %v12326_v9 = vld [vmem:[%s12194_s23 + $0x28] sm:$0xff]  }
  0x22   : > { %1766 = vrot.lane.b32.xlu1 %v1731_v47, %s12143_s26  ;;  %v2223_v22 = vor.u32 %v2222_v10, %v2219_v5  ;;  %v2231_v27 = vrot.slane %v2229_v17, 3  ;;  %v540_v30 = vshrl.u32 %v12225_v25, 16  ;;  %v2582_v32 = vrot.slane %v11728_v23, 3  ;;  %v11735_v47 = vld [vmem:[%s12194_s23 + $0x20] sm:$0xff]   ;;  %v11743_v10 = vld [vmem:[%s12194_s23 + $0x28] sm:$0xff]   ;;  %v11744_v17 = vld [vmem:[%s12194_s23 + $0x30] sm:$0xff]  }
  0x23   : > { %v2215_v31 = vor.u32 %v2214_v21, %v2211_v19  ;;  %v544_v33 = vshll.u32 %v11730_v12, 16  ;;  %v548_v38 = vshrl.u32 %v11730_v12, 16  ;;  %v2585_v49 = vrot.slane %v12281_v37, 3  ;;  %v11741_v19 = vld [vmem:[%s12194_s23 + $0x28] sm:$0xff]   ;;  %v12343_v21 = vld [vmem:[%s12194_s23 + $0x30] sm:$0xff]  }
  0x24   : > { %v12277_v34 = vor.u32 %v2231_v27, %v2228_v26  ;;  %v542_v35 = vor.u32 %v540_v30, %v12235_v36  ;;  %v552_v36 = vshll.u32 %v12285_v40, 16  ;;  %v2584_v48 = vsel %vm15007_vm5, %v2582_v32, %v2583_v28  ;;  %v11746_v32 = vld [vmem:[%s12194_s23 + $0x28] sm:$0xff]  }
  0x25   : > { %1523 = vrot.lane.b32.xlu0 %v1369_v7, %s12145_s28  ;;  %v2224_v25 = vsel %vm15008_vm4, %v2215_v31, %v2223_v22  ;;  %v546_v39 = vrot.slane %v544_v33, 1  ;;  %v877_v53 = vrot.slane %v11733_v42, 1  ;;  %v879_v55 = vrot.slane %v12293_v43, 1 }
  0x26   : > { %1525 = vrot.lane.b32.xlu1 %v1378_v62, %s12145_s28  ;;  %v2233_v41 = vsel %vm15008_vm4, %v2223_v22, %v12277_v34  ;;  %v12300_v50 = vrot.slane %v552_v36, 1  ;;  %v1380_v57 = vshrl.u32 %v11737_v52, 16  ;;  %v1383_v60 = vshll.u32 %v11737_v52, 16 }
  0x27   : > { %v547_v44 = vsel %vm15010_vm2, %v542_v35, %v546_v39  ;;  %v550_v45 = vor.u32 %v548_v38, %v546_v39  ;;  %v1389_v61 = vshrl.u32 %v11738_v54, 16  ;;  %v1392_v62 = vshll.u32 %v11738_v54, 16 }
  0x28   : > { %v2586_v63 = vsel %vm15007_vm5, %v2583_v28, %v2585_v49  ;;  %v1117_v0 = vrot.slane %v11735_v47, 1  ;;  %v1119_v1 = vrot.slane %v12303_v51, 1  ;;  %v1382_v2 = vrot.slane %v1380_v57, 1  ;;  %v11749_v57 = vld [vmem:[%s12194_s23 + $0x28] sm:$0xff]  }
  0x29   : > { %2004 = vrot.lane.b32.xlu0 %v1969_v18, %s12146_s29  ;;  %v555_v58 = vsel %vm15010_vm2, %v550_v45, %v12300_v50  ;;  %v1385_v3 = vrot.slane %v1383_v60, 2  ;;  %v880_v4 = vsel %vm15006_vm0, %v877_v53, %v879_v55  ;;  %v1391_v5 = vrot.slane %v1389_v61, 1  ;;  %v12370_v45 = vld [vmem:[%s12194_s23 + $0x30] sm:$0xff]  }
  0x2a   : > { %2006 = vrot.lane.b32.xlu1 %v1971_v14, %s12146_s29  ;;  %v1394_v6 = vrot.slane %v1392_v62, 2  ;;  %v878_v7 = vsel %vm15006_vm0, %v875_v16, %v877_v53  ;;  %v1120_v12 = vsel %vm15006_vm0, %v1117_v0, %v1119_v1  ;;  %v1118_v11 = vsel %vm15006_vm0, %v1115_v20, %v1117_v0  ;;  %v11753_v60 = vld [vmem:[%s12194_s23 + $0x30] sm:$0xff]  }
  0x2b   : > { %v1386_v14 = vor.u32 %v1385_v3, %v1382_v2  ;;  %v1732_v16 = vrot.slane %v11739_v8, 2  ;;  %v1734_v18 = vrot.slane %v12326_v9, 2  ;;  %v2235_v22 = vshrl.u32 %v11743_v10, 16  ;;  %v11751_v3 = vld [vmem:[%s12194_s23 + $0x30] sm:$0xff]  }
  0x2c   : > { %v12334_v15 = vor.u32 %v1394_v6, %v1391_v5  ;;  %v2238_v23 = vshll.u32 %v11743_v10, 16  ;;  %v2244_v27 = vshrl.u32 %v11744_v17, 16  ;;  %v2247_v13 = vshll.u32 %v11744_v17, 16  ;;  %v12405_v5 = vld [vmem:[%s12194_s23 + $0x38] sm:$0xff]  }
  0x2d   : > { %2378 = vrot.lane.b32.xlu0 %v2224_v25, %s12147_s30  ;;  %v1387_v20 = vsel %vm14999_vm3, %v12251_v56, %v1386_v14  ;;  %v1972_v28 = vrot.slane %v11741_v19, 2  ;;  %v1735_v30 = vsel %vm15009_vm1, %v1732_v16, %v1734_v18  ;;  %v1974_v31 = vrot.slane %v12343_v21, 2 }
  0x2e   : > { %2380 = vrot.lane.b32.xlu1 %v2233_v41, %s12147_s30  ;;  %v1396_v26 = vsel %vm14999_vm3, %v1386_v14, %v12334_v15  ;;  %v2237_v33 = vrot.slane %v2235_v22, 2  ;;  %v2240_v35 = vrot.slane %v2238_v23, 3  ;;  %v2246_v38 = vrot.slane %v2244_v27, 2  ;;  %v12425_v27 = vld [vmem:[%s12194_s23 + $0x38] sm:$0xff]  }
  0x2f   : > { %v2249_v25 = vrot.slane %v2247_v13, 3  ;;  %v1733_v56 = vsel %vm15009_vm1, %v1730_v29, %v1732_v16  ;;  %v556_v39 = vshrl.u32 %v12285_v40, 16  ;;  %v1975_v41 = vsel %vm15009_vm1, %v1972_v28, %v1974_v31  ;;  %v11745_v29 = vld [vmem:[%s12194_s23 + $0x28] sm:$0xff]   ;;  %v12378_v40 = vld [vmem:[%s12194_s23 + $0x30] sm:$0xff]   ;;  %v11759_v13 = vld [vmem:[%s12194_s23 + $0x38] sm:$0xff]  }
  0x30   : > { %v2241_v42 = vor.u32 %v2240_v35, %v2237_v33  ;;  %v1973_v24 = vsel %vm15009_vm1, %v1970_v59, %v1972_v28  ;;  %v564_v47 = vshrl.u32 %v11746_v32, 16  ;;  %v568_v46 = vshll.u32 %v12370_v45, 16  ;;  %v11755_v16 = vld [vmem:[%s12194_s23 + $0x30] sm:$0xff]   ;;  %v11757_v35 = vld [vmem:[%s12194_s23 + $0x38] sm:$0xff]  }
  0x31   : > { %2619 = vrot.lane.b32.xlu0 %v2584_v48, %s12148_s6  ;;  %v12367_v36 = vor.u32 %v2249_v25, %v2246_v38  ;;  %v558_v52 = vor.u32 %v556_v39, %v12300_v50  ;;  %v2587_v54 = vrot.slane %v11745_v29, 3  ;;  %v2589_v0 = vrot.slane %v12378_v40, 3  ;;  %v12442_v38 = vld [vmem:[%s12194_s23 + $0x40] sm:$0xff]   ;;  %v11793_v40 = vld [vmem:[%s14991_s1 + $0x8] sm:$0xff]  }
  0x32   : > { %672 = vrot.lane.b32.xlu1 %v547_v44, %s12144_s27  ;;  %v560_v44 = vshll.u32 %v11746_v32, 16  ;;  %v2242_v59 = vsel %vm15008_vm4, %v12277_v34, %v2241_v42  ;;  %v12395_v62 = vrot.slane %v568_v46, 1  ;;  %v881_v2 = vrot.slane %v11749_v57, 1 }
  0x33   : > { %v2251_v48 = vsel %vm15008_vm4, %v2241_v42, %v12367_v36  ;;  %v2588_v34 = vsel %vm15007_vm5, %v2585_v49, %v2587_v54  ;;  %v1398_v6 = vshrl.u32 %v11753_v60, 16  ;;  %v2590_v10 = vsel %vm15007_vm5, %v2587_v54, %v2589_v0  ;;  %v11777_v42 = vld [vmem:[%s12194_s23] sm:$0xff]  }
  0x34   : > { %v562_v53 = vrot.slane %v560_v44, 1  ;;  %v1123_v14 = vrot.slane %v12405_v5, 1  ;;  %v1738_v33 = vrot.slane %v12425_v27, 2  ;;  %v2253_v25 = vshrl.u32 %v11759_v13, 16  ;;  %371 = vst.msk [vmem:[#allocation4] sm:$0xff] %vm370_vm6, %v11777_v42 }
  0x35   : > { %2621 = vrot.lane.b32.xlu0 %v2586_v63, %s12148_s6  ;;  %v11754_v63 = vld [vmem:[%s12194_s23 + $0x38] sm:$0xff]   ;;  %v1400_v17 = vrot.slane %v1398_v6, 1  ;;  %v1978_v29 = vrot.slane %v12442_v38, 2  ;;  %v572_v9 = vshrl.u32 %v12370_v45, 16 }
  0x36   : > { %674 = vrot.lane.b32.xlu1 %v555_v58, %s12144_s27  ;;  %v12389_v58 = vld [vmem:[%s12194_s23 + $0x30] sm:$0xff]   ;;  %v563_v61 = vsel %vm15010_vm2, %v558_v52, %v562_v53  ;;  %v566_v50 = vor.u32 %v564_v47, %v562_v53  ;;  %v1407_v49 = vshrl.u32 %v11754_v63, 16  ;;  %v1410_v8 = vshll.u32 %v11754_v63, 16  ;;  %v11762_v47 = vld [vmem:[%s12194_s23 + $0x38] sm:$0xff]  }
  0x37   : > { %v2255_v52 = vrot.slane %v2253_v25, 2  ;;  %v576_v54 = vshll.u32 %v11762_v47, 16  ;;  %v11761_v63 = vld [vmem:[%s12194_s23 + $0x38] sm:$0xff]   ;;  %v574_v6 = vor.u32 %v572_v9, %v12395_v62 }
  0x38   : > { %v571_v37 = vsel %vm15010_vm2, %v566_v50, %v12395_v62  ;;  %v1409_v22 = vrot.slane %v1407_v49, 1  ;;  %v1412_v23 = vrot.slane %v1410_v8, 2  ;;  %v12492_v49 = vld [vmem:[%s12194_s23 + $0x40] sm:$0xff]   ;;  %v11770_v62 = vld [vmem:[%s12194_s23 + $0x48] sm:$0xff]  }
  0x39   : > { %913 = vrot.lane.b32.xlu0 %v878_v7, %s12142_s25  ;;  %v1401_v7 = vshll.u32 %v11753_v60, 16  ;;  %v11769_v8 = vld [vmem:[%s12194_s23 + $0x40] sm:$0xff]  }
  0x3a   : > { %915 = vrot.lane.b32.xlu1 %v880_v4, %s12142_s25  ;;  %v883_v4 = vrot.slane %v12389_v58, 1  ;;  %v12434_v32 = vor.u32 %v1412_v23, %v1409_v22  ;;  %v11767_v23 = vld [vmem:[%s12194_s23 + $0x40] sm:$0xff]  }
  0x3b   : > { %v1125_v25 = vrot.slane %v11767_v23, 1 }
  0x3c   : > { %v884_v19 = vsel %vm15006_vm0, %v881_v2, %v883_v4 }
  0x3d   : > { %1153 = vrot.lane.b32.xlu0 %v1118_v11, %s12141_s24  ;;  %v1403_v11 = vrot.slane %v1401_v7, 2  ;;  %v11765_v7 = vld [vmem:[%s12194_s23 + $0x38] sm:$0xff]  }
  0x3e   : > { %1155 = vrot.lane.b32.xlu1 %v1120_v12, %s12141_s24  ;;  %v1121_v12 = vrot.slane %v11751_v3, 1  ;;  %v580_v3 = vshrl.u32 %v11762_v47, 16  ;;  %v885_v22 = vrot.slane %v11765_v7, 1  ;;  %v11779_v7 = vld [vmem:[%s12194_s23 + $0x48] sm:$0xff]  }
  0x40   : > { %v1124_v28 = vsel %vm15006_vm0, %v1121_v12, %v1123_v14  ;;  %v1122_v43 = vsel %vm15006_vm0, %v1119_v1, %v1121_v12 }
  0x41   : > { %1527 = vrot.lane.b32.xlu0 %v1387_v20, %s12145_s28  ;;  %v11760_v20 = vld [vmem:[%s12194_s23 + $0x40] sm:$0xff]  }
  0x42   : > { %1529 = vrot.lane.b32.xlu1 %v1396_v26, %s12145_s28  ;;  %v882_v26 = vsel %vm15006_vm0, %v879_v55, %v881_v2  ;;  %v1736_v55 = vrot.slane %v11755_v16, 2  ;;  %v2262_v39 = vshrl.u32 %v11760_v20, 16  ;;  %v578_v2 = vrot.slane %v576_v54, 1  ;;  %v11790_v16 = vld [vmem:[%s12194_s23 + $0x10] sm:$0xff]  }
  0x43   : > { %373 = vst.msk [vmem:[#allocation4 + $0x10] sm:$0xff] %vm370_vm6, %v11790_v16 }
  0x44   : > { %v1739_v44 = vsel %vm15009_vm1, %v1736_v55, %v1738_v33  ;;  %v2264_v53 = vrot.slane %v2262_v39, 2  ;;  %v579_v12 = vsel %vm15010_vm2, %v574_v6, %v578_v2 }
  0x45   : > { %1768 = vrot.lane.b32.xlu0 %v1733_v56, %s12143_s26  ;;  %v2256_v56 = vshll.u32 %v11759_v13, 16  ;;  %v12512_v13 = vld [vmem:[%s12194_s23 + $0x48] sm:$0xff]  }
  0x46   : > { %1770 = vrot.lane.b32.xlu1 %v1735_v30, %s12143_s26  ;;  %v1404_v30 = vor.u32 %v1403_v11, %v1400_v17 }
  0x48   : > { %v1414_v51 = vsel %vm14999_vm3, %v1404_v30, %v12434_v32  ;;  %v1405_v1 = vsel %vm14999_vm3, %v12334_v15, %v1404_v30  ;;  %v2258_v15 = vrot.slane %v2256_v56, 3  ;;  %v1425_v30 = vshrl.u32 %v11770_v62, 16  ;;  %v11797_v56 = vld [vmem:[%s14991_s1 + $0x10] ss:$0 sps:$4 sm:$0x33]  }
  0x49   : > { %2008 = vrot.lane.b32.xlu0 %v1973_v24, %s12146_s29  ;;  %v1976_v24 = vrot.slane %v11757_v35, 2 }
  0x4a   : > { %2010 = vrot.lane.b32.xlu1 %v1975_v41, %s12146_s29  ;;  %v2265_v41 = vshll.u32 %v11760_v20, 16  ;;  %v2259_v60 = vor.u32 %v2258_v15, %v2255_v52  ;;  %v1416_v20 = vshrl.u32 %v11769_v8, 16  ;;  %v2794_v52 = vsel %vm2792_vm7, %v11797_v56, 0 }
  0x4b   : > { %v1979_v57 = vsel %vm15009_vm1, %v1976_v24, %v1978_v29  ;;  %v1977_v50 = vsel %vm15009_vm1, %v1974_v31, %v1976_v24  ;;  %v1427_v24 = vrot.slane %v1425_v30, 1  ;;  %v886_v15 = vsel %vm15006_vm0, %v883_v4, %v885_v22  ;;  %v11776_v4 = vld [vmem:[%s12194_s23 + $0x50] sm:$0xff]   ;;  %v11778_v30 = vld [vmem:[%s12194_s23 + $0x48] sm:$0xff]  }
  0x4c   : > { %v2267_v46 = vrot.slane %v2265_v41, 3  ;;  %v2260_v31 = vsel %vm15008_vm4, %v12367_v36, %v2259_v60  ;;  %v582_v36 = vor.u32 %v580_v3, %v578_v2  ;;  %v1127_v41 = vrot.slane %v12512_v13, 1  ;;  %v12568_v2 = vld [vmem:[%s12194_s23 + $0x50] sm:$0xff]  }
  0x4d   : > { %2382 = vrot.lane.b32.xlu0 %v2242_v59, %s12147_s30  ;;  %v1737_v59 = vsel %vm15009_vm1, %v1734_v18, %v1736_v55  ;;  %v12473_v18 = vld [vmem:[%s12194_s23 + $0x40] sm:$0xff]   ;;  %v11794_v55 = vld [vmem:[%s12194_s23 + $0x18] sm:$0xff]   ;;  %v2283_v5 = vshll.u32 %v11776_v4, 16 }
  0x4e   : > { %2384 = vrot.lane.b32.xlu1 %v2251_v48, %s12147_s30  ;;  %v11780_v48 = vld [vmem:[%s12194_s23 + $0x8] sm:$0xff]   ;;  %v584_v21 = vshll.u32 %v12473_v18, 16  ;;  %374 = vst.msk [vmem:[#allocation4 + $0x18] sm:$0xff] %vm370_vm6, %v11794_v55  ;;  %v1128_v54 = vsel %vm15006_vm0, %v1125_v25, %v1127_v41  ;;  %v588_v27 = vshrl.u32 %v12473_v18, 16 }
  0x4f   : > { %372 = vst.msk [vmem:[#allocation4 + $0x8] sm:$0xff] %vm370_vm6, %v11780_v48 }
  0x50   : > { %v12503_v11 = vrot.slane %v584_v21, 1  ;;  %v2280_v21 = vshrl.u32 %v11776_v4, 16  ;;  %v11785_v4 = vld [vmem:[%s12194_s23 + $0x50] sm:$0xff]  }
  0x51   : > { %2623 = vrot.lane.b32.xlu0 %v2588_v34, %s12148_s6  ;;  %v12480_v34 = vld [vmem:[%s12194_s23 + $0x40] sm:$0xff]  }
  0x52   : > { %676 = vrot.lane.b32.xlu1 %v563_v61, %s12144_s27  ;;  %v12469_v61 = vor.u32 %v2267_v46, %v2264_v53  ;;  %v2593_v17 = vrot.slane %v12480_v34, 3  ;;  %v11771_v53 = vld [vmem:[%s12194_s23 + $0x40] sm:$0xff]   ;;  %v12551_v46 = vld [vmem:[%s12194_s23 + $0x48] sm:$0xff]   ;;  %v590_v38 = vor.u32 %v588_v27, %v12503_v11 }
  0x53   : > { %v1740_v9 = vrot.slane %v11771_v53, 2 }
  0x54   : > { %v2269_v45 = vsel %vm15008_vm4, %v2259_v60, %v12469_v61  ;;  %v1126_v60 = vsel %vm15006_vm0, %v1123_v14, %v1125_v25  ;;  %v596_v25 = vshrl.u32 %v11779_v7, 16 }
  0x55   : > { %2625 = vrot.lane.b32.xlu0 %v2590_v10, %s12148_s6  ;;  %v11789_v10 = vld [vmem:[%s14991_s1] sm:$0xff]  }
  0x56   : > { %678 = vrot.lane.b32.xlu1 %v571_v37, %s12144_s27  ;;  %v2591_v37 = vrot.slane %v11761_v63, 3  ;;  %10801 = vmatprep.subr.bf16.mxu0 %v11789_v10  ;;  %v1742_v63 = vrot.slane %v12551_v46, 2 }
  0x57   : > { %10802 = vmatpush3.bf16.msra.mxu0 %v11789_v10 }
  0x58   : > { %v2594_v35 = vsel %vm15007_vm5, %v2591_v37, %v2593_v17  ;;  %10803 = vmatprep.subr.bf16.mxu0 %v11793_v40 }
  0x59   : > { %917 = vrot.lane.b32.xlu0 %v882_v26, %s12142_s25  ;;  %v887_v26 = vrot.slane %v12492_v49, 1 }
  0x5a   : > { %919 = vrot.lane.b32.xlu1 %v884_v19, %s12142_s25  ;;  %v2592_v19 = vsel %vm15007_vm5, %v2589_v0, %v2591_v37  ;;  %v587_v0 = vsel %vm15010_vm2, %v582_v36, %v12503_v11  ;;  %v1982_v37 = vrot.slane %v12568_v2, 2  ;;  %v2285_v36 = vrot.slane %v2283_v5, 3  ;;  %v11787_v11 = vld [vmem:[%s12194_s23 + $0x50] sm:$0xff]   ;;  %v12755_v2 = vld [vmem:[%s12194_s23 + $0x60] sm:$0xff]  }
  0x5b   : > { %10804 = vmatpush3.bf16.msra.mxu0 %v11793_v40  ;;  %v888_v39 = vsel %vm15006_vm0, %v885_v22, %v887_v26  ;;  %v11810_v22 = vld [vmem:[%s12194_s23 + $0x20] sm:$0xff]   ;;  %v12597_v40 = vld [vmem:[%s12194_s23 + $0x50] sm:$0xff]  }
  0x5c   : > { %11615 = vmatprep.subr.msk.bf16.mxu0 %vm2792_vm7, %v11797_v56  ;;  %375 = vst.msk [vmem:[#allocation4 + $0x20] sm:$0xff] %vm370_vm6, %v11810_v22  ;;  %vm14997_vm7 = vcmask 261344  }
  0x5d   : > { %1157 = vrot.lane.b32.xlu0 %v1122_v43, %s12141_s24  ;;  %v1428_v43 = vshll.u32 %v11770_v62, 16  ;;  %v1743_v62 = vsel %vm15009_vm1, %v1740_v9, %v1742_v63 }
  0x5e   : > { %1159 = vrot.lane.b32.xlu1 %v1124_v28, %s12141_s24  ;;  %v1419_v28 = vshll.u32 %v11769_v8, 16 }
  0x5f   : > { %v1430_v47 = vrot.slane %v1428_v43, 2  ;;  %10806 = vmatpush3.bf16.msra.mxu0 %v2794_v52  ;;  %v11813_v43 = vld [vmem:[%s12194_s23 + $0x28] sm:$0xff]  }
  0x60   : > { %376 = vst.msk [vmem:[#allocation4 + $0x28] sm:$0xff] %vm370_vm6, %v11813_v43 }
  0x61   : > { %1531 = vrot.lane.b32.xlu0 %v1405_v1, %s12145_s28  ;;  %v1421_v1 = vrot.slane %v1419_v28, 2  ;;  %v12559_v58 = vor.u32 %v1430_v47, %v1427_v24  ;;  %v12621_v24 = vld [vmem:[%s12194_s23 + $0x50] sm:$0xff]  }
  0x62   : > { %1533 = vrot.lane.b32.xlu1 %v1414_v51, %s12145_s28  ;;  %v1418_v51 = vrot.slane %v1416_v20, 1 }
  0x65   : > { %1772 = vrot.lane.b32.xlu0 %v1737_v59, %s12143_s26  ;;  %v11775_v59 = vld [vmem:[%s12194_s23 + $0x48] sm:$0xff]  }
  0x66   : > { %1774 = vrot.lane.b32.xlu1 %v1739_v44, %s12143_s26  ;;  %v3771_v44 = vld [vmem:[#allocation2 + $0x8] sm:$0x3]  ;;  %v2271_v3 = vshrl.u32 %v11775_v59, 16 }
  0x67   : > { %v3772_v48 = vsel %vm12537_vm9, 0, %v3771_v44  ;;  %v11783_v44 = vld [vmem:[%s12194_s23 + $0x48] sm:$0xff]  }
  0x68   : > { %3773 = vst [vmem:[#allocation2 + $0x8] sm:$0x3] %v3772_v48  ;;  %v2273_v8 = vrot.slane %v2271_v3, 2 }
  0x69   : > { %2012 = vrot.lane.b32.xlu0 %v1977_v50, %s12146_s29  ;;  %v11773_v50 = vld [vmem:[%s12194_s23 + $0x48] sm:$0xff]  }
  0x6a   : > { %2014 = vrot.lane.b32.xlu1 %v1979_v57, %s12146_s29  ;;  %v1422_v57 = vor.u32 %v1421_v1, %v1418_v51  ;;  %v2595_v51 = vrot.slane %v11778_v30, 3  ;;  %v12616_v1 = vld [vmem:[%s12194_s23 + $0x50] sm:$0xff]  }
  0x6b   : > { %v11828_v30 = vld [vmem:[%s12194_s23 + $0x30] sm:$0xff]  }
  0x6c   : > { %v1432_v6 = vsel %vm14999_vm3, %v1422_v57, %v12559_v58  ;;  %v1423_v14 = vsel %vm14999_vm3, %v12434_v32, %v1422_v57  ;;  %v1741_v32 = vsel %vm15009_vm1, %v1738_v33, %v1740_v9  ;;  %v2596_v53 = vsel %vm15007_vm5, %v2593_v17, %v2595_v51  ;;  %377 = vst.msk [vmem:[#allocation4 + $0x30] sm:$0xff] %vm370_vm6, %v11828_v30 }
  0x6d   : > { %2386 = vrot.lane.b32.xlu0 %v2260_v31, %s12147_s30  ;;  %v1980_v31 = vrot.slane %v11773_v50, 2  ;;  %v889_v57 = vrot.slane %v11783_v44, 1  ;;  %v1434_v9 = vshrl.u32 %v11787_v11, 16  ;;  %v1437_v50 = vshll.u32 %v11787_v11, 16 }
  0x6e   : > { %2388 = vrot.lane.b32.xlu1 %v2269_v45, %s12147_s30  ;;  %v2274_v45 = vshll.u32 %v11775_v59, 16  ;;  %v2597_v59 = vrot.slane %v12616_v1, 3  ;;  %v891_v17 = vrot.slane %v12621_v24, 1  ;;  %v11849_v1 = vld [vmem:[%s12194_s23 + $0x48] sm:$0xff]  }
  0x6f   : > { %v1983_v23 = vsel %vm15009_vm1, %v1980_v31, %v1982_v37  ;;  %380 = vst.msk [vmem:[#allocation4 + $0x48] sm:$0xff] %vm370_vm6, %v11849_v1  ;;  %v12876_v1 = vld [vmem:[%s12194_s23 + $0x70] sm:$0xff]  }
  0x70   : > { %v2276_v10 = vrot.slane %v2274_v45, 3 }
  0x71   : > { %2627 = vrot.lane.b32.xlu0 %v2592_v19, %s12148_s6  ;;  %v592_v19 = vshll.u32 %v11779_v7, 16 }
  0x72   : > { %680 = vrot.lane.b32.xlu1 %v579_v12, %s12144_s27  ;;  %v2282_v12 = vrot.slane %v2280_v21, 2  ;;  %v2277_v20 = vor.u32 %v2276_v10, %v2273_v8  ;;  %v2598_v21 = vsel %vm15007_vm5, %v2595_v51, %v2597_v59  ;;  %v1439_v8 = vrot.slane %v1437_v50, 2  ;;  %v12652_v10 = vld [vmem:[%s12194_s23 + $0x50] sm:$0xff]   ;;  %v12699_v51 = vld [vmem:[%s12194_s23 + $0x58] sm:$0xff]  }
  0x73   : > { %v594_v55 = vrot.slane %v592_v19, 1  ;;  %v12664_v19 = vld [vmem:[%s12194_s23 + $0x58] sm:$0xff]   ;;  %v1744_v43 = vrot.slane %v12652_v10, 2  ;;  %v612_v46 = vshrl.u32 %v12699_v51, 16  ;;  %v11808_v10 = vld [vmem:[%s12194_s23 + $0x60] sm:$0xff]  }
  0x74   : > { %v12592_v28 = vor.u32 %v2285_v36, %v2282_v12 }
  0x75   : > { %2629 = vrot.lane.b32.xlu0 %v2594_v35, %s12148_s6  ;;  %v595_v47 = vsel %vm15010_vm2, %v590_v38, %v594_v55  ;;  %v598_v48 = vor.u32 %v596_v25, %v594_v55  ;;  %v11795_v55 = vld [vmem:[%s12194_s23 + $0x58] sm:$0xff]   ;;  %v12690_v38 = vld [vmem:[%s12194_s23 + $0x60] sm:$0xff]  }
  0x76   : > { %682 = vrot.lane.b32.xlu1 %v587_v0, %s12144_s27  ;;  %v1981_v0 = vsel %vm15009_vm1, %v1978_v29, %v1980_v31  ;;  %v2287_v35 = vsel %vm15008_vm4, %v2277_v20, %v12592_v28  ;;  %v600_v29 = vshll.u32 %v12597_v40, 16  ;;  %v1436_v31 = vrot.slane %v1434_v9, 1 }
  0x77   : > { %v608_v9 = vshll.u32 %v12699_v51, 16 }
  0x78   : > { %v12626_v52 = vrot.slane %v600_v29, 1  ;;  %v11831_v29 = vld [vmem:[%s12194_s23 + $0x38] sm:$0xff]  }
  0x79   : > { %921 = vrot.lane.b32.xlu0 %v886_v15, %s12142_s25  ;;  %378 = vst.msk [vmem:[#allocation4 + $0x38] sm:$0xff] %vm370_vm6, %v11831_v29 }
  0x7a   : > { %923 = vrot.lane.b32.xlu1 %v888_v39, %s12142_s25  ;;  %v2278_v39 = vsel %vm15008_vm4, %v12469_v61, %v2277_v20  ;;  %v11788_v61 = vld [vmem:[%s12194_s23 + $0x58] sm:$0xff]   ;;  %v603_v34 = vsel %vm15010_vm2, %v598_v48, %v12626_v52  ;;  %v11799_v20 = vld [vmem:[%s12194_s23 + $0x60] sm:$0xff]   ;;  %v1984_v48 = vrot.slane %v11795_v55, 2 }
  0x7b   : > { %v1443_v3 = vshrl.u32 %v11788_v61, 16  ;;  %v1446_v45 = vshll.u32 %v11788_v61, 16  ;;  %v12706_v61 = vld [vmem:[%s12194_s23 + $0x58] sm:$0xff]  }
  0x7d   : > { %1161 = vrot.lane.b32.xlu0 %v1126_v60, %s12141_s24  ;;  %v12635_v60 = vld [vmem:[%s12194_s23 + $0x58] sm:$0xff]   ;;  %v1445_v12 = vrot.slane %v1443_v3, 1  ;;  %v1448_v36 = vrot.slane %v1446_v45, 2  ;;  %v12720_v3 = vld [vmem:[%s12194_s23 + $0x60] sm:$0xff]  }
  0x7e   : > { %1163 = vrot.lane.b32.xlu1 %v1128_v54, %s12141_s24  ;;  %v1131_v7 = vrot.slane %v12635_v60, 1 }
  0x7f   : > { %v12679_v27 = vor.u32 %v1448_v36, %v1445_v12  ;;  %v1985_v12 = vsel %vm15009_vm1, %v1982_v37, %v1984_v48  ;;  %v2601_v36 = vrot.slane %v12720_v3, 3 }
  0x81   : > { %1535 = vrot.lane.b32.xlu0 %v1423_v14, %s12145_s28  ;;  %v1129_v14 = vrot.slane %v11785_v4, 1 }
  0x82   : > { %1537 = vrot.lane.b32.xlu1 %v1432_v6, %s12145_s28 }
  0x83   : > { %v1132_v49 = vsel %vm15006_vm0, %v1129_v14, %v1131_v7 }
  0x85   : > { %1776 = vrot.lane.b32.xlu0 %v1741_v32, %s12143_s26 }
  0x86   : > { %1778 = vrot.lane.b32.xlu1 %v1743_v62, %s12143_s26  ;;  %v892_v62 = vsel %vm15006_vm0, %v889_v57, %v891_v17 }
  0x87   : > { %v1150_v16 = vpop.permute.xlu0 %1149 }
  0x88   : > { %v910_v33 = vpop.permute.xlu1 %909 }
  0x89   : > { %2016 = vrot.lane.b32.xlu0 %v1981_v0, %s12146_s29  ;;  %v1130_v0 = vsel %vm15006_vm0, %v1127_v41, %v1129_v14  ;;  %v2298_v41 = vshrl.u32 %v11799_v20, 16 }
  0x8a   : > { %2018 = vrot.lane.b32.xlu1 %v1983_v23, %s12146_s29  ;;  %v11798_v23 = vld [vmem:[%s12194_s23 + $0x58] sm:$0xff]  }
  0x8b   : > { %v12607_v18 = vpop.permute.xlu0 %1764  ;;  %v2289_v25 = vshrl.u32 %v11798_v23, 16  ;;  %v2292_v13 = vshll.u32 %v11798_v23, 16  ;;  %v12749_v23 = vld [vmem:[%s12194_s23 + $0x60] sm:$0xff]  }
  0x8c   : > { %v912_v56 = vpop.permute.xlu1 %911 }
  0x8d   : > { %2390 = vrot.lane.b32.xlu0 %v2278_v39, %s12147_s30  ;;  %v2301_v39 = vshll.u32 %v11799_v20, 16 }
  0x8e   : > { %2392 = vrot.lane.b32.xlu1 %v2287_v35, %s12147_s30  ;;  %v1746_v35 = vrot.slane %v12664_v19, 2 }
  0x8f   : > { %v669_v54 = vpop.permute.xlu0 %668  ;;  %v2303_v4 = vrot.slane %v2301_v39, 3  ;;  %v11846_v39 = vld [vmem:[%s12194_s23 + $0x40] sm:$0xff]  }
  0x90   : > { %v1152_v15 = vpop.permute.xlu1 %1151  ;;  %723 = vst.msk [vmem:[#allocation4] sm:$0xff] %vm722_vm10, %v669_v54  ;;  %v2294_v54 = vrot.slane %v2292_v13, 3 }
  0x91   : > { %964 = vst.msk [vmem:[#allocation4] sm:$0xff] %vm15012_vm11, %v910_v33  ;;  %2631 = vrot.lane.b32.xlu0 %v2596_v53, %s12148_s6  ;;  %v1986_v53 = vrot.slane %v12690_v38, 2 }
  0x92   : > { %684 = vrot.lane.b32.xlu1 %v595_v47, %s12144_s27  ;;  %1204 = vst.msk [vmem:[#allocation4] sm:$0xff] %vm15005_vm12, %v1150_v16  ;;  %v890_v16 = vsel %vm15006_vm0, %v887_v26, %v889_v57  ;;  %v1440_v26 = vor.u32 %v1439_v8, %v1436_v31  ;;  %v2300_v57 = vrot.slane %v2298_v41, 2  ;;  %v610_v8 = vrot.slane %v608_v9, 1  ;;  %v12770_v41 = vld [vmem:[%s12194_s23 + $0x60] sm:$0xff]  }
  0x93   : > { %v671_v5 = vpop.permute.xlu0 %670  ;;  %v1987_v14 = vsel %vm15009_vm1, %v1984_v48, %v1986_v53  ;;  %379 = vst.msk [vmem:[#allocation4 + $0x40] sm:$0xff] %vm370_vm6, %v11846_v39 }
  0x94   : > { %v1767_v6 = vpop.permute.xlu1 %1766  ;;  %724 = vst.msk [vmem:[#allocation4 + $0x8] sm:$0xff] %vm722_vm10, %v671_v5  ;;  %v1441_v11 = vsel %vm14999_vm3, %v12559_v58, %v1440_v26  ;;  %v2291_v58 = vrot.slane %v2289_v25, 2  ;;  %v12726_v5 = vld [vmem:[%s12194_s23 + $0x60] sm:$0xff]  }
  0x95   : > { %965 = vst.msk [vmem:[#allocation4 + $0x8] sm:$0xff] %vm15012_vm11, %v912_v56  ;;  %2633 = vrot.lane.b32.xlu0 %v2598_v21, %s12148_s6  ;;  %v1450_v56 = vsel %vm14999_vm3, %v1440_v26, %v12679_v27  ;;  %v604_v21 = vshrl.u32 %v12597_v40, 16  ;;  %v12738_v40 = vor.u32 %v2303_v4, %v2300_v57  ;;  %v1452_v26 = vshrl.u32 %v11808_v10, 16  ;;  %v11816_v57 = vld [vmem:[%s12194_s23 + $0x68] sm:$0xff]   ;;  %v11817_v4 = vld [vmem:[%s12194_s23 + $0x70] sm:$0xff]  }
  0x96   : > { %686 = vrot.lane.b32.xlu1 %v603_v34, %s12144_s27  ;;  %1205 = vst.msk [vmem:[#allocation4 + $0x8] sm:$0xff] %vm15005_vm12, %v1152_v15  ;;  %v1747_v15 = vsel %vm15009_vm1, %v1744_v43, %v1746_v35  ;;  %v1745_v34 = vsel %vm15009_vm1, %v1742_v63, %v1744_v43  ;;  %v12732_v63 = vld [vmem:[%s12194_s23 + $0x58] sm:$0xff]   ;;  %v2295_v31 = vor.u32 %v2294_v54, %v2291_v58  ;;  %v1455_v43 = vshll.u32 %v11808_v10, 16 }
  0x97   : > { %v1524_v22 = vpop.permute.xlu0 %1523  ;;  %v893_v20 = vrot.slane %v12732_v63, 1  ;;  %v606_v30 = vor.u32 %v604_v21, %v12626_v52  ;;  %v1133_v52 = vrot.slane %v12755_v2, 1  ;;  %v12795_v21 = vld [vmem:[%s12194_s23 + $0x68] sm:$0xff]   ;;  %v11826_v63 = vld [vmem:[%s12194_s23 + $0x70] sm:$0xff]  }
  0x98   : > { %v1526_v32 = vpop.permute.xlu1 %1525  ;;  %1578 = vst.msk [vmem:[#allocation4] sm:$0xff] %vm15004_vm13, %v1524_v22  ;;  %v616_v22 = vshll.u32 %v12726_v5, 16  ;;  %v2305_v37 = vsel %vm15008_vm4, %v2295_v31, %v12738_v40  ;;  %v1457_v58 = vrot.slane %v1455_v43, 2  ;;  %v1470_v2 = vshrl.u32 %v11826_v63, 16 }
  0x99   : > { %1579 = vst.msk [vmem:[#allocation4 + $0x8] sm:$0xff] %vm15004_vm13, %v1526_v32  ;;  %925 = vrot.lane.b32.xlu0 %v890_v16, %s12142_s25  ;;  %v11809_v32 = vld [vmem:[%s12194_s23 + $0x68] sm:$0xff]   ;;  %v611_v51 = vsel %vm15010_vm2, %v606_v30, %v610_v8  ;;  %v2319_v30 = vshll.u32 %v11817_v4, 16  ;;  %v1473_v60 = vshll.u32 %v11826_v63, 16  ;;  %v11834_v63 = vld [vmem:[%s12194_s23 + $0x78] sm:$0xff]  }
  0x9a   : > { %927 = vrot.lane.b32.xlu1 %v892_v62, %s12142_s25  ;;  %1820 = vst.msk [vmem:[#allocation4 + $0x8] sm:$0xff] %vm15003_vm14, %v1767_v6  ;;  %1819 = vst.msk [vmem:[#allocation4] sm:$0xff] %vm15003_vm14, %v12607_v18  ;;  %v2599_v6 = vrot.slane %v12706_v61, 3  ;;  %v1461_v55 = vshrl.u32 %v11809_v32, 16  ;;  %v12767_v29 = vrot.slane %v616_v22, 1  ;;  %v1464_v13 = vshll.u32 %v11809_v32, 16 }
  0x9b   : > { %v2005_v18 = vpop.permute.xlu0 %2004  ;;  %v12822_v22 = vld [vmem:[%s12194_s23 + $0x70] sm:$0xff]  }
  0x9c   : > { %v2007_v33 = vpop.permute.xlu1 %2006  ;;  %2059 = vst.msk [vmem:[#allocation4] sm:$0xff] %vm14998_vm15, %v2005_v18  ;;  %v1463_v54 = vrot.slane %v1461_v55, 1  ;;  %v2602_v10 = vsel %vm15007_vm5, %v2599_v6, %v2601_v36  ;;  %v894_v55 = vsel %vm15006_vm0, %v891_v17, %v893_v20  ;;  %v632_v24 = vshll.u32 %v12822_v22, 16  ;;  %v12857_v17 = vld [vmem:[%s12194_s23 + $0x70] sm:$0xff]  }
  0x9d   : > { %2060 = vst.msk [vmem:[#allocation4 + $0x8] sm:$0xff] %vm14998_vm15, %v2007_v33  ;;  %1165 = vrot.lane.b32.xlu0 %v1130_v0, %s12141_s24  ;;  %v2296_v0 = vsel %vm15008_vm4, %v12592_v28, %v2295_v31  ;;  %v895_v28 = vrot.slane %v12749_v23, 1 }
  0x9e   : > { %1167 = vrot.lane.b32.xlu1 %v1132_v49, %s12141_s24  ;;  %v12762_v49 = vld [vmem:[%s12194_s23 + $0x68] sm:$0xff]  }
  0x9f   : > { %v2379_v47 = vpop.permute.xlu0 %2378  ;;  %v896_v61 = vsel %vm15006_vm0, %v893_v20, %v895_v28 }
  0xa0   : > { %v2381_v44 = vpop.permute.xlu1 %2380  ;;  %2433 = vst.msk [vmem:[#allocation4] sm:$0xff] %vm14997_vm7, %v2379_v47  ;;  %v1454_v47 = vrot.slane %v1452_v26, 1  ;;  %v620_v26 = vshrl.u32 %v12726_v5, 16 }
  0xa1   : > { %2434 = vst.msk [vmem:[#allocation4 + $0x8] sm:$0xff] %vm14997_vm7, %v2381_v44  ;;  %1539 = vrot.lane.b32.xlu0 %v1441_v11, %s12145_s28  ;;  %vm15011_vm7 = vcmask 293888   ;;  %v614_v44 = vor.u32 %v612_v46, %v610_v8  ;;  %v15002_v11 = vrot.slane %v12762_v49, 1  ;;  %v12803_v46 = vld [vmem:[%s12194_s23 + $0x70] sm:$0xff]  }
  0xa2   : > { %1541 = vrot.lane.b32.xlu1 %v1450_v56, %s12145_s28  ;;  %v12778_v56 = vld [vmem:[%s12194_s23 + $0x68] sm:$0xff]  }
  0xa3   : > { %v2620_v45 = vpop.permute.xlu0 %2619  ;;  %v619_v31 = vsel %vm15010_vm2, %v614_v44, %v12767_v29  ;;  %v1136_v39 = vsel %vm15006_vm0, %v1133_v52, %v15002_v11 }
  0xa4   : > { %v673_v50 = vpop.permute.xlu1 %672  ;;  %2674 = vst.msk [vmem:[#allocation4] sm:$0xff] %vm15013_vm8, %v2620_v45  ;;  %v1748_v45 = vrot.slane %v12770_v41, 2  ;;  %v2328_v41 = vshll.u32 %v11834_v63, 16 }
  0xa5   : > { %725 = vst.msk [vmem:[#allocation4 + $0x10] sm:$0xff] %vm722_vm10, %v673_v50  ;;  %1780 = vrot.lane.b32.xlu0 %v1745_v34, %s12143_s26  ;;  %v1466_v34 = vrot.slane %v1464_v13, 2 }
  0xa6   : > { %1782 = vrot.lane.b32.xlu1 %v1747_v15, %s12143_s26  ;;  %v2600_v15 = vsel %vm15007_vm5, %v2597_v59, %v2599_v6  ;;  %v15000_v59 = vrot.slane %v12778_v56, 2  ;;  %v1988_v6 = vrot.slane %v12795_v21, 2  ;;  %v12990_v21 = vld [vmem:[%s12194_s23 + $0x80] sm:$0xff]  }
  0xa7   : > { %v2622_v16 = vpop.permute.xlu0 %2621 }
  0xa8   : > { %v675_v62 = vpop.permute.xlu1 %674  ;;  %2675 = vst.msk [vmem:[#allocation4 + $0x8] sm:$0xff] %vm15013_vm8, %v2622_v16  ;;  %v2310_v16 = vshll.u32 %v11816_v57, 16 }
  0xa9   : > { %726 = vst.msk [vmem:[#allocation4 + $0x18] sm:$0xff] %vm722_vm10, %v675_v62  ;;  %2020 = vrot.lane.b32.xlu0 %v1985_v12, %s12146_s29  ;;  %v2307_v62 = vshrl.u32 %v11816_v57, 16  ;;  %v12818_v12 = vld [vmem:[%s12194_s23 + $0x68] sm:$0xff]   ;;  %v1458_v57 = vor.u32 %v1457_v58, %v1454_v47  ;;  %v12886_v47 = vld [vmem:[%s12194_s23 + $0x78] sm:$0xff]  }
  0xaa   : > { %2022 = vrot.lane.b32.xlu1 %v1987_v14, %s12146_s29  ;;  %v12806_v14 = vld [vmem:[%s12194_s23 + $0x68] sm:$0xff]   ;;  %v12862_v20 = vrot.slane %v2310_v16, 3 }
  0xab   : > { %v914_v18 = vpop.permute.xlu0 %913  ;;  %v2692_v25 = vld [vmem:[#allocation4] sm:$0xff] }
  0xac   : > { %v916_v33 = vpop.permute.xlu1 %915  ;;  %966 = vst.msk [vmem:[#allocation4 + $0x10] sm:$0xff] %vm15012_vm11, %v914_v18  ;;  %10807 = vmatprep.mubr.msk.bf16.mxu0 %vm15011_vm7, %v2692_v25  ;;  %v15001_v18 = vrot.slane %v12803_v46, 2  ;;  %v12845_v25 = vld [vmem:[%s12194_s23 + $0x68] sm:$0xff]  }
  0xad   : > { %967 = vst.msk [vmem:[#allocation4 + $0x18] sm:$0xff] %vm15012_vm11, %v916_v33  ;;  %2394 = vrot.lane.b32.xlu0 %v2296_v0, %s12147_s30  ;;  %v624_v33 = vshll.u32 %v12806_v14, 16  ;;  %v12836_v0 = vld [vmem:[%s12194_s23 + $0x70] sm:$0xff]  }
  0xae   : > { %2396 = vrot.lane.b32.xlu1 %v2305_v37, %s12147_s30  ;;  %v2316_v37 = vshrl.u32 %v11817_v4, 16  ;;  %v12870_v4 = vor.u32 %v1466_v34, %v1463_v54  ;;  %v12889_v54 = vrot.slane %v632_v24, 1  ;;  %v897_v34 = vrot.slane %v12845_v25, 1 }
  0xaf   : > { %v1154_v9 = vpop.permute.xlu0 %1153  ;;  %v2693_v50 = vld [vmem:[#allocation4 + $0x8] sm:$0xff]  ;;  %v12912_v24 = vrot.slane %v1470_v2, 1 }
  0xb0   : > { %v1156_v48 = vpop.permute.xlu1 %1155  ;;  %1206 = vst.msk [vmem:[#allocation4 + $0x10] sm:$0xff] %vm15005_vm12, %v1154_v9  ;;  %10808 = vmatmul.mubr.msk.bf16.vlgmr.msra.gmra.mrb[0].mxu0 %vm15011_vm7, %v2693_v50  ;;  %v12864_v44 = vrot.slane %v2316_v37, 2  ;;  %v12872_v9 = vrot.slane %v624_v33, 1  ;;  %v628_v50 = vshrl.u32 %v12806_v14, 16  ;;  %v1137_v33 = vrot.slane %v12876_v1, 1 }
  0xb1   : > { %1207 = vst.msk [vmem:[#allocation4 + $0x18] sm:$0xff] %vm15005_vm12, %v1156_v48  ;;  %2635 = vrot.lane.b32.xlu0 %v2600_v15, %s12148_s6  ;;  %v12866_v48 = vrot.slane %v2319_v30, 3  ;;  %v2603_v15 = vrot.slane %v12818_v12, 3  ;;  %v898_v12 = vsel %vm15006_vm0, %v895_v28, %v897_v34 }
  0xb2   : > { %688 = vrot.lane.b32.xlu1 %v611_v51, %s12144_s27  ;;  %v12853_v51 = vrot.slane %v2307_v62, 2  ;;  %v2605_v62 = vrot.slane %v12836_v0, 3 }
  0xb3   : > { %v1528_v32 = vpop.permute.xlu0 %1527 }
  0xb4   : > { %v1530_v8 = vpop.permute.xlu1 %1529  ;;  %1580 = vst.msk [vmem:[#allocation4 + $0x10] sm:$0xff] %vm15004_vm13, %v1528_v32  ;;  %v899_v32 = vrot.slane %v12857_v17, 1  ;;  %v2313_v19 = vor.u32 %v12862_v20, %v12853_v51  ;;  %v1991_v51 = vsel %vm15009_vm1, %v1988_v6, %v15001_v18  ;;  %v2606_v14 = vsel %vm15007_vm5, %v2603_v15, %v2605_v62 }
  0xb5   : > { %1581 = vst.msk [vmem:[#allocation4 + $0x18] sm:$0xff] %vm15004_vm13, %v1530_v8  ;;  %2637 = vrot.lane.b32.xlu0 %v2602_v10, %s12148_s6  ;;  %v1134_v10 = vsel %vm15006_vm0, %v1131_v7, %v1133_v52  ;;  %v12896_v7 = vld [vmem:[%s12194_s23 + $0x70] sm:$0xff]   ;;  %v1468_v52 = vsel %vm14999_vm3, %v1458_v57, %v12870_v4 }
  0xb6   : > { %690 = vrot.lane.b32.xlu1 %v619_v31, %s12144_s27  ;;  %v11827_v31 = vld [vmem:[%s12194_s23 + $0x78] sm:$0xff]  }
  0xb7   : > { %v1769_v13 = vpop.permute.xlu0 %1768  ;;  %v1479_v16 = vshrl.u32 %v11827_v31, 16  ;;  %v1482_v37 = vshll.u32 %v11827_v31, 16  ;;  %v11835_v31 = vld [vmem:[%s12194_s23 + $0x80] sm:$0xff]  }
  0xb8   : > { %v1771_v43 = vpop.permute.xlu1 %1770  ;;  %1821 = vst.msk [vmem:[#allocation4 + $0x10] sm:$0xff] %vm15003_vm14, %v1769_v13  ;;  %v12909_v13 = vld [vmem:[%s12194_s23 + $0x78] sm:$0xff]  }
  0xb9   : > { %1822 = vst.msk [vmem:[#allocation4 + $0x18] sm:$0xff] %vm15003_vm14, %v1771_v43  ;;  %929 = vrot.lane.b32.xlu0 %v894_v55, %s12142_s25  ;;  %v1139_v43 = vrot.slane %v12886_v47, 1  ;;  %v12906_v55 = vld [vmem:[%s12194_s23 + $0x78] sm:$0xff]   ;;  %v12930_v2 = vrot.slane %v1482_v37, 2 }
  0xba   : > { %931 = vrot.lane.b32.xlu1 %v896_v61, %s12142_s25  ;;  %v1459_v61 = vsel %vm14999_vm3, %v12679_v27, %v1458_v57  ;;  %v12919_v27 = vrot.slane %v1473_v60, 2  ;;  %v11864_v57 = vld [vmem:[%s12194_s23 + $0x50] sm:$0xff]  }
  0xbb   : > { %v2009_v58 = vpop.permute.xlu0 %2008  ;;  %381 = vst.msk [vmem:[#allocation4 + $0x50] sm:$0xff] %vm370_vm6, %v11864_v57  ;;  %v2337_v57 = vshll.u32 %v11835_v31, 16 }
  0xbc   : > { %v2011_v8 = vpop.permute.xlu1 %2010  ;;  %2061 = vst.msk [vmem:[#allocation4 + $0x10] sm:$0xff] %vm14998_vm15, %v2009_v58  ;;  %v12928_v58 = vrot.slane %v1479_v16, 1  ;;  %v1476_v23 = vor.u32 %v12919_v27, %v12912_v24 }
  0xbd   : > { %2062 = vst.msk [vmem:[#allocation4 + $0x18] sm:$0xff] %vm14998_vm15, %v2011_v8  ;;  %1169 = vrot.lane.b32.xlu0 %v1134_v10, %s12141_s24  ;;  %vm15016_vm15 = vcmask 261344   ;;  %v1751_v10 = vsel %vm15009_vm1, %v1748_v45, %v15000_v59  ;;  %v12943_v8 = vld [vmem:[%s12194_s23 + $0x80] sm:$0xff]   ;;  %v2325_v59 = vshrl.u32 %v11834_v63, 16 }
  0xbe   : > { %1171 = vrot.lane.b32.xlu1 %v1136_v39, %s12141_s24  ;;  %vm15017_vm3 = vmmov %vm15016_vm15  ;;  %v12963_v63 = vld [vmem:[%s12194_s23 + $0x80] sm:$0xff]   ;;  %v13091_v28 = vor.u32 %v12930_v2, %v12928_v58  ;;  %v15026_v58 = vrot.slane %v12896_v7, 2  ;;  %v15029_v7 = vrot.slane %v12943_v8, 2 }
  0xbf   : > { %v2383_v39 = vpop.permute.xlu0 %2382  ;;  %v12983_v18 = vrot.slane %v2325_v59, 2  ;;  %v13000_v59 = vrot.slane %v2328_v41, 3  ;;  %v13021_v41 = vld [vmem:[%s12194_s23 + $0x88] sm:$0xff]  }
  0xc0   : > { %v2385_v30 = vpop.permute.xlu1 %2384  ;;  %2435 = vst.msk [vmem:[#allocation4 + $0x10] sm:$0xff] %vm15017_vm3, %v2383_v39  ;;  %v12934_v39 = vld [vmem:[%s12194_s23 + $0x78] sm:$0xff]   ;;  %vm15019_vm3 = vcmask 228544  }
  0xc1   : > { %2436 = vst.msk [vmem:[#allocation4 + $0x18] sm:$0xff] %vm15016_vm15, %v2385_v30  ;;  %1543 = vrot.lane.b32.xlu0 %v1459_v61, %s12145_s28  ;;  %v12949_v30 = vld [vmem:[%s12194_s23 + $0x80] sm:$0xff]   ;;  %v640_v20 = vshll.u32 %v12934_v39, 16  ;;  %v644_v11 = vshrl.u32 %v12934_v39, 16  ;;  %vm15020_vm15 = vmmov %vm15019_vm3 }
  0xc2   : > { %1545 = vrot.lane.b32.xlu1 %v1468_v52, %s12145_s28  ;;  %v1749_v52 = vsel %vm15009_vm1, %v1746_v35, %v1748_v45  ;;  %v12957_v35 = vor.u32 %v12866_v48, %v12864_v44  ;;  %v2334_v45 = vshrl.u32 %v11835_v31, 16  ;;  %v11867_v44 = vld [vmem:[%s12194_s23 + $0x58] sm:$0xff]   ;;  %v1989_v31 = vsel %vm15009_vm1, %v1986_v53, %v1988_v6  ;;  %v12987_v61 = vld [vmem:[%s12194_s23 + $0x80] sm:$0xff]  }
  0xc3   : > { %v2624_v16 = vpop.permute.xlu0 %2623  ;;  %v648_v37 = vshll.u32 %v12949_v30, 16  ;;  %382 = vst.msk [vmem:[#allocation4 + $0x58] sm:$0xff] %vm370_vm6, %v11867_v44  ;;  %v622_v53 = vor.u32 %v620_v26, %v12767_v29  ;;  %v13011_v44 = vrot.slane %v2337_v57, 3  ;;  %v2314_v29 = vsel %vm15008_vm4, %v12738_v40, %v2313_v19  ;;  %v11874_v26 = vld [vmem:[%s12194_s23 + $0x60] sm:$0xff]  }
  0xc4   : > { %v677_v60 = vpop.permute.xlu1 %676  ;;  %2676 = vst.msk [vmem:[#allocation4 + $0x10] sm:$0xff] %vm15013_vm8, %v2624_v16  ;;  %v2323_v38 = vsel %vm15008_vm4, %v2313_v19, %v12957_v35  ;;  %v13002_v6 = vrot.slane %v2334_v45, 2  ;;  %v1497_v40 = vshrl.u32 %v13021_v41, 16  ;;  %v11875_v19 = vld [vmem:[%s12194_s23 + $0x68] sm:$0xff]  }
  0xc5   : > { %727 = vst.msk [vmem:[#allocation4 + $0x20] sm:$0xff] %vm722_vm10, %v677_v60  ;;  %v12960_v60 = vld [vmem:[%s12194_s23 + $0x78] sm:$0xff]   ;;  %1784 = vrot.lane.b32.xlu0 %v1749_v52, %s12143_s26 }
  0xc6   : > { %1786 = vrot.lane.b32.xlu1 %v1751_v10, %s12143_s26  ;;  %v12980_v52 = vld [vmem:[%s12194_s23 + $0x78] sm:$0xff]   ;;  %v13008_v10 = vld [vmem:[%s12194_s23 + $0x80] sm:$0xff]   ;;  %383 = vst.msk [vmem:[#allocation4 + $0x60] sm:$0xff] %vm370_vm6, %v11874_v26  ;;  %384 = vst.msk [vmem:[#allocation4 + $0x68] sm:$0xff] %vm370_vm6, %v11875_v19 }
  0xc7   : > { %v2626_v16 = vpop.permute.xlu0 %2625 }
  0xc8   : > { %v679_v48 = vpop.permute.xlu1 %678  ;;  %2677 = vst.msk [vmem:[#allocation4 + $0x18] sm:$0xff] %vm15013_vm8, %v2626_v16  ;;  %v13014_v16 = vrot.slane %v640_v20, 1  ;;  %v627_v20 = vsel %vm15010_vm2, %v622_v53, %v12872_v9 }
  0xc9   : > { %728 = vst.msk [vmem:[#allocation4 + $0x28] sm:$0xff] %vm722_vm10, %v679_v48  ;;  %v13005_v48 = vld [vmem:[%s12194_s23 + $0x88] sm:$0xff]   ;;  %2024 = vrot.lane.b32.xlu0 %v1989_v31, %s12146_s29  ;;  %v13024_v31 = vrot.slane %v648_v37, 1  ;;  %v1491_v37 = vshll.u32 %v13008_v10, 16 }
  0xca   : > { %2026 = vrot.lane.b32.xlu1 %v1991_v51, %s12146_s29  ;;  %v1500_v51 = vshll.u32 %v13021_v41, 16  ;;  %v15041_v41 = vrot.slane %v12987_v61, 1 }
  0xcb   : > { %v918_v45 = vpop.permute.xlu0 %917  ;;  %v2694_v57 = vld [vmem:[#allocation4 + $0x10] sm:$0xff] }
  0xcc   : > { %v920_v5 = vpop.permute.xlu1 %919  ;;  %968 = vst.msk [vmem:[#allocation4 + $0x20] sm:$0xff] %vm15012_vm11, %v918_v45  ;;  %10811 = vmatprep.mubr.msk.bf16.mxu0 %vm15011_vm7, %v2694_v57  ;;  %v630_v45 = vor.u32 %v628_v50, %v12872_v9  ;;  %v900_v50 = vsel %vm15006_vm0, %v897_v34, %v899_v32  ;;  %v15018_v34 = vrot.slane %v12762_v49, 1 }
  0xcd   : > { %969 = vst.msk [vmem:[#allocation4 + $0x28] sm:$0xff] %vm15012_vm11, %v920_v5  ;;  %v1488_v5 = vshrl.u32 %v13008_v10, 16  ;;  %2398 = vrot.lane.b32.xlu0 %v2314_v29, %s12147_s30 }
  0xce   : > { %2400 = vrot.lane.b32.xlu1 %v2323_v38, %s12147_s30  ;;  %v2604_v38 = vsel %vm15007_vm5, %v2601_v36, %v2603_v15  ;;  %v635_v3 = vsel %vm15010_vm2, %v630_v45, %v12889_v54  ;;  %v1138_v19 = vsel %vm15006_vm0, %v15018_v34, %v1137_v33  ;;  %v15034_v34 = vrot.slane %v12960_v60, 3  ;;  %v13201_v60 = vld [vmem:[%s12194_s23 + $0x88] sm:$0xff]  }
  0xcf   : > { %v1158_v29 = vpop.permute.xlu0 %1157  ;;  %v2695_v53 = vld [vmem:[#allocation4 + $0x18] sm:$0xff] }
  0xd0   : > { %v1160_v57 = vpop.permute.xlu1 %1159  ;;  %1208 = vst.msk [vmem:[#allocation4 + $0x20] sm:$0xff] %vm15005_vm12, %v1158_v29  ;;  %10812 = vmatmul.mubr.msk.bf16.gmra.mrb[4].mxu0 %vm15011_vm7, %v2695_v53  ;;  %v13120_v53 = vrot.slane %v1488_v5, 1  ;;  %v2331_v5 = vor.u32 %v13000_v59, %v12983_v18  ;;  %v15033_v18 = vshrl.u32 %v12822_v22, 16  ;;  %v15038_v39 = vmov %v15034_v34 }
  0xd1   : > { %1209 = vst.msk [vmem:[#allocation4 + $0x28] sm:$0xff] %vm15005_vm12, %v1160_v57  ;;  %2639 = vrot.lane.b32.xlu0 %v2604_v38, %s12148_s6  ;;  %vm15023_vm12 = vcmask 261344   ;;  %v15027_v38 = vmov %v15026_v58 }
  0xd2   : > { %692 = vrot.lane.b32.xlu1 %v627_v20, %s12144_s27  ;;  %v1140_v20 = vsel %vm15006_vm0, %v1137_v33, %v1139_v43  ;;  %vm15024_vm0 = vmmov %vm15023_vm12  ;;  %v15025_v33 = vrot.slane %v12906_v55, 2  ;;  %v2332_v59 = vsel %vm15008_vm4, %v12957_v35, %v2331_v5 }
  0xd3   : > { %v1532_v9 = vpop.permute.xlu0 %1531 }
  0xd4   : > { %v1534_v36 = vpop.permute.xlu1 %1533  ;;  %1582 = vst.msk [vmem:[#allocation4 + $0x20] sm:$0xff] %vm15004_vm13, %v1532_v9  ;;  %v1755_v2 = vsel %vm15009_vm1, %v15026_v58, %v15025_v33  ;;  %v13137_v9 = vor.u32 %v13011_v44, %v13002_v6 }
  0xd5   : > { %1583 = vst.msk [vmem:[#allocation4 + $0x28] sm:$0xff] %vm15004_vm13, %v1534_v36  ;;  %2641 = vrot.lane.b32.xlu0 %v2606_v14, %s12148_s6 }
  0xd6   : > { %694 = vrot.lane.b32.xlu1 %v635_v3, %s12144_s27  ;;  %v11876_v3 = vld [vmem:[%s12194_s23 + $0x70] sm:$0xff]  }
  0xd7   : > { %v1773_v15 = vpop.permute.xlu0 %1772  ;;  %385 = vst.msk [vmem:[#allocation4 + $0x70] sm:$0xff] %vm370_vm6, %v11876_v3 }
  0xd8   : > { %v1775_v26 = vpop.permute.xlu1 %1774  ;;  %1823 = vst.msk [vmem:[#allocation4 + $0x20] sm:$0xff] %vm15003_vm14, %v1773_v15 }
  0xd9   : > { %1824 = vst.msk [vmem:[#allocation4 + $0x28] sm:$0xff] %vm15003_vm14, %v1775_v26  ;;  %933 = vrot.lane.b32.xlu0 %v898_v12, %s12142_s25  ;;  %vm15021_vm14 = vsmask.f32 6400  ;;  %v15032_v12 = vrot.slane %v12803_v46, 2  ;;  %v2341_v46 = vsel %vm15008_vm4, %v2331_v5, %v13137_v9 }
  0xda   : > { %935 = vrot.lane.b32.xlu1 %v900_v50, %s12142_s25  ;;  %v1486_v24 = vsel %vm15021_vm14, %v1476_v23, %v13091_v28  ;;  %vm15022_vm13 = vmmov %vm15021_vm14 }
  0xdb   : > { %v2013_v45 = vpop.permute.xlu0 %2012  ;;  %v1477_v1 = vsel %vm15022_vm13, %v12870_v4, %v1476_v23  ;;  %v15028_v4 = vrot.slane %v12778_v56, 2  ;;  %v15030_v56 = vrot.slane %v12909_v13, 2  ;;  %v11877_v23 = vld [vmem:[%s12194_s23 + $0x78] sm:$0xff]   ;;  %v638_v13 = vor.u32 %v15033_v18, %v12889_v54 }
  0xdc   : > { %v2015_v25 = vpop.permute.xlu1 %2014  ;;  %2063 = vst.msk [vmem:[#allocation4 + $0x20] sm:$0xff] %vm15020_vm15, %v2013_v45  ;;  %v646_v54 = vor.u32 %v644_v11, %v13014_v16  ;;  %vm15039_vm13 = vcmask 162944  }
  0xdd   : > { %2064 = vst.msk [vmem:[#allocation4 + $0x28] sm:$0xff] %vm15019_vm3, %v2015_v25  ;;  %1173 = vrot.lane.b32.xlu0 %v1138_v19, %s12141_s24  ;;  %v1753_v29 = vsel %vm15009_vm1, %v15028_v4, %v15027_v38  ;;  %v1995_v14 = vsel %vm15009_vm1, %v15030_v56, %v15029_v7  ;;  %v15031_v26 = vmov %v15030_v56  ;;  %v643_v22 = vsel %vm15010_vm2, %v638_v13, %v13014_v16  ;;  %vm15040_vm14 = vmmov %vm15039_vm13  ;;  %v11853_v4 = vld [vmem:[%s12194_s23 + $0x90] sm:$0xff]   ;;  %v11855_v13 = vld [vmem:[%s12194_s23 + $0x88] sm:$0xff]  }
  0xde   : > { %1175 = vrot.lane.b32.xlu1 %v1140_v20, %s12141_s24  ;;  %v1993_v15 = vsel %vm15009_vm1, %v15032_v12, %v15031_v26  ;;  %v1493_v20 = vrot.slane %v1491_v37, 2  ;;  %386 = vst.msk [vmem:[#allocation4 + $0x78] sm:$0xff] %vm370_vm6, %v11877_v23  ;;  %v1499_v37 = vrot.slane %v1497_v40, 1  ;;  %v2608_v40 = vsel %vm15007_vm5, %v2605_v62, %v15034_v34  ;;  %v13231_v12 = vld [vmem:[%s12194_s23 + $0x90] sm:$0xff]  }
  0xdf   : > { %v2387_v49 = vpop.permute.xlu0 %2386  ;;  %v651_v11 = vsel %vm15010_vm2, %v646_v54, %v13024_v31  ;;  %v15037_v62 = vrot.slane %v12963_v63, 3  ;;  %vm15043_vm3 = vcmask 1046528   ;;  %v1758_v26 = vrot.slane %v13201_v60, 2 }
  0xe0   : > { %v2389_v27 = vpop.permute.xlu1 %2388  ;;  %2437 = vst.msk [vmem:[#allocation4 + $0x20] sm:$0xff] %vm15024_vm0, %v2387_v49  ;;  %vm15035_vm0 = vcmask 130144   ;;  %v11847_v49 = vld [vmem:[%s12194_s23 + $0x80] sm:$0xff]   ;;  %vm15045_vm15 = vmmov %vm15043_vm3  ;;  %v1998_v18 = vrot.slane %v13231_v12, 2 }
  0xe1   : > { %2438 = vst.msk [vmem:[#allocation4 + $0x28] sm:$0xff] %vm15023_vm12, %v2389_v27  ;;  %1547 = vrot.lane.b32.xlu0 %v1477_v1, %s12145_s28  ;;  %vm15036_vm12 = vmmov %vm15035_vm0  ;;  %v2610_v16 = vsel %vm15007_vm5, %v15038_v39, %v15037_v62  ;;  %v15042_v27 = vrot.slane %v12980_v52, 1  ;;  %v15049_v52 = vrot.slane %v12990_v21, 1  ;;  %v15060_v62 = vrot.slane %v12943_v8, 2 }
  0xe2   : > { %1549 = vrot.lane.b32.xlu1 %v1486_v24, %s12145_s28  ;;  %v1502_v24 = vrot.slane %v1500_v51, 2 }
  0xe3   : > { %v2628_v36 = vpop.permute.xlu0 %2627  ;;  %v904_v1 = vsel %vm15043_vm3, %v15042_v27, %v15041_v41  ;;  %v15044_v58 = vmov %v15042_v27  ;;  %v15051_v7 = vmov %v15049_v52 }
  0xe4   : > { %v681_v57 = vpop.permute.xlu1 %680  ;;  %2678 = vst.msk [vmem:[#allocation4 + $0x20] sm:$0xff] %vm15013_vm8, %v2628_v36  ;;  %v13220_v3 = vor.u32 %v1502_v24, %v1499_v37  ;;  %v656_v24 = vshll.u32 %v11855_v13, 16 }
  0xe5   : > { %729 = vst.msk [vmem:[#allocation4 + $0x30] sm:$0xff] %vm722_vm10, %v681_v57  ;;  %1788 = vrot.lane.b32.xlu0 %v1753_v29, %s12143_s26  ;;  %v11852_v57 = vld [vmem:[%s12194_s23 + $0x88] sm:$0xff]   ;;  %v15048_v29 = vrot.slane %v13005_v48, 1 }
  0xe6   : > { %1790 = vrot.lane.b32.xlu1 %v1755_v2, %s12143_s26  ;;  %v902_v2 = vsel %vm15045_vm15, %v899_v32, %v15044_v58  ;;  %v1494_v32 = vor.u32 %v1493_v20, %v13120_v53  ;;  %v2343_v53 = vshrl.u32 %v11852_v57, 16  ;;  %v2346_v21 = vshll.u32 %v11852_v57, 16  ;;  %v13281_v57 = vld [vmem:[%s12194_s23 + $0x90] sm:$0xff]  }
  0xe7   : > { %v2630_v25 = vpop.permute.xlu0 %2629  ;;  %v658_v27 = vrot.slane %v656_v24, 1 }
  0xe8   : > { %v683_v50 = vpop.permute.xlu1 %682  ;;  %2679 = vst.msk [vmem:[#allocation4 + $0x28] sm:$0xff] %vm15013_vm8, %v2630_v25 }
  0xe9   : > { %730 = vst.msk [vmem:[#allocation4 + $0x38] sm:$0xff] %vm722_vm10, %v683_v50  ;;  %2028 = vrot.lane.b32.xlu0 %v1993_v15, %s12146_s29  ;;  %v1756_v50 = vrot.slane %v11847_v49, 2  ;;  %v2355_v15 = vshll.u32 %v11853_v4, 16 }
  0xea   : > { %2030 = vrot.lane.b32.xlu1 %v1995_v14, %s12146_s29  ;;  %v11850_v14 = vld [vmem:[%s12194_s23 + $0x88] sm:$0xff]  }
  0xeb   : > { %v922_v6 = vpop.permute.xlu0 %921  ;;  %v2696_v44 = vld [vmem:[#allocation4 + $0x20] sm:$0xff]  ;;  %v1996_v25 = vrot.slane %v11850_v14, 2 }
  0xec   : > { %v924_v10 = vpop.permute.xlu1 %923  ;;  %970 = vst.msk [vmem:[#allocation4 + $0x30] sm:$0xff] %vm15012_vm11, %v922_v6  ;;  %10815 = vmatprep.mubr.msk.bf16.mxu0 %vm15011_vm7, %v2696_v44  ;;  %v2357_v44 = vrot.slane %v2355_v15, 3  ;;  %v11860_v15 = vld [vmem:[%s12194_s23 + $0x90] sm:$0xff]  }
  0xed   : > { %971 = vst.msk [vmem:[#allocation4 + $0x38] sm:$0xff] %vm15012_vm11, %v924_v10  ;;  %2402 = vrot.lane.b32.xlu0 %v2332_v59, %s12147_s30  ;;  %v2345_v10 = vrot.slane %v2343_v53, 2  ;;  %v2348_v59 = vrot.slane %v2346_v21, 3  ;;  %v1997_v39 = vsel %vm15009_vm1, %v15060_v62, %v1996_v25 }
  0xee   : > { %2404 = vrot.lane.b32.xlu1 %v2341_v46, %s12147_s30 }
  0xef   : > { %v1162_v19 = vpop.permute.xlu0 %1161  ;;  %v2697_v45 = vld [vmem:[#allocation4 + $0x28] sm:$0xff] }
  0xf0   : > { %v1164_v35 = vpop.permute.xlu1 %1163  ;;  %1210 = vst.msk [vmem:[#allocation4 + $0x30] sm:$0xff] %vm15036_vm12, %v1162_v19  ;;  %10816 = vmatmul.mubr.msk.bf16.gmra.mrb[8].mxu0 %vm15011_vm7, %v2697_v45  ;;  %v2349_v19 = vor.u32 %v2348_v59, %v2345_v10  ;;  %v3777_v10 = vld [vmem:[#allocation2 + $0x98] sm:$0xe] }
  0xf1   : > { %1211 = vst.msk [vmem:[#allocation4 + $0x38] sm:$0xff] %vm15035_vm0, %v1164_v35  ;;  %2643 = vrot.lane.b32.xlu0 %v2608_v40, %s12148_s6  ;;  %vm15046_vm0 = vcmask 195744   ;;  %v11878_v35 = vld [vmem:[%s12194_s23 + $0x80] sm:$0xff]   ;;  %v652_v40 = vshrl.u32 %v12949_v30, 16  ;;  %v11879_v30 = vld [vmem:[%s12194_s23 + $0x88] sm:$0xff]  }
  0xf2   : > { %696 = vrot.lane.b32.xlu1 %v643_v22, %s12144_s27  ;;  %vm15047_vm12 = vmmov %vm15046_vm0  ;;  %v15059_v22 = vrot.slane %v12906_v55, 2  ;;  %387 = vst.msk [vmem:[#allocation4 + $0x80] sm:$0xff] %vm370_vm6, %v11878_v35  ;;  %v1999_v55 = vsel %vm15009_vm1, %v1996_v25, %v1998_v18  ;;  %v2350_v58 = vsel %vm15008_vm4, %v13137_v9, %v2349_v19 }
  0xf3   : > { %v1536_v51 = vpop.permute.xlu0 %1535  ;;  %v654_v41 = vor.u32 %v652_v40, %v13024_v31  ;;  %388 = vst.msk [vmem:[#allocation4 + $0x88] sm:$0xff] %vm370_vm6, %v11879_v30  ;;  %vm15062_vm6 = vcmask 130144   ;;  %v11881_v30 = vld [vmem:[%s14993_s3 + $0x8] sm:$0xff]  }
  0xf4   : > { %v1538_v0 = vpop.permute.xlu1 %1537  ;;  %1584 = vst.msk [vmem:[#allocation4 + $0x30] sm:$0xff] %vm15040_vm14, %v1536_v51  ;;  %vm15052_vm14 = vmmov %vm15043_vm3  ;;  %v1757_v54 = vsel %vm15009_vm1, %v15059_v22, %v1756_v50  ;;  %v12149_v22 = vmov 0  }
  0xf5   : > { %1585 = vst.msk [vmem:[#allocation4 + $0x38] sm:$0xff] %vm15039_vm13, %v1538_v0  ;;  %2645 = vrot.lane.b32.xlu0 %v2610_v16, %s12148_s6  ;;  %vm15050_vm13 = vmmov %vm15043_vm3  ;;  %v1142_v56 = vsel %vm15052_vm14, %v1139_v43, %v15051_v7  ;;  %vm15053_vm3 = vcmask 228544   ;;  %v2352_v43 = vshrl.u32 %v11853_v4, 16  ;;  %v11854_v16 = vld [vmem:[%s12194_s23 + $0x88] sm:$0xff]   ;;  %v659_v9 = vsel %vm15010_vm2, %v654_v41, %v658_v27 }
  0xf6   : > { %698 = vrot.lane.b32.xlu1 %v651_v11, %s12144_s27  ;;  %v1144_v17 = vsel %vm15050_vm13, %v15049_v52, %v15048_v29  ;;  %vm15054_vm15 = vmmov %vm15053_vm3  ;;  %vm15057_vm13 = vcmask 261344   ;;  %v11857_v11 = vld [vmem:[%s12194_s23 + $0x90] ss:$0 sps:$4 sm:$0x11]   ;;  %v11858_v4 = vld [vmem:[%s12194_s23 + $0x88] sm:$0xff]  }
  0xf7   : > { %v1777_v38 = vpop.permute.xlu0 %1776  ;;  %vm15058_vm14 = vmmov %vm15057_vm13  ;;  %v2354_v6 = vrot.slane %v2352_v43, 2  ;;  %v664_v49 = vshll.u32 %v11857_v11, 16  ;;  %v11862_v29 = vld [vmem:[%s12194_s23 + $0x90] sm:$0xff]   ;;  %v11863_v52 = vld [vmem:[%s12194_s23 + $0x98] ss:$0 sps:$4 sm:$0x33]  }
  0xf8   : > { %v1779_v33 = vpop.permute.xlu1 %1778  ;;  %1825 = vst.msk [vmem:[#allocation4 + $0x30] sm:$0xff] %vm15047_vm12, %v1777_v38  ;;  %v905_v21 = vrot.slane %v11858_v4, 1  ;;  %v1509_v43 = vshll.u32 %v11862_v29, 16  ;;  %3766 = vst [vmem:[#allocation2] sm:$0xf] %v12149_v22  ;;  %v11882_v4 = vld [vmem:[%s14993_s3 + $0x10] sm:$0xff]  }
  0xf9   : > { %1826 = vst.msk [vmem:[#allocation4 + $0x38] sm:$0xff] %vm15046_vm0, %v1779_v33  ;;  %937 = vrot.lane.b32.xlu0 %v902_v2, %s12142_s25  ;;  %vm15055_vm0 = vsmask.f32 6400  ;;  %v13262_v45 = vor.u32 %v2357_v44, %v2354_v6  ;;  %v2611_v2 = vrot.slane %v11854_v16, 3  ;;  %3767 = vst [vmem:[#allocation2 + $0x4] sm:$0xf] %v12149_v22 }
  0xfa   : > { %939 = vrot.lane.b32.xlu1 %v904_v1, %s12142_s25  ;;  %v1504_v47 = vsel %vm15055_vm0, %v1494_v32, %v13220_v3  ;;  %vm15056_vm12 = vmmov %vm15055_vm0  ;;  %v660_v1 = vshrl.u32 %v11855_v13, 16  ;;  %vm3775_vm0 = vsmask.f32 7942  ;;  %3780 = vst [vmem:[#allocation2 + $0x9c] sm:$0xf] %v12149_v22  ;;  %v1511_v35 = vrot.slane %v1509_v43, 2 }
  0xfb   : > { %v2017_v5 = vpop.permute.xlu0 %2016  ;;  %v1495_v23 = vsel %vm15056_vm12, %v13091_v28, %v1494_v32  ;;  %v1759_v28 = vsel %vm15009_vm1, %v1756_v50, %v1758_v26  ;;  %v2359_v8 = vsel %vm15008_vm4, %v2349_v19, %v13262_v45  ;;  %v666_v32 = vrot.slane %v664_v49, 1  ;;  %3781 = vst [vmem:[#allocation2 + $0xa0] sm:$0xf] %v12149_v22  ;;  %v11885_v22 = vld [vmem:[%s14993_s3 + $0x28] sm:$0xff]  }
  0xfc   : > { %v2019_v36 = vpop.permute.xlu1 %2018  ;;  %2065 = vst.msk [vmem:[#allocation4 + $0x30] sm:$0xff] %vm15054_vm15, %v2017_v5  ;;  %v2613_v5 = vrot.slane %v13281_v57, 3  ;;  %vm3774_vm15 = vcmask 1043457   ;;  %v1145_v19 = vrot.slane %v11860_v15, 1 }
  0xfd   : > { %2066 = vst.msk [vmem:[#allocation4 + $0x38] sm:$0xff] %vm15053_vm3, %v2019_v36  ;;  %1177 = vrot.lane.b32.xlu0 %v1142_v56, %s12141_s24  ;;  %v11859_v36 = vld [vmem:[%s12194_s23 + $0x90] ss:$0 sps:$4 sm:$0x11]   ;;  %v15061_v56 = vrot.slane %v12963_v63, 3  ;;  %vm15063_vm3 = vmmov %vm15062_vm6  ;;  %v1515_v63 = vshrl.u32 %v11863_v52, 16 }
  0xfe   : > { %1179 = vrot.lane.b32.xlu1 %v1144_v17, %s12141_s24  ;;  %v662_v17 = vor.u32 %v660_v1, %v658_v27  ;;  %v907_v25 = vrot.slane %v11859_v36, 1  ;;  %vm13305_vm12 = vmand %vm3774_vm15, %vm3775_vm0  ;;  %vm15071_vm15 = vcmask 195744   ;;  %v11870_v27 = vld [vmem:[%s12194_s23 + $0x98] sm:$0xff]   ;;  %v11871_v1 = vld [vmem:[%s12194_s23 + $0xa0] ss:$0 sps:$4 sm:$0x77]  }
  0xff   : > { %v2391_v46 = vpop.permute.xlu0 %2390  ;;  %v2612_v14 = vsel %vm15007_vm5, %v15061_v56, %v2611_v2  ;;  %v3778_v6 = vsel %vm13305_vm12, 0, %v3777_v10  ;;  %vm15072_vm0 = vmmov %vm15071_vm15  ;;  %v2373_v36 = vshll.u32 %v11871_v1, 16 }
 0x100   : > { %v2393_v20 = vpop.permute.xlu1 %2392  ;;  %2439 = vst.msk [vmem:[#allocation4 + $0x30] sm:$0xff] %vm15058_vm14, %v2391_v46  ;;  %v11861_v46 = vld [vmem:[%s12194_s23 + $0x98] ss:$0 sps:$4 sm:$0x11]   ;;  %3779 = vst [vmem:[#allocation2 + $0x98] sm:$0xe] %v3778_v6 }
 0x101   : > { %2440 = vst.msk [vmem:[#allocation4 + $0x38] sm:$0xff] %vm15057_vm13, %v2393_v20  ;;  %1551 = vrot.lane.b32.xlu0 %v1495_v23, %s12145_s28  ;;  %v1518_v20 = vshll.u32 %v11863_v52, 16  ;;  %v667_v23 = vsel %vm15010_vm2, %v662_v17, %v666_v32  ;;  %vm15066_vm13 = vcmask 162944   ;;  %v1147_v24 = vrot.slane %v11861_v46, 1  ;;  %v11884_v46 = vld [vmem:[%s14993_s3 + $0x20] sm:$0xff]  }
 0x102   : > { %1553 = vrot.lane.b32.xlu1 %v1504_v47, %s12145_s28  ;;  %v1506_v47 = vshrl.u32 %v11862_v29, 16  ;;  %vm15067_vm14 = vmmov %vm15066_vm13  ;;  %v2364_v17 = vshll.u32 %v11870_v27, 16  ;;  %v2370_v32 = vshrl.u32 %v11871_v1, 16 }
 0x103   : > { %v2632_v34 = vpop.permute.xlu0 %2631  ;;  %v1520_v40 = vrot.slane %v1518_v20, 2 }
 0x104   : > { %v685_v37 = vpop.permute.xlu1 %684  ;;  %2680 = vst.msk [vmem:[#allocation4 + $0x30] sm:$0xff] %vm15013_vm8, %v2632_v34  ;;  %v1517_v34 = vrot.slane %v1515_v63, 1  ;;  %v2372_v15 = vrot.slane %v2370_v32, 2  ;;  %v2375_v63 = vrot.slane %v2373_v36, 3 }
 0x105   : > { %731 = vst.msk [vmem:[#allocation4 + $0x40] sm:$0xff] %vm722_vm10, %v685_v37  ;;  %1792 = vrot.lane.b32.xlu0 %v1757_v54, %s12143_s26  ;;  %v11880_v37 = vld [vmem:[%s14993_s3] sm:$0xff]   ;;  %v1508_v54 = vrot.slane %v1506_v47, 1 }
 0x106   : > { %1794 = vrot.lane.b32.xlu1 %v1759_v28, %s12143_s26  ;;  %v2614_v28 = vsel %vm15007_vm5, %v2611_v2, %v2613_v5  ;;  %10843 = vmatprep.subr.bf16.mxu0 %v11880_v37  ;;  %v1521_v41 = vor.u32 %v1520_v40, %v1517_v34  ;;  %v2376_v60 = vor.u32 %v2375_v63, %v2372_v15 }
 0x107   : > { %v2634_v51 = vpop.permute.xlu0 %2633  ;;  %10844 = vmatpush3.bf16.msra.mxu0 %v11880_v37 }
 0x108   : > { %v687_v0 = vpop.permute.xlu1 %686  ;;  %2681 = vst.msk [vmem:[#allocation4 + $0x38] sm:$0xff] %vm15013_vm8, %v2634_v51  ;;  %v1512_v51 = vor.u32 %v1511_v35, %v1508_v54  ;;  %10845 = vmatprep.subr.bf16.mxu0 %v11881_v30 }
 0x109   : > { %732 = vst.msk [vmem:[#allocation4 + $0x48] sm:$0xff] %vm722_vm10, %v687_v0  ;;  %2032 = vrot.lane.b32.xlu0 %v1997_v39, %s12146_s29  ;;  %v15069_v0 = vrot.slane %v12987_v61, 1  ;;  %v11865_v39 = vld [vmem:[%s12194_s23 + $0x90] sm:$0xff]  }
 0x10a   : > { %2034 = vrot.lane.b32.xlu1 %v1999_v55, %s12146_s29  ;;  %v1760_v2 = vrot.slane %v11865_v39, 2  ;;  %v11887_v39 = vld [vmem:[%s14993_s3 + $0x38] sm:$0xff]  }
 0x10b   : > { %v926_v31 = vpop.permute.xlu0 %925  ;;  %v2698_v38 = vld [vmem:[#allocation4 + $0x30] sm:$0xff]  ;;  %10846 = vmatpush3.bf16.msra.mxu0 %v11881_v30 }
 0x10c   : > { %v928_v33 = vpop.permute.xlu1 %927  ;;  %972 = vst.msk [vmem:[#allocation4 + $0x40] sm:$0xff] %vm15012_vm11, %v926_v31  ;;  %10819 = vmatprep.mubr.msk.bf16.mxu0 %vm15011_vm7, %v2698_v38  ;;  %v11869_v38 = vld [vmem:[%s12194_s23 + $0xa0] ss:$0 sps:$4 sm:$0x33]   ;;  %10847 = vmatprep.subr.bf16.mxu0 %v11882_v4 }
 0x10d   : > { %973 = vst.msk [vmem:[#allocation4 + $0x48] sm:$0xff] %vm15012_vm11, %v928_v33  ;;  %2406 = vrot.lane.b32.xlu0 %v2350_v58, %s12147_s30  ;;  %v15074_v33 = vrot.slane %v13005_v48, 1  ;;  %v11868_v48 = vld [vmem:[%s12194_s23 + $0x98] sm:$0xff]   ;;  %v2002_v47 = vrot.slane %v11869_v38, 2 }
 0x10e   : > { %2408 = vrot.lane.b32.xlu1 %v2359_v8, %s12147_s30  ;;  %v11866_v8 = vld [vmem:[%s12194_s23 + $0x98] ss:$0 sps:$4 sm:$0x33]  }
 0x10f   : > { %v1166_v50 = vpop.permute.xlu0 %1165  ;;  %v2699_v53 = vld [vmem:[#allocation4 + $0x38] sm:$0xff]  ;;  %v1762_v52 = vrot.slane %v11866_v8, 2  ;;  %10848 = vmatpush3.bf16.msra.mxu0 %v11882_v4 }
 0x110   : > { %v1168_v7 = vpop.permute.xlu1 %1167  ;;  %1212 = vst.msk [vmem:[#allocation4 + $0x40] sm:$0xff] %vm15063_vm3, %v1166_v50  ;;  %10820 = vmatmul.mubr.msk.bf16.gmra.mrb[12].mxu0 %vm15011_vm7, %v2699_v53  ;;  %v11883_v50 = vld [vmem:[%s14993_s3 + $0x18] sm:$0xff]  }
 0x111   : > { %1213 = vst.msk [vmem:[#allocation4 + $0x48] sm:$0xff] %vm15062_vm6, %v1168_v7  ;;  %2647 = vrot.lane.b32.xlu0 %v2612_v14, %s12148_s6  ;;  %vm15068_vm6 = vcmask 1046528   ;;  %v1763_v53 = vsel %vm15009_vm1, %v1760_v2, %v1762_v52  ;;  %10849 = vmatprep.subr.bf16.mxu0 %v11883_v50 }
 0x112   : > { %700 = vrot.lane.b32.xlu1 %v659_v9, %s12144_s27  ;;  %v908_v55 = vsel %vm15068_vm6, %v905_v21, %v907_v25  ;;  %vm15070_vm3 = vmmov %vm15068_vm6  ;;  %vm15076_vm6 = vcmask 228544   ;;  %v2361_v9 = vshrl.u32 %v11870_v27, 16 }
 0x113   : > { %v1540_v44 = vpop.permute.xlu0 %1539  ;;  %v906_v62 = vsel %vm15070_vm3, %v15069_v0, %v905_v21  ;;  %v2000_v21 = vrot.slane %v11868_v48, 2  ;;  %10850 = vmatpush3.bf16.msra.mxu0 %v11883_v50  ;;  %v11900_v50 = vld [vmem:[%s14993_s3 + $0x128] sm:$0xff]  }
 0x114   : > { %v1542_v59 = vpop.permute.xlu1 %1541  ;;  %1586 = vst.msk [vmem:[#allocation4 + $0x40] sm:$0xff] %vm15067_vm14, %v1540_v44  ;;  %vm15075_vm14 = vmmov %vm15070_vm3  ;;  %v2363_v43 = vrot.slane %v2361_v9, 2  ;;  %10851 = vmatprep.subr.bf16.mxu0 %v11884_v46 }
 0x115   : > { %1587 = vst.msk [vmem:[#allocation4 + $0x48] sm:$0xff] %vm15066_vm13, %v1542_v59  ;;  %2649 = vrot.lane.b32.xlu0 %v2614_v28, %s12148_s6  ;;  %vm15073_vm13 = vmmov %vm15070_vm3  ;;  %v1146_v58 = vsel %vm15075_vm14, %v15074_v33, %v1145_v19  ;;  %v2003_v10 = vsel %vm15009_vm1, %v2000_v21, %v2002_v47  ;;  %v11872_v28 = vld [vmem:[%s12194_s23 + $0x98] sm:$0xff]   ;;  %v2001_v44 = vsel %vm15009_vm1, %v1998_v18, %v2000_v21  ;;  %v3009_v21 = vlaneseq }
 0x116   : > { %702 = vrot.lane.b32.xlu1 %v667_v23, %s12144_s27  ;;  %v1148_v61 = vsel %vm15073_vm13, %v1145_v19, %v1147_v24  ;;  %vm15077_vm3 = vmmov %vm15076_vm6  ;;  %vm15080_vm13 = vcmask 261344   ;;  %v1761_v23 = vsel %vm15009_vm1, %v1758_v26, %v1760_v2  ;;  %v11873_v26 = vld [vmem:[%s12194_s23 + $0xa0] ss:$0 sps:$4 sm:$0x77]   ;;  %v2615_v35 = vrot.slane %v11872_v28, 3  ;;  %v11886_v19 = vld [vmem:[%s14993_s3 + $0x30] sm:$0xff]  }
 0x117   : > { %v1781_v16 = vpop.permute.xlu0 %1780  ;;  %vm15081_vm14 = vmmov %vm15080_vm13  ;;  %10852 = vmatpush3.bf16.msra.mxu0 %v11884_v46  ;;  %v2617_v12 = vrot.slane %v11873_v26, 3  ;;  %v11896_v2 = vld [vmem:[%s14993_s3 + $0x108] sm:$0xff]  }
 0x118   : > { %v1783_v11 = vpop.permute.xlu1 %1782  ;;  %1827 = vst.msk [vmem:[#allocation4 + $0x40] sm:$0xff] %vm15072_vm0, %v1781_v16  ;;  %10853 = vmatprep.subr.bf16.mxu0 %v11885_v22 }
 0x119   : > { %1828 = vst.msk [vmem:[#allocation4 + $0x48] sm:$0xff] %vm15071_vm15, %v1783_v11  ;;  %941 = vrot.lane.b32.xlu0 %v906_v62, %s12142_s25  ;;  %vm15078_vm15 = vsmask.f32 6400  ;;  %v2618_v24 = vsel %vm15007_vm5, %v2615_v35, %v2617_v12  ;;  %v2616_v11 = vsel %vm15007_vm5, %v2613_v5, %v2615_v35  ;;  %vm15090_vm5 = vcmask 261344  }
 0x11a   : > { %943 = vrot.lane.b32.xlu1 %v908_v55, %s12142_s25  ;;  %v1522_v29 = vsel %vm15078_vm15, %v1512_v51, %v1521_v41  ;;  %vm15079_vm0 = vmmov %vm15078_vm15  ;;  %vm15084_vm15 = vcmask 162944   ;;  %s11617_s25 = smul.u32 144, %s15385_s19 }
 0x11b   : > { %v2021_v31 = vpop.permute.xlu0 %2020  ;;  %v1513_v56 = vsel %vm15079_vm0, %v13220_v3, %v1512_v51  ;;  %v2366_v3 = vrot.slane %v2364_v17, 3  ;;  %10854 = vmatpush3.bf16.msra.mxu0 %v11885_v22  ;;  %vm15085_vm0 = vmmov %vm15084_vm15  ;;  %v11898_v17 = vld [vmem:[%s14993_s3 + $0x118] sm:$0xff]  }
 0x11c   : > { %v2023_v49 = vpop.permute.xlu1 %2022  ;;  %2067 = vst.msk [vmem:[#allocation4 + $0x40] sm:$0xff] %vm15077_vm3, %v2021_v31  ;;  %10855 = vmatprep.subr.bf16.mxu0 %v11886_v19  ;;  %s14906_s23 = scalar_lea.vmem %s14995_s5, %s11617_s25 }
 0x11d   : > { %2068 = vst.msk [vmem:[#allocation4 + $0x48] sm:$0xff] %vm15076_vm6, %v2023_v49  ;;  %1181 = vrot.lane.b32.xlu0 %v1146_v58, %s12141_s24  ;;  %v2367_v59 = vor.u32 %v2366_v3, %v2363_v43  ;;  %vm15082_vm6 = vcmask 130144   ;;  %v11893_v49 = vld [vmem:[%s14993_s3 + $0x100] sm:$0xff]   ;;  %v13451_v3 = vshrl.u32 %v3009_v21, 7 }
 0x11e   : > { %1183 = vrot.lane.b32.xlu1 %v1148_v61, %s12141_s24  ;;  %vm15083_vm3 = vmmov %vm15082_vm6  ;;  %11311 = vmatprep.subr.bf16.mxu1 %v11893_v49 }
 0x11f   : > { %v2395_v14 = vpop.permute.xlu0 %2394  ;;  %v2377_v54 = vsel %vm15008_vm4, %v2367_v59, %v2376_v60  ;;  %v2368_v34 = vsel %vm15008_vm4, %v13262_v45, %v2367_v59  ;;  %10856 = vmatpush3.bf16.msra.mxu0 %v11886_v19  ;;  %vm15091_vm4 = vmmov %vm15090_vm5  ;;  %11319 = vmatpush3.bf16.msra.mxu1 %v11893_v49  ;;  %v3011_v59 = vadd.s32 8, %v13451_v3 }
 0x120   : > { %v2397_v7 = vpop.permute.xlu1 %2396  ;;  %2441 = vst.msk [vmem:[#allocation4 + $0x40] sm:$0xff] %vm15081_vm14, %v2395_v14  ;;  %10857 = vmatprep.subr.bf16.mxu0 %v11887_v39  ;;  %11312 = vmatprep.subr.bf16.mxu1 %v11896_v2 }
 0x121   : > { %2442 = vst.msk [vmem:[#allocation4 + $0x48] sm:$0xff] %vm15080_vm13, %v2397_v7  ;;  %1555 = vrot.lane.b32.xlu0 %v1513_v56, %s12145_s28  ;;  %vm15086_vm13 = vcmask 195744   ;;  %v11899_v7 = vld [vmem:[%s14993_s3 + $0x120] sm:$0xff]   ;;  %v13475_v35 = vmul.u32.u64.low 3817748708, %v3011_v59  ;;  %v13476_v12 = vmul.u32.u64.high 3817748708, %v3011_v59, %v13475_v35 }
 0x122   : > { %1557 = vrot.lane.b32.xlu1 %v1522_v29, %s12145_s28  ;;  %vm15087_vm14 = vmmov %vm15086_vm13  ;;  %v11897_v29 = vld [vmem:[%s14993_s3 + $0x110] sm:$0xff]  }
 0x123   : > { %v2636_v25 = vpop.permute.xlu0 %2635  ;;  %10858 = vmatpush3.bf16.msra.mxu0 %v11887_v39  ;;  %11320 = vmatpush3.bf16.msra.mxu1 %v11896_v2 }
 0x124   : > { %v689_v20 = vpop.permute.xlu1 %688  ;;  %2682 = vst.msk [vmem:[#allocation4 + $0x40] sm:$0xff] %vm15013_vm8, %v2636_v25  ;;  %11313 = vmatprep.subr.bf16.mxu1 %v11897_v29 }
 0x125   : > { %733 = vst.msk [vmem:[#allocation4 + $0x50] sm:$0xff] %vm722_vm10, %v689_v20  ;;  %1796 = vrot.lane.b32.xlu0 %v1761_v23, %s12143_s26  ;;  %v11904_v20 = vld [vmem:[%s14993_s3 + $0x138] sm:$0xff]   ;;  %v3012_v23 = vadd.s32 16, %v13451_v3 }
 0x126   : > { %1798 = vrot.lane.b32.xlu1 %v1763_v53, %s12143_s26  ;;  %v11901_v53 = vld [vmem:[%s14993_s3 + $0x130] sm:$0xff]  }
 0x127   : > { %v2638_v37 = vpop.permute.xlu0 %2637  ;;  %11321 = vmatpush3.bf16.msra.mxu1 %v11897_v29  ;;  %v13463_v60 = vmul.u32.u64.low 3817748708, %v3012_v23  ;;  %v13464_v28 = vmul.u32.u64.high 3817748708, %v3012_v23, %v13463_v60 }
 0x128   : > { %v691_v6 = vpop.permute.xlu1 %690  ;;  %2683 = vst.msk [vmem:[#allocation4 + $0x48] sm:$0xff] %vm15013_vm8, %v2638_v37  ;;  %11314 = vmatprep.subr.bf16.mxu1 %v11898_v17 }
 0x129   : > { %734 = vst.msk [vmem:[#allocation4 + $0x58] sm:$0xff] %vm722_vm10, %v691_v6  ;;  %2036 = vrot.lane.b32.xlu0 %v2001_v44, %s12146_s29  ;;  %v13467_v6 = vmul.u32.u64.low 3817748708, %v13451_v3  ;;  %v13468_v44 = vmul.u32.u64.high 3817748708, %v13451_v3, %v13467_v6 }
 0x12a   : > { %2038 = vrot.lane.b32.xlu1 %v2003_v10, %s12146_s29  ;;  %v3013_v10 = vadd.s32 24, %v13451_v3 }
 0x12b   : > { %v930_v40 = vpop.permute.xlu0 %929  ;;  %v2700_v55 = vld [vmem:[#allocation4 + $0x40] sm:$0xff]  ;;  %11322 = vmatpush3.bf16.msra.mxu1 %v11898_v17 }
 0x12c   : > { %v932_v18 = vpop.permute.xlu1 %931  ;;  %974 = vst.msk [vmem:[#allocation4 + $0x50] sm:$0xff] %vm15012_vm11, %v930_v40  ;;  %10823 = vmatprep.mubr.msk.bf16.mxu0 %vm15011_vm7, %v2700_v55  ;;  %11315 = vmatprep.subr.bf16.mxu1 %v11899_v7  ;;  %v3074_v55 = vshrl.u32 %v13464_v28, 4 }
 0x12d   : > { %975 = vst.msk [vmem:[#allocation4 + $0x58] sm:$0xff] %vm15012_vm11, %v932_v18  ;;  %2410 = vrot.lane.b32.xlu0 %v2368_v34, %s12147_s30 }
 0x12e   : > { %2412 = vrot.lane.b32.xlu1 %v2377_v54, %s12147_s30  ;;  %v13471_v22 = vmul.u32.u64.low 3817748708, %v3013_v10  ;;  %v13472_v54 = vmul.u32.u64.high 3817748708, %v3013_v10, %v13471_v22  ;;  %v3075_v39 = vmul.u32 18, %v3074_v55 }
 0x12f   : > { %v1170_v0 = vpop.permute.xlu0 %1169  ;;  %v2701_v62 = vld [vmem:[#allocation4 + $0x48] sm:$0xff]  ;;  %11323 = vmatpush3.bf16.msra.mxu1 %v11899_v7  ;;  %v13516_v7 = vadd.s32 48, %v13451_v3 }
 0x130   : > { %v1172_v45 = vpop.permute.xlu1 %1171  ;;  %1214 = vst.msk [vmem:[#allocation4 + $0x50] sm:$0xff] %vm15083_vm3, %v1170_v0  ;;  %10824 = vmatmul.mubr.msk.bf16.gmra.mrb[16].mxu0 %vm15011_vm7, %v2701_v62  ;;  %11316 = vmatprep.subr.bf16.mxu1 %v11900_v50  ;;  %v3085_v0 = vshrl.u32 %v13472_v54, 4  ;;  %v3063_v62 = vshrl.u32 %v13476_v12, 4 }
 0x131   : > { %1215 = vst.msk [vmem:[#allocation4 + $0x58] sm:$0xff] %vm15082_vm6, %v1172_v45  ;;  %2651 = vrot.lane.b32.xlu0 %v2616_v11, %s12148_s6  ;;  %vm15088_vm6 = vcmask 228544  }
 0x132   : > { %2653 = vrot.lane.b32.xlu1 %v2618_v24, %s12148_s6  ;;  %vm15089_vm3 = vmmov %vm15088_vm6  ;;  %v3052_v24 = vshrl.u32 %v13468_v44, 4 }
 0x133   : > { %v1544_v5 = vpop.permute.xlu0 %1543  ;;  %11324 = vmatpush3.bf16.msra.mxu1 %v11900_v50 }
 0x134   : > { %v1546_v57 = vpop.permute.xlu1 %1545  ;;  %1588 = vst.msk [vmem:[#allocation4 + $0x50] sm:$0xff] %vm15085_vm0, %v1544_v5  ;;  %11317 = vmatprep.subr.bf16.mxu1 %v11901_v53  ;;  %v3053_v5 = vmul.u32 18, %v3052_v24 }
 0x135   : > { %1589 = vst.msk [vmem:[#allocation4 + $0x58] sm:$0xff] %vm15084_vm15, %v1546_v57  ;;  %vm15094_vm15 = vmmov %vm15085_vm0 }
 0x137   : > { %v1785_v30 = vpop.permute.xlu0 %1784  ;;  %11325 = vmatpush3.bf16.msra.mxu1 %v11901_v53 }
 0x138   : > { %v1787_v16 = vpop.permute.xlu1 %1786  ;;  %1829 = vst.msk [vmem:[#allocation4 + $0x50] sm:$0xff] %vm15087_vm14, %v1785_v30  ;;  %vm15095_vm14 = vmmov %vm15086_vm13  ;;  %11318 = vmatprep.subr.bf16.mxu1 %v11904_v20  ;;  %v3086_v30 = vmul.u32 18, %v3085_v0 }
 0x139   : > { %1830 = vst.msk [vmem:[#allocation4 + $0x58] sm:$0xff] %vm15086_vm13, %v1787_v16 }
 0x13b   : > { %v2025_v41 = vpop.permute.xlu0 %2024  ;;  %11326 = vmatpush3.bf16.msra.mxu1 %v11904_v20  ;;  %v13538_v20 = vadd.s32 56, %v13451_v3 }
 0x13c   : > { %v2027_v51 = vpop.permute.xlu1 %2026  ;;  %2069 = vst.msk [vmem:[#allocation4 + $0x50] sm:$0xff] %vm15089_vm3, %v2025_v41  ;;  %v3076_v41 = vsub.s32 %v3012_v23, %v3075_v39 }
 0x13d   : > { %2070 = vst.msk [vmem:[#allocation4 + $0x58] sm:$0xff] %vm15088_vm6, %v2027_v51  ;;  %vm15096_vm6 = vmmov %vm15089_vm3  ;;  %v3064_v51 = vmul.u32 18, %v3063_v62 }
 0x13f   : > { %v2399_v61 = vpop.permute.xlu0 %2398  ;;  %v3065_v49 = vsub.s32 %v3011_v59, %v3064_v51  ;;  %v13547_v59 = vadd.s32 40, %v13451_v3 }
 0x140   : > { %v2401_v8 = vpop.permute.xlu1 %2400  ;;  %2443 = vst.msk [vmem:[#allocation4 + $0x50] sm:$0xff] %vm15091_vm4, %v2399_v61  ;;  %vm15092_vm4 = vcmask 130144   ;;  %v3054_v61 = vsub.s32 %v13451_v3, %v3053_v5 }
 0x141   : > { %2444 = vst.msk [vmem:[#allocation4 + $0x58] sm:$0xff] %vm15090_vm5, %v2401_v8  ;;  %vm15093_vm5 = vmmov %vm15092_vm4  ;;  %v13577_v0 = vmul.u32.u64.low 3817748708, %v13547_v59  ;;  %v13578_v62 = vmul.u32.u64.high 3817748708, %v13547_v59, %v13577_v0 }
 0x142   : > { %v3550_v29 = vadd.s32 18, %v3054_v61 }
 0x143   : > { %v2640_v1 = vpop.permute.xlu0 %2639  ;;  %v3107_v44 = vshrl.u32 %v13578_v62, 4 }
 0x144   : > { %v693_v27 = vpop.permute.xlu1 %692  ;;  %2684 = vst.msk [vmem:[#allocation4 + $0x50] sm:$0xff] %vm15013_vm8, %v2640_v1  ;;  %v3087_v1 = vsub.s32 %v3013_v10, %v3086_v30 }
 0x145   : > { %735 = vst.msk [vmem:[#allocation4 + $0x60] sm:$0xff] %vm722_vm10, %v693_v27 }
 0x146   : > { %vm3481_vm1 = vcmp.lt.s32.totalorder %v3087_v1, 0 }
 0x147   : > { %v2642_v58 = vpop.permute.xlu0 %2641 }
 0x148   : > { %v695_v33 = vpop.permute.xlu1 %694  ;;  %2685 = vst.msk [vmem:[#allocation4 + $0x58] sm:$0xff] %vm15013_vm8, %v2642_v58 }
 0x149   : > { %736 = vst.msk [vmem:[#allocation4 + $0x68] sm:$0xff] %vm722_vm10, %v695_v33 }
 0x14b   : > { %v934_v38 = vpop.permute.xlu0 %933  ;;  %v2702_v4 = vld [vmem:[#allocation4 + $0x50] sm:$0xff] }
 0x14c   : > { %v936_v31 = vpop.permute.xlu1 %935  ;;  %976 = vst.msk [vmem:[#allocation4 + $0x60] sm:$0xff] %vm15012_vm11, %v934_v38  ;;  %10827 = vmatprep.mubr.msk.bf16.mxu0 %vm15011_vm7, %v2702_v4 }
 0x14d   : > { %977 = vst.msk [vmem:[#allocation4 + $0x68] sm:$0xff] %vm15012_vm11, %v936_v31  ;;  %v3552_v31 = vadd.s32 18, %v3076_v41 }
 0x14f   : > { %v1174_v48 = vpop.permute.xlu0 %1173  ;;  %v2703_v9 = vld [vmem:[#allocation4 + $0x58] sm:$0xff] }
 0x150   : > { %v1176_v52 = vpop.permute.xlu1 %1175  ;;  %1216 = vst.msk [vmem:[#allocation4 + $0x60] sm:$0xff] %vm15093_vm5, %v1174_v48  ;;  %10828 = vmatmul.mubr.msk.bf16.gmra.mrb[20].mxu0 %vm15011_vm7, %v2703_v9  ;;  %v3553_v48 = vadd.s32 18, %v3087_v1  ;;  %v3551_v9 = vadd.s32 18, %v3065_v49 }
 0x151   : > { %1217 = vst.msk [vmem:[#allocation4 + $0x68] sm:$0xff] %vm15092_vm4, %v1176_v52  ;;  %vm15097_vm4 = vcmask 261344  }
 0x152   : > { %vm15098_vm5 = vmmov %vm15097_vm4 }
 0x153   : > { %v1548_v36 = vpop.permute.xlu0 %1547 }
 0x154   : > { %v1550_v32 = vpop.permute.xlu1 %1549  ;;  %1590 = vst.msk [vmem:[#allocation4 + $0x60] sm:$0xff] %vm15085_vm0, %v1548_v36 }
 0x155   : > { %1591 = vst.msk [vmem:[#allocation4 + $0x68] sm:$0xff] %vm15094_vm15, %v1550_v32  ;;  %vm15099_vm15 = vcmask 130144  }
 0x156   : > { %vm15100_vm0 = vmmov %vm15099_vm15 }
 0x157   : > { %v1789_v14 = vpop.permute.xlu0 %1788 }
 0x158   : > { %v1791_v56 = vpop.permute.xlu1 %1790  ;;  %1831 = vst.msk [vmem:[#allocation4 + $0x60] sm:$0xff] %vm15095_vm14, %v1789_v14 }
 0x159   : > { %1832 = vst.msk [vmem:[#allocation4 + $0x68] sm:$0xff] %vm15086_vm13, %v1791_v56  ;;  %vm15101_vm13 = vcmask 162944   ;;  %v13521_v56 = vld [vmem:[%s14992_s2] ss:$0 sm:$0xff] }
 0x15a   : > { %vm15102_vm14 = vmmov %vm15101_vm13 }
 0x15b   : > { %v2029_v43 = vpop.permute.xlu0 %2028 }
 0x15c   : > { %v2031_v47 = vpop.permute.xlu1 %2030  ;;  %2071 = vst.msk [vmem:[#allocation4 + $0x60] sm:$0xff] %vm15089_vm3, %v2029_v43 }
 0x15d   : > { %2072 = vst.msk [vmem:[#allocation4 + $0x68] sm:$0xff] %vm15096_vm6, %v2031_v47  ;;  %vm15103_vm6 = vcmask 195744   ;;  %v13530_v47 = vadd.s32 32, %v13451_v3 }
 0x15e   : > { %vm15104_vm3 = vmmov %vm15103_vm6 }
 0x15f   : > { %v2403_v63 = vpop.permute.xlu0 %2402 }
 0x160   : > { %v2405_v15 = vpop.permute.xlu1 %2404  ;;  %2445 = vst.msk [vmem:[#allocation4 + $0x60] sm:$0xff] %vm15098_vm5, %v2403_v63  ;;  %vm3480_vm5 = vcmp.lt.s32.totalorder %v3076_v41, 0 }
 0x161   : > { %2446 = vst.msk [vmem:[#allocation4 + $0x68] sm:$0xff] %vm15097_vm4, %v2405_v15  ;;  %vm3444_vm4 = vcmp.ne.s32.totalorder %v3076_v41, 0 }
 0x163   : > { %v2644_v46 = vpop.permute.xlu0 %2643 }
 0x164   : > { %v697_v25 = vpop.permute.xlu1 %696  ;;  %2686 = vst.msk [vmem:[#allocation4 + $0x60] sm:$0xff] %vm15013_vm8, %v2644_v46  ;;  %v13543_v46 = vmul.u32.u64.low 3817748708, %v13516_v7  ;;  %v13544_v10 = vmul.u32.u64.high 3817748708, %v13516_v7, %v13543_v46 }
 0x165   : > { %737 = vst.msk [vmem:[#allocation4 + $0x70] sm:$0xff] %vm722_vm10, %v697_v25 }
 0x167   : > { %v2646_v37 = vpop.permute.xlu0 %2645 }
 0x168   : > { %v699_v26 = vpop.permute.xlu1 %698  ;;  %2687 = vst.msk [vmem:[#allocation4 + $0x68] sm:$0xff] %vm15013_vm8, %v2646_v37 }
 0x169   : > { %738 = vst.msk [vmem:[#allocation4 + $0x78] sm:$0xff] %vm722_vm10, %v699_v26 }
 0x16b   : > { %v938_v34 = vpop.permute.xlu0 %937  ;;  %v2704_v40 = vld [vmem:[#allocation4 + $0x60] sm:$0xff] }
 0x16c   : > { %v940_v18 = vpop.permute.xlu1 %939  ;;  %978 = vst.msk [vmem:[#allocation4 + $0x70] sm:$0xff] %vm15012_vm11, %v938_v34  ;;  %10831 = vmatprep.mubr.msk.bf16.mxu0 %vm15011_vm7, %v2704_v40 }
 0x16d   : > { %979 = vst.msk [vmem:[#allocation4 + $0x78] sm:$0xff] %vm15012_vm11, %v940_v18  ;;  %v13564_v12 = vmul.u32.u64.low 3817748708, %v13530_v47  ;;  %v13565_v18 = vmul.u32.u64.high 3817748708, %v13530_v47, %v13564_v12 }
 0x16f   : > { %v1178_v45 = vpop.permute.xlu0 %1177  ;;  %v2705_v11 = vld [vmem:[#allocation4 + $0x68] sm:$0xff]  ;;  %v3096_v63 = vshrl.u32 %v13565_v18, 4 }
 0x170   : > { %v1180_v19 = vpop.permute.xlu1 %1179  ;;  %1218 = vst.msk [vmem:[#allocation4 + $0x70] sm:$0xff] %vm15100_vm0, %v1178_v45  ;;  %10832 = vmatmul.mubr.msk.bf16.gmra.mrb[24].mxu0 %vm15011_vm7, %v2705_v11  ;;  %vm3478_vm0 = vcmp.lt.s32.totalorder %v3054_v61, 0  ;;  %vm13495_vm7 = vmand %vm3480_vm5, %vm3444_vm4 }
 0x171   : > { %1219 = vst.msk [vmem:[#allocation4 + $0x78] sm:$0xff] %vm15099_vm15, %v1180_v19  ;;  %vm3442_vm15 = vcmp.ne.s32.totalorder %v3054_v61, 0  ;;  %v3588_v36 = vsel %vm13495_vm7, %v3552_v31, %v3076_v41  ;;  %v13570_v19 = vmul.u32.u64.low 3817748708, %v13538_v20  ;;  %v13571_v24 = vmul.u32.u64.high 3817748708, %v13538_v20, %v13570_v19 }
 0x172   : > { %vm13499_vm11 = vmand %vm3478_vm0, %vm3442_vm15  ;;  %v3118_v31 = vshrl.u32 %v13544_v10, 4 }
 0x173   : > { %v1552_v16 = vpop.permute.xlu0 %1551  ;;  %v3586_v50 = vsel %vm13499_vm11, %v3550_v29, %v3054_v61  ;;  %vm15119_vm11 = vcmask 294144  }
 0x174   : > { %v1554_v57 = vpop.permute.xlu1 %1553  ;;  %1592 = vst.msk [vmem:[#allocation4 + $0x70] sm:$0xff] %vm15102_vm14, %v1552_v16  ;;  %vm3445_vm14 = vcmp.ne.s32.totalorder %v3087_v1, 0  ;;  %vm15126_vm0 = vmmov %vm15119_vm11  ;;  %v3119_v6 = vmul.u32 18, %v3118_v31 }
 0x175   : > { %1593 = vst.msk [vmem:[#allocation4 + $0x78] sm:$0xff] %vm15101_vm13, %v1554_v57  ;;  %vm15105_vm13 = vcmask 228544   ;;  %vm13503_vm8 = vmand %vm3481_vm1, %vm3445_vm14  ;;  %vm13532_vm1 = vcmp.lt.s32.totalorder %v3588_v36, 16 }
 0x176   : > { %vm15106_vm2 = vmmov %vm15105_vm13  ;;  %v3589_v53 = vsel %vm13503_vm8, %v3553_v48, %v3087_v1  ;;  %vm13550_vm8 = vcmp.lt.s32.totalorder %v3586_v50, 16  ;;  %v4290_v50 = vld [vmem:[#allocation2 + $0x8] sm:$0xe]  ;;  %v3120_v19 = vsub.s32 %v13516_v7, %v3119_v6  ;;  %v13622_v7 = vadd.s32 80, %v13451_v3 }
 0x177   : > { %v1793_v27 = vpop.permute.xlu0 %1792  ;;  %vm13554_vm7 = vcmp.lt.s32.totalorder %v3589_v53, 16 }
 0x178   : > { %v1795_v8 = vpop.permute.xlu1 %1794  ;;  %1833 = vst.msk [vmem:[#allocation4 + $0x70] sm:$0xff] %vm15104_vm3, %v1793_v27  ;;  %vm3479_vm3 = vcmp.lt.s32.totalorder %v3065_v49, 0 }
 0x179   : > { %1834 = vst.msk [vmem:[#allocation4 + $0x78] sm:$0xff] %vm15103_vm6, %v1795_v8  ;;  %vm3443_vm6 = vcmp.ne.s32.totalorder %v3065_v49, 0 }
 0x17a   : > { %vm13508_vm4 = vmand %vm3479_vm3, %vm3443_vm6  ;;  %vm15129_vm6 = vcmask 293888   ;;  %vm15130_vm3 = vcmask 130144  }
 0x17b   : > { %v2033_v58 = vpop.permute.xlu0 %2032  ;;  %v3587_v21 = vsel %vm13508_vm4, %v3551_v9, %v3065_v49 }
 0x17c   : > { %v2035_v33 = vpop.permute.xlu1 %2034  ;;  %2073 = vst.msk [vmem:[#allocation4 + $0x70] sm:$0xff] %vm15106_vm2, %v2033_v58  ;;  %vm15113_vm2 = vcmask 261344   ;;  %vm13558_vm15 = vcmp.lt.s32.totalorder %v3587_v21, 16 }
 0x17d   : > { %2074 = vst.msk [vmem:[#allocation4 + $0x78] sm:$0xff] %vm15105_vm13, %v2035_v33  ;;  %vm15116_vm5 = vmmov %vm15113_vm2  ;;  %vm15127_vm13 = vcmask 97344  }
 0x17e   : > { %vm15128_vm14 = vmmov %vm15127_vm13 }
 0x17f   : > { %v2407_v17 = vpop.permute.xlu0 %2406 }
 0x180   : > { %v2409_v4 = vpop.permute.xlu1 %2408  ;;  %2447 = vst.msk [vmem:[#allocation4 + $0x70] sm:$0xff] %vm15116_vm5, %v2407_v17  ;;  %vm15134_vm5 = vmmov %vm15130_vm3 }
 0x181   : > { %2448 = vst.msk [vmem:[#allocation4 + $0x78] sm:$0xff] %vm15113_vm2, %v2409_v4  ;;  %vm15131_vm2 = vsmask.f32 1280 }
 0x183   : > { %v2648_v43 = vpop.permute.xlu0 %2647  ;;  %v10809_v15 = vpop.f32.mrb[0].mxu0 }
 0x184   : > { %v701_v14 = vpop.permute.xlu1 %700  ;;  %2688 = vst.msk [vmem:[#allocation4 + $0x70] sm:$0xff] %vm15119_vm11, %v2648_v43  ;;  %v2839_v23 = vadd.f32 %v10809_v15, %v13521_v56  ;;  %v2830_v25 = vpop.f32.mrb[1].mxu0  ;;  %vm15136_vm11 = vcmask 162944  }
 0x185   : > { %739 = vst.msk [vmem:[#allocation4 + $0x80] sm:$0xff] %vm722_vm10, %v701_v14  ;;  %v2831_v60 = vadd.f32 %v13521_v56, %v2830_v25  ;;  %v10810_v26 = vpop.f32.mrb[2].mxu0 }
 0x186   : > { %v2975_v37 = vmax.f32 %v2839_v23, 0.0  ;;  %v2842_v22 = vadd.f32 %v10810_v26, %v13521_v56  ;;  %v2833_v54 = vpop.f32.mrb[3].mxu0 }
 0x187   : > { %v2973_v34 = vmax.f32 %v2831_v60, 0.0  ;;  %v2834_v40 = vadd.f32 %v13521_v56, %v2833_v54  ;;  %v2650_v55 = vpop.permute.xlu0 %2649  ;;  %v3129_v60 = vshrl.u32 %v13571_v24, 4  ;;  %v3108_v24 = vmul.u32 18, %v3107_v44 }
 0x188   : > { %v703_v35 = vpop.permute.xlu1 %702  ;;  %v3732_v45 = vsel %vm13532_vm1, %v2975_v37, 0.0  ;;  %v2976_v11 = vmax.f32 %v2842_v22, 0.0  ;;  %2689 = vst.msk [vmem:[#allocation4 + $0x78] sm:$0xff] %vm15126_vm0, %v2650_v55  ;;  %vm15135_vm1 = vmmov %vm15129_vm6  ;;  %vm3484_vm0 = vcmp.lt.s32.totalorder %v3120_v19, 0 }
 0x189   : > { %740 = vst.msk [vmem:[#allocation4 + $0x88] sm:$0xff] %vm722_vm10, %v703_v35  ;;  %v10369_v39 = vpack.c.bf16 %v3732_v45, %v3732_v45  ;;  %v3730_v57 = vsel %vm13550_vm8, %v2973_v34, 0.0  ;;  %v2974_v5 = vmax.f32 %v2834_v40, 0.0  ;;  %vm3892_vm10 = vsmask.f32 5392  ;;  %vm15137_vm8 = vmmov %vm15136_vm11 }
 0x18a   : > { %v10367_v16 = vpack.c.bf16 %v3730_v57, %v3730_v57  ;;  %v3733_v30 = vsel %vm13554_vm7, %v2976_v11, 0.0  ;;  %vm13594_vm4 = vmor %vm15131_vm2, %vm3892_vm10  ;;  %v3097_v34 = vmul.u32 18, %v3096_v63  ;;  %v3130_v13 = vmul.u32 18, %v3129_v60 }
 0x18b   : > { %v3914_v41 = vshrl.u32 %v10369_v39, 16  ;;  %v3917_v8 = vshll.u32 %v10369_v39, 16  ;;  %v10370_v61 = vpack.c.bf16 %v3733_v30, %v3733_v30  ;;  %v3731_v27 = vsel %vm13558_vm15, %v2974_v5, 0.0  ;;  %v942_v1 = vpop.permute.xlu0 %941  ;;  %v2706_v49 = vld [vmem:[#allocation4 + $0x70] sm:$0xff] }
 0x18c   : > { %v944_v51 = vpop.permute.xlu1 %943  ;;  %v3895_v33 = vshrl.u32 %v10367_v16, 16  ;;  %v3898_v58 = vshll.u32 %v10367_v16, 16  ;;  %v10368_v2 = vpack.c.bf16 %v3731_v27, %v3731_v27  ;;  %980 = vst.msk [vmem:[#allocation4 + $0x80] sm:$0xff] %vm15128_vm14, %v942_v1  ;;  %10835 = vmatprep.mubr.msk.bf16.mxu0 %vm15129_vm6, %v2706_v49  ;;  %v3098_v62 = vsub.s32 %v13530_v47, %v3097_v34 }
 0x18d   : > { %981 = vst.msk [vmem:[#allocation4 + $0x88] sm:$0xff] %vm15127_vm13, %v944_v51  ;;  %v3916_v38 = vrot.slane %v3914_v41, 6  ;;  %v3919_v4 = vrot.slane %v3917_v8, 7  ;;  %v3924_v29 = vshrl.u32 %v10370_v61, 16  ;;  %v3927_v52 = vshll.u32 %v10370_v61, 16 }
 0x18e   : > { %v3897_v48 = vrot.slane %v3895_v33, 6  ;;  %v3900_v9 = vrot.slane %v3898_v58, 7  ;;  %v3904_v17 = vshrl.u32 %v10368_v2, 16  ;;  %v3907_v32 = vshll.u32 %v10368_v2, 16 }
 0x18f   : > { %v3920_v14 = vor.u32 %v3919_v4, %v3916_v38  ;;  %v3926_v53 = vrot.slane %v3924_v29, 6  ;;  %v3929_v21 = vrot.slane %v3927_v52, 7  ;;  %v1182_v43 = vpop.permute.xlu0 %1181  ;;  %v2707_v15 = vld [vmem:[#allocation4 + $0x78] sm:$0xff]  ;;  %v3131_v39 = vsub.s32 %v13538_v20, %v3130_v13 }
 0x190   : > { %v1184_v36 = vpop.permute.xlu1 %1183  ;;  %v3901_v25 = vor.u32 %v3900_v9, %v3897_v48  ;;  %v3906_v46 = vrot.slane %v3904_v17, 6  ;;  %v3909_v10 = vrot.slane %v3907_v32, 7  ;;  %1220 = vst.msk [vmem:[#allocation4 + $0x80] sm:$0xff] %vm15134_vm5, %v1182_v43  ;;  %10836 = vmatmul.mubr.msk.bf16.gmra.mrb[28].mxu0 %vm15135_vm1, %v2707_v15  ;;  %vm3448_vm15 = vcmp.ne.s32.totalorder %v3120_v19, 0 }
 0x191   : > { %1221 = vst.msk [vmem:[#allocation4 + $0x88] sm:$0xff] %vm15130_vm3, %v1184_v36  ;;  %v3922_v28 = vrot.slane %v3920_v14, 4  ;;  %v13601_v26 = vor.u32 %v3929_v21, %v3926_v53  ;;  %v3109_v57 = vsub.s32 %v13547_v59, %v3108_v24  ;;  %vm15140_vm10 = vcmask 228544   ;;  %vm13626_vm5 = vmand %vm3484_vm0, %vm3448_vm15 }
 0x192   : > { %v3902_v37 = vrot.slane %v3901_v25, 4  ;;  %v4291_v22 = vsel %vm13305_vm12, %v3901_v25, %v4290_v50  ;;  %v3910_v54 = vor.u32 %v3909_v10, %v3906_v46  ;;  %vm15138_vm12 = vcmask 195744   ;;  %vm15141_vm6 = vmmov %vm15140_vm10 }
 0x193   : > { %4292 = vst [vmem:[#allocation2 + $0x8] sm:$0xe] %v4291_v22  ;;  %v3931_v12 = vsel %vm13594_vm4, %v3922_v28, %v13601_v26  ;;  %v1556_v18 = vpop.permute.xlu0 %1555  ;;  %vm15139_vm7 = vmmov %vm15138_vm12  ;;  %vm3446_vm13 = vcmp.ne.s32.totalorder %v3098_v62, 0  ;;  %vm3482_vm14 = vcmp.lt.s32.totalorder %v3098_v62, 0  ;;  %vm3449_vm3 = vcmp.ne.s32.totalorder %v3131_v39, 0 }
 0x194   : > { %v1558_v35 = vpop.permute.xlu1 %1557  ;;  %4295 = vst [vmem:[#allocation2 + $0x14] sm:$0xf] %v3931_v12  ;;  %v3911_v40 = vsel %vm13594_vm4, %v3902_v37, %v3910_v54  ;;  %v3912_v55 = vrot.slane %v3910_v54, 4  ;;  %1594 = vst.msk [vmem:[#allocation4 + $0x80] sm:$0xff] %vm15137_vm8, %v1556_v18  ;;  %vm3485_vm2 = vcmp.lt.s32.totalorder %v3131_v39, 0  ;;  %v3556_v20 = vadd.s32 18, %v3120_v19 }
 0x195   : > { %1595 = vst.msk [vmem:[#allocation4 + $0x88] sm:$0xff] %vm15136_vm11, %v1558_v35  ;;  %4293 = vst [vmem:[#allocation2 + $0xc] sm:$0xf] %v3911_v40  ;;  %vm3447_vm1 = vcmp.ne.s32.totalorder %v3109_v57, 0  ;;  %vm3483_vm11 = vcmp.lt.s32.totalorder %v3109_v57, 0  ;;  %v3554_v51 = vadd.s32 18, %v3098_v62 }
 0x196   : > { %v3921_v45 = vsel %vm13594_vm4, %v3912_v55, %v3920_v14  ;;  %vm13630_vm8 = vmand %vm3482_vm14, %vm3446_vm13  ;;  %v13635_v41 = vmul.u32.u64.low 3817748708, %v13622_v7  ;;  %v13636_v8 = vmul.u32.u64.high 3817748708, %v13622_v7, %v13635_v41  ;;  %v13639_v61 = vadd.s32 64, %v13451_v3  ;;  %v11888_v55 = vld [vmem:[#allocation2] sm:$0xff]  }
 0x197   : > { %4294 = vst [vmem:[#allocation2 + $0x10] sm:$0xf] %v3921_v45  ;;  %v1797_v0 = vpop.permute.xlu0 %1796  ;;  %v3557_v49 = vadd.s32 18, %v3131_v39  ;;  %v3555_v33 = vadd.s32 18, %v3109_v57  ;;  %vm13647_vm0 = vmand %vm3483_vm11, %vm3447_vm1  ;;  %v13652_v2 = vadd.s32 88, %v13451_v3  ;;  %v3592_v31 = vsel %vm13626_vm5, %v3556_v20, %v3120_v19 }
 0x198   : > { %v1799_v11 = vpop.permute.xlu1 %1798  ;;  %1835 = vst.msk [vmem:[#allocation4 + $0x80] sm:$0xff] %vm15139_vm7, %v1797_v0  ;;  %vm13642_vm7 = vmand %vm3485_vm2, %vm3449_vm3  ;;  %v3590_v4 = vsel %vm13630_vm8, %v3554_v51, %v3098_v62  ;;  %v13659_v29 = vmul.u32.u64.low 3817748708, %v13639_v61  ;;  %v13660_v52 = vmul.u32.u64.high 3817748708, %v13639_v61, %v13659_v29  ;;  %v13674_v21 = vadd.s32 72, %v13451_v3 }
 0x199   : > { %1836 = vst.msk [vmem:[#allocation4 + $0x88] sm:$0xff] %vm15138_vm12, %v1799_v11  ;;  %vm15146_vm12 = vcmask 261344   ;;  %v3593_v17 = vsel %vm13642_vm7, %v3557_v49, %v3131_v39  ;;  %v3591_v32 = vsel %vm13647_vm0, %v3555_v33, %v3109_v57  ;;  %vm3628_vm14 = vcmp.lt.s32.totalorder %v3592_v31, 16 }
 0x19a   : > { %vm15149_vm15 = vmmov %vm15146_vm12  ;;  %v13670_v50 = vmul.u32.u64.low 3817748708, %v13652_v2  ;;  %v13671_v53 = vmul.u32.u64.high 3817748708, %v13652_v2, %v13670_v50  ;;  %vm13682_vm3 = vcmp.lt.s32.totalorder %v3593_v17, 16  ;;  %v3162_v28 = vshrl.u32 %v13636_v8, 4 }
 0x19b   : > { %v2037_v16 = vpop.permute.xlu0 %2036  ;;  %vm13688_vm2 = vcmp.lt.s32.totalorder %v3591_v32, 16  ;;  %v13693_v35 = vmul.u32.u64.low 3817748708, %v13674_v21  ;;  %v13694_v12 = vmul.u32.u64.high 3817748708, %v13674_v21, %v13693_v35  ;;  %v3140_v11 = vshrl.u32 %v13660_v52, 4 }
 0x19c   : > { %v2039_v5 = vpop.permute.xlu1 %2038  ;;  %2075 = vst.msk [vmem:[#allocation4 + $0x80] sm:$0xff] %vm15141_vm6, %v2037_v16  ;;  %vm13677_vm6 = vcmp.lt.s32.totalorder %v3590_v4, 16  ;;  %v3163_v45 = vmul.u32 18, %v3162_v28  ;;  %vm15160_vm5 = vcmask 293888   ;;  %v3932_v29 = vrot.slane %v13601_v26, 4  ;;  %v11889_v26 = vld [vmem:[#allocation2 + $0x8] sm:$0xff]  }
 0x19d   : > { %2076 = vst.msk [vmem:[#allocation4 + $0x88] sm:$0xff] %vm15140_vm10, %v2039_v5  ;;  %vm15152_vm10 = vcmask 294144   ;;  %vm15161_vm1 = vmmov %vm15160_vm5  ;;  %v3141_v4 = vmul.u32 18, %v3140_v11 }
 0x19e   : > { %vm15153_vm13 = vmmov %vm15152_vm10  ;;  %v3164_v10 = vsub.s32 %v13622_v7, %v3163_v45  ;;  %v13724_v7 = vadd.s32 112, %v13451_v3 }
 0x19f   : > { %v2411_v27 = vpop.permute.xlu0 %2410 }
 0x1a0   : > { %v2413_v59 = vpop.permute.xlu1 %2412  ;;  %2449 = vst.msk [vmem:[#allocation4 + $0x80] sm:$0xff] %vm15149_vm15, %v2411_v27  ;;  %vm3452_vm11 = vcmp.ne.s32.totalorder %v3164_v10, 0  ;;  %vm3488_vm8 = vcmp.lt.s32.totalorder %v3164_v10, 0  ;;  %v3560_v37 = vadd.s32 18, %v3164_v10 }
 0x1a1   : > { %2450 = vst.msk [vmem:[#allocation4 + $0x88] sm:$0xff] %vm15146_vm12, %v2413_v59  ;;  %v3173_v59 = vshrl.u32 %v13671_v53, 4  ;;  %vm13726_vm0 = vmand %vm3488_vm8, %vm3452_vm11  ;;  %vm15172_vm8 = vsmask.f32 6400 }
 0x1a3   : > { %v2652_v48 = vpop.permute.xlu0 %2651  ;;  %v10813_v9 = vpop.f32.mrb[4].mxu0 }
 0x1a4   : > { %v2654_v38 = vpop.permute.xlu1 %2653  ;;  %2690 = vst.msk [vmem:[#allocation4 + $0x80] sm:$0xff] %vm15153_vm13, %v2652_v48  ;;  %v2855_v36 = vadd.f32 %v10813_v9, %v13521_v56  ;;  %v2846_v14 = vpop.f32.mrb[5].mxu0 }
 0x1a5   : > { %2691 = vst.msk [vmem:[#allocation4 + $0x88] sm:$0xff] %vm15152_vm10, %v2654_v38  ;;  %v2847_v43 = vadd.f32 %v13521_v56, %v2846_v14  ;;  %v10814_v63 = vpop.f32.mrb[6].mxu0 }
 0x1a6   : > { %v2979_v25 = vmax.f32 %v2855_v36, 0.0  ;;  %v2858_v46 = vadd.f32 %v10814_v63, %v13521_v56  ;;  %v2849_v60 = vpop.f32.mrb[7].mxu0  ;;  %v3151_v36 = vshrl.u32 %v13694_v12, 4  ;;  %v13731_v12 = vadd.s32 96, %v13451_v3 }
 0x1a7   : > { %v2977_v6 = vmax.f32 %v2847_v43, 0.0  ;;  %v2850_v44 = vadd.f32 %v13521_v56, %v2849_v60  ;;  %v3174_v43 = vmul.u32 18, %v3173_v59  ;;  %v3142_v60 = vsub.s32 %v13639_v61, %v3141_v4 }
 0x1a8   : > { %v3736_v22 = vsel %vm3628_vm14, %v2979_v25, 0.0  ;;  %v2980_v54 = vmax.f32 %v2858_v46, 0.0  ;;  %v11890_v46 = vld [vmem:[#allocation2 + $0x10] sm:$0xff]   ;;  %v3152_v28 = vmul.u32 18, %v3151_v36 }
 0x1a9   : > { %v10373_v18 = vpack.c.bf16 %v3736_v22, %v3736_v22  ;;  %v3734_v34 = vsel %vm13677_vm6, %v2977_v6, 0.0  ;;  %v2978_v40 = vmax.f32 %v2850_v44, 0.0  ;;  %v3175_v44 = vsub.s32 %v13652_v2, %v3174_v43 }
 0x1aa   : > { %v10371_v13 = vpack.c.bf16 %v3734_v34, %v3734_v34  ;;  %v3737_v19 = vsel %vm13682_vm3, %v2980_v54, 0.0  ;;  %vm3450_vm12 = vcmp.ne.s32.totalorder %v3142_v60, 0  ;;  %vm3486_vm7 = vcmp.lt.s32.totalorder %v3142_v60, 0 }
 0x1ab   : > { %v3954_v0 = vshrl.u32 %v10373_v18, 16  ;;  %v3957_v62 = vshll.u32 %v10373_v18, 16  ;;  %v10374_v39 = vpack.c.bf16 %v3737_v19, %v3737_v19  ;;  %v3735_v57 = vsel %vm13688_vm2, %v2978_v40, 0.0  ;;  %v2708_v5 = vld [vmem:[#allocation4 + $0x80] sm:$0xff]  ;;  %vm13744_vm6 = vmand %vm3486_vm7, %vm3450_vm12 }
 0x1ac   : > { %v2709_v24 = vld [vmem:[#allocation4 + $0x88] sm:$0xff]  ;;  %v3934_v16 = vshrl.u32 %v10371_v13, 16  ;;  %v3937_v47 = vshll.u32 %v10371_v13, 16  ;;  %v10372_v20 = vpack.c.bf16 %v3735_v57, %v3735_v57  ;;  %10839 = vmatprep.mubr.msk.bf16.mxu0 %vm15160_vm5, %v2708_v5  ;;  %v3153_v22 = vsub.s32 %v13674_v21, %v3152_v28 }
 0x1ad   : > { %v3956_v30 = vrot.slane %v3954_v0, 6  ;;  %v3959_v51 = vrot.slane %v3957_v62, 7  ;;  %v3964_v41 = vshrl.u32 %v10374_v39, 16  ;;  %v3967_v8 = vshll.u32 %v10374_v39, 16  ;;  %10840 = vmatmul.mubr.msk.bf16.gmra.mrb[32].mxu0 %vm15161_vm1, %v2709_v24 }
 0x1ae   : > { %v3936_v27 = vrot.slane %v3934_v16, 6  ;;  %v3939_v1 = vrot.slane %v3937_v47, 7  ;;  %v3944_v49 = vshrl.u32 %v10372_v20, 16  ;;  %v3947_v33 = vshll.u32 %v10372_v20, 16  ;;  %10859 = vmatprep.mubr.bf16.mxu0 %v11888_v55 }
 0x1af   : > { %v3960_v58 = vor.u32 %v3959_v51, %v3956_v30  ;;  %v3966_v31 = vrot.slane %v3964_v41, 6  ;;  %v3969_v38 = vrot.slane %v3967_v8, 7  ;;  %v3558_v54 = vadd.s32 18, %v3142_v60 }
 0x1b0   : > { %v3940_v52 = vor.u32 %v3939_v1, %v3936_v27  ;;  %v3946_v48 = vrot.slane %v3944_v49, 6  ;;  %v3949_v9 = vrot.slane %v3947_v33, 7  ;;  %vm3453_vm15 = vcmp.ne.s32.totalorder %v3175_v44, 0 }
 0x1b1   : > { %v3962_v17 = vrot.slane %v3960_v58, 4  ;;  %v13707_v32 = vor.u32 %v3969_v38, %v3966_v31  ;;  %vm3489_vm10 = vcmp.lt.s32.totalorder %v3175_v44, 0  ;;  %v3561_v35 = vadd.s32 18, %v3175_v44 }
 0x1b2   : > { %v3941_v14 = vsel %vm13594_vm4, %v3932_v29, %v3940_v52  ;;  %v3942_v50 = vrot.slane %v3940_v52, 4  ;;  %v3950_v53 = vor.u32 %v3949_v9, %v3946_v48  ;;  %vm3451_vm13 = vcmp.ne.s32.totalorder %v3153_v22, 0  ;;  %vm13757_vm3 = vmand %vm3489_vm10, %vm3453_vm15 }
 0x1b3   : > { %4296 = vst [vmem:[#allocation2 + $0x18] sm:$0xf] %v3941_v14  ;;  %v3971_v15 = vsel %vm13594_vm4, %v3962_v17, %v13707_v32  ;;  %v13734_v34 = vmul.u32.u64.low 3817748708, %v13724_v7  ;;  %v13735_v21 = vmul.u32.u64.high 3817748708, %v13724_v7, %v13734_v34  ;;  %v13738_v55 = vadd.s32 120, %v13451_v3 }
 0x1b4   : > { %4299 = vst [vmem:[#allocation2 + $0x24] sm:$0xf] %v3971_v15  ;;  %v3951_v63 = vsel %vm13594_vm4, %v3942_v50, %v3950_v53  ;;  %v3952_v25 = vrot.slane %v3950_v53, 4  ;;  %v3596_v13 = vsel %vm13726_vm0, %v3560_v37, %v3164_v10  ;;  %vm3487_vm14 = vcmp.lt.s32.totalorder %v3153_v22, 0 }
 0x1b5   : > { %4297 = vst [vmem:[#allocation2 + $0x1c] sm:$0xf] %v3951_v63  ;;  %10860 = vmatmul.mubr.bf16.vlgmr.msra.gmra.mrb[36].mxu0 %v11889_v26  ;;  %v3559_v0 = vadd.s32 18, %v3153_v22  ;;  %v13749_v62 = vmul.u32.u64.low 3817748708, %v13731_v12  ;;  %v13750_v39 = vmul.u32.u64.high 3817748708, %v13731_v12, %v13749_v62  ;;  %v13753_v57 = vadd.s32 104, %v13451_v3  ;;  %vm13762_vm2 = vmand %vm3487_vm14, %vm3451_vm13 }
 0x1b6   : > { %v3961_v6 = vsel %vm13594_vm4, %v3952_v25, %v3960_v58  ;;  %10863 = vmatprep.mubr.bf16.mxu0 %v11890_v46  ;;  %v13767_v51 = vmul.u32.u64.low 3817748708, %v13738_v55  ;;  %v13768_v41 = vmul.u32.u64.high 3817748708, %v13738_v55, %v13767_v51  ;;  %vm13770_vm5 = vcmp.lt.s32.totalorder %v3596_v13, 16 }
 0x1b7   : > { %4298 = vst [vmem:[#allocation2 + $0x20] sm:$0xf] %v3961_v6  ;;  %v3594_v1 = vsel %vm13744_vm6, %v3558_v54, %v3142_v60  ;;  %v3597_v38 = vsel %vm13757_vm3, %v3561_v35, %v3175_v44  ;;  %v13780_v4 = vmul.u32.u64.low 3817748708, %v13753_v57  ;;  %v13781_v29 = vmul.u32.u64.high 3817748708, %v13753_v57, %v13780_v4 }
 0x1b8   : > { %v3595_v9 = vsel %vm13762_vm2, %v3559_v0, %v3153_v22  ;;  %vm3630_vm1 = vcmp.lt.s32.totalorder %v3594_v1, 16  ;;  %v3206_v43 = vshrl.u32 %v13735_v21, 4  ;;  %vm3633_vm11 = vcmp.lt.s32.totalorder %v3597_v38, 16 }
 0x1b9   : > { %vm3631_vm12 = vcmp.lt.s32.totalorder %v3595_v9, 16  ;;  %v3184_v10 = vshrl.u32 %v13750_v39, 4  ;;  %v3217_v54 = vshrl.u32 %v13768_v41, 4  ;;  %v3195_v1 = vshrl.u32 %v13781_v29, 4 }
 0x1ba   : > { %v3207_v22 = vmul.u32 18, %v3206_v43  ;;  %v13823_v43 = vadd.s32 128, %v13451_v3 }
 0x1bb   : > { %v3185_v13 = vmul.u32 18, %v3184_v10 }
 0x1bc   : > { %v11891_v2 = vld [vmem:[#allocation2 + $0x18] sm:$0xff]  }
 0x1bd   : > { %v11894_v18 = vld [vmem:[#allocation2 + $0x18] sm:$0xff]   ;;  %10864 = vmatmul.mubr.bf16.gmra.mrb[40].mxu0 %v11891_v2  ;;  %v3186_v29 = vsub.s32 %v13731_v12, %v3185_v13 }
 0x1be   : > { %v11892_v40 = vld [vmem:[#allocation2 + $0x20] sm:$0xff]   ;;  %v6633_v24 = vshrl.u32 %v11894_v18, 16  ;;  %v6636_v45 = vshll.u32 %v11894_v18, 16 }
 0x1bf   : > { %v11895_v19 = vld [vmem:[#allocation2 + $0x20] sm:$0xff]   ;;  %10867 = vmatprep.mubr.bf16.mxu0 %v11892_v40  ;;  %vm3454_vm0 = vcmp.ne.s32.totalorder %v3186_v29, 0  ;;  %vm3490_vm10 = vcmp.lt.s32.totalorder %v3186_v29, 0 }
 0x1c0   : > { %v6635_v16 = vrot.slane %v6633_v24, 1  ;;  %v6638_v47 = vrot.slane %v6636_v45, 2  ;;  %v6642_v20 = vshrl.u32 %v11895_v19, 16  ;;  %v6645_v59 = vshll.u32 %v11895_v19, 16  ;;  %vm13847_vm2 = vmand %vm3490_vm10, %vm3454_vm0 }
 0x1c2   : > { %v6644_v49 = vrot.slane %v6642_v20, 1  ;;  %v6647_v33 = vrot.slane %v6645_v59, 2  ;;  %v13786_v17 = vor.u32 %v6638_v47, %v6635_v16  ;;  %v3972_v16 = vrot.slane %v13707_v32, 4 }
 0x1c3   : > { %v10817_v8 = vpop.f32.mrb[8].mxu0 }
 0x1c4   : > { %v2871_v58 = vadd.f32 %v10817_v8, %v13521_v56  ;;  %v2862_v31 = vpop.f32.mrb[9].mxu0  ;;  %v13788_v36 = vor.u32 %v6647_v33, %v6644_v49 }
 0x1c5   : > { %v2863_v52 = vadd.f32 %v13521_v56, %v2862_v31  ;;  %v10818_v48 = vpop.f32.mrb[10].mxu0  ;;  %v3218_v31 = vmul.u32 18, %v3217_v54 }
 0x1c6   : > { %v2983_v14 = vmax.f32 %v2871_v58, 0.0  ;;  %v2874_v50 = vadd.f32 %v10818_v48, %v13521_v56  ;;  %v2865_v53 = vpop.f32.mrb[11].mxu0  ;;  %v6649_v63 = vsel %vm15172_vm8, %v13786_v17, %v13788_v36  ;;  %v3196_v48 = vmul.u32 18, %v3195_v1 }
 0x1c7   : > { %v2981_v15 = vmax.f32 %v2863_v52, 0.0  ;;  %v2866_v26 = vadd.f32 %v13521_v56, %v2865_v53  ;;  %11071 = vmatprep.mubr.bf16.mxu1 %v6649_v63  ;;  %v3208_v52 = vsub.s32 %v13724_v7, %v3207_v22  ;;  %v3562_v7 = vadd.s32 18, %v3186_v29 }
 0x1c8   : > { %v3740_v25 = vsel %vm13770_vm5, %v2983_v14, 0.0  ;;  %v2984_v46 = vmax.f32 %v2874_v50, 0.0  ;;  %v13816_v14 = vsub.s32 %v13738_v55, %v3218_v31  ;;  %v13819_v50 = vadd.s32 144, %v13451_v3 }
 0x1c9   : > { %v10377_v60 = vpack.c.bf16 %v3740_v25, %v3740_v25  ;;  %v3738_v28 = vsel %vm3630_vm1, %v2981_v15, 0.0  ;;  %v2982_v6 = vmax.f32 %v2866_v26, 0.0  ;;  %vm3456_vm7 = vcmp.ne.s32.totalorder %v3208_v52, 0 }
 0x1ca   : > { %v10375_v44 = vpack.c.bf16 %v3738_v28, %v3738_v28  ;;  %v3741_v37 = vsel %vm3633_vm11, %v2984_v46, 0.0  ;;  %vm3492_vm15 = vcmp.lt.s32.totalorder %v3208_v52, 0  ;;  %v3564_v53 = vadd.s32 18, %v3208_v52 }
 0x1cb   : > { %v3994_v61 = vshrl.u32 %v10377_v60, 16  ;;  %v3997_v35 = vshll.u32 %v10377_v60, 16  ;;  %v10378_v2 = vpack.c.bf16 %v3741_v37, %v3741_v37  ;;  %v3739_v18 = vsel %vm3631_vm12, %v2982_v6, 0.0  ;;  %vm13827_vm6 = vmand %vm3492_vm15, %vm3456_vm7 }
 0x1cc   : > { %v3974_v34 = vshrl.u32 %v10375_v44, 16  ;;  %v3977_v21 = vshll.u32 %v10375_v44, 16  ;;  %v10376_v40 = vpack.c.bf16 %v3739_v18, %v3739_v18  ;;  %v3197_v12 = vsub.s32 %v13753_v57, %v3196_v48 }
 0x1cd   : > { %v3996_v19 = vrot.slane %v3994_v61, 6  ;;  %v3999_v24 = vrot.slane %v3997_v35, 7  ;;  %v4004_v45 = vshrl.u32 %v10378_v2, 16  ;;  %v4007_v11 = vshll.u32 %v10378_v2, 16 }
 0x1ce   : > { %v3976_v0 = vrot.slane %v3974_v34, 6  ;;  %v3979_v62 = vrot.slane %v3977_v21, 7  ;;  %v3984_v39 = vshrl.u32 %v10376_v40, 16  ;;  %v3987_v5 = vshll.u32 %v10376_v40, 16 }
 0x1cf   : > { %v4000_v47 = vor.u32 %v3999_v24, %v3996_v19  ;;  %v4006_v20 = vrot.slane %v4004_v45, 6  ;;  %v4009_v59 = vrot.slane %v4007_v11, 7  ;;  %vm3457_vm13 = vcmp.ne.s32.totalorder %v13816_v14, 0 }
 0x1d0   : > { %v3980_v30 = vor.u32 %v3979_v62, %v3976_v0  ;;  %v3986_v51 = vrot.slane %v3984_v39, 6  ;;  %v3989_v41 = vrot.slane %v3987_v5, 7  ;;  %vm3493_vm14 = vcmp.lt.s32.totalorder %v13816_v14, 0 }
 0x1d1   : > { %v4002_v8 = vrot.slane %v4000_v47, 4  ;;  %v13801_v27 = vor.u32 %v4009_v59, %v4006_v20  ;;  %v13832_v15 = vmul.u32.u64.low 3817748708, %v13819_v50  ;;  %v13833_v26 = vmul.u32.u64.high 3817748708, %v13819_v50, %v13832_v15  ;;  %vm13855_vm1 = vmand %vm3493_vm14, %vm3457_vm13 }
 0x1d2   : > { %v3981_v49 = vsel %vm13594_vm4, %v3972_v16, %v3980_v30  ;;  %v3982_v33 = vrot.slane %v3980_v30, 4  ;;  %v3990_v58 = vor.u32 %v3989_v41, %v3986_v51  ;;  %v3565_v25 = vadd.s32 18, %v13816_v14 }
 0x1d3   : > { %4300 = vst [vmem:[#allocation2 + $0x28] sm:$0xf] %v3981_v49  ;;  %v4011_v32 = vsel %vm13594_vm4, %v4002_v8, %v13801_v27  ;;  %vm3455_vm3 = vcmp.ne.s32.totalorder %v3197_v12, 0  ;;  %v13837_v46 = vmul.u32.u64.low 3817748708, %v13823_v43  ;;  %v13838_v10 = vmul.u32.u64.high 3817748708, %v13823_v43, %v13837_v46 }
 0x1d4   : > { %4303 = vst [vmem:[#allocation2 + $0x34] sm:$0xf] %v4011_v32  ;;  %v3991_v38 = vsel %vm13594_vm4, %v3982_v33, %v3990_v58  ;;  %v3992_v4 = vrot.slane %v3990_v58, 4  ;;  %v13841_v28 = vadd.s32 152, %v13451_v3  ;;  %v3600_v6 = vsel %vm13827_vm6, %v3564_v53, %v3208_v52 }
 0x1d5   : > { %4301 = vst [vmem:[#allocation2 + $0x2c] sm:$0xf] %v3991_v38  ;;  %vm3491_vm5 = vcmp.lt.s32.totalorder %v3197_v12, 0  ;;  %v3563_v35 = vadd.s32 18, %v3197_v12  ;;  %v13860_v2 = vadd.s32 136, %v13451_v3  ;;  %vm13862_vm11 = vcmp.lt.s32.totalorder %v3600_v6, 16 }
 0x1d6   : > { %v4001_v9 = vsel %vm13594_vm4, %v3992_v4, %v4000_v47  ;;  %v3598_v19 = vsel %vm13847_vm2, %v3562_v7, %v3186_v29  ;;  %vm13870_vm8 = vmand %vm3491_vm5, %vm3455_vm3  ;;  %v13875_v45 = vmul.u32.u64.low 3817748708, %v13841_v28  ;;  %v13876_v11 = vmul.u32.u64.high 3817748708, %v13841_v28, %v13875_v45 }
 0x1d7   : > { %4302 = vst [vmem:[#allocation2 + $0x30] sm:$0xf] %v4001_v9  ;;  %v3601_v62 = vsel %vm13855_vm1, %v3565_v25, %v13816_v14  ;;  %v3250_v59 = vshrl.u32 %v13833_v26, 4  ;;  %v13884_v30 = vmul.u32.u64.low 3817748708, %v13860_v2  ;;  %v13885_v51 = vmul.u32.u64.high 3817748708, %v13860_v2, %v13884_v30 }
 0x1d8   : > { %v3599_v1 = vsel %vm13870_vm8, %v3563_v35, %v3197_v12  ;;  %vm15183_vm12 = vsmask.f32 6400  ;;  %vm13894_vm7 = vcmp.lt.s32.totalorder %v3598_v19, 16  ;;  %v3228_v4 = vshrl.u32 %v13838_v10, 4 }
 0x1d9   : > { %vm3637_vm15 = vcmp.lt.s32.totalorder %v3601_v62, 16  ;;  %vm15186_vm0 = vmmov %vm15183_vm12  ;;  %vm3635_vm10 = vcmp.lt.s32.totalorder %v3599_v1, 16  ;;  %v3251_v14 = vmul.u32 18, %v3250_v59  ;;  %v3239_v44 = vshrl.u32 %v13885_v51, 4 }
 0x1da   : > { %v3229_v26 = vmul.u32 18, %v3228_v4  ;;  %v13932_v31 = vadd.s32 176, %v13451_v3 }
 0x1db   : > { %v3240_v59 = vmul.u32 18, %v3239_v44 }
 0x1dc   : > { %v11902_v63 = vld [vmem:[#allocation2 + $0x28] sm:$0xff]  }
 0x1dd   : > { %v11905_v57 = vld [vmem:[#allocation2 + $0x28] sm:$0xff]   ;;  %10868 = vmatmul.mubr.bf16.gmra.mrb[44].mxu0 %v11902_v63 }
 0x1de   : > { %v11903_v60 = vld [vmem:[#allocation2 + $0x30] sm:$0xff]   ;;  %v6651_v37 = vshrl.u32 %v11905_v57, 16  ;;  %v6654_v22 = vshll.u32 %v11905_v57, 16 }
 0x1df   : > { %v11906_v54 = vld [vmem:[#allocation2 + $0x30] sm:$0xff]   ;;  %10871 = vmatprep.mubr.bf16.mxu0 %v11903_v60 }
 0x1e0   : > { %v6653_v18 = vrot.slane %v6651_v37, 1  ;;  %v6656_v34 = vrot.slane %v6654_v22, 2  ;;  %v6660_v21 = vshrl.u32 %v11906_v54, 16  ;;  %v6663_v40 = vshll.u32 %v11906_v54, 16 }
 0x1e2   : > { %v6657_v39 = vor.u32 %v6656_v34, %v6653_v18  ;;  %v6662_v5 = vrot.slane %v6660_v21, 1  ;;  %v6665_v16 = vrot.slane %v6663_v40, 2  ;;  %v4012_v40 = vrot.slane %v13801_v27, 4 }
 0x1e3   : > { %v10821_v0 = vpop.f32.mrb[12].mxu0 }
 0x1e4   : > { %v2887_v47 = vadd.f32 %v10821_v0, %v13521_v56  ;;  %v2878_v20 = vpop.f32.mrb[13].mxu0  ;;  %v6658_v49 = vsel %vm15183_vm12, %v13788_v36, %v6657_v39  ;;  %v13892_v33 = vor.u32 %v6665_v16, %v6662_v5 }
 0x1e5   : > { %v2879_v41 = vadd.f32 %v13521_v56, %v2878_v20  ;;  %v10822_v8 = vpop.f32.mrb[14].mxu0  ;;  %11072 = vmatmul.mubr.bf16.vlgmr.msra.gmra.mrb[0].mxu1 %v6658_v49 }
 0x1e6   : > { %v2987_v58 = vmax.f32 %v2887_v47, 0.0  ;;  %v2890_v32 = vadd.f32 %v10822_v8, %v13521_v56  ;;  %v2881_v38 = vpop.f32.mrb[15].mxu0  ;;  %v6667_v36 = vsel %vm15186_vm0, %v6657_v39, %v13892_v33  ;;  %v13921_v8 = vsub.s32 %v13823_v43, %v3229_v26  ;;  %v11924_v43 = vld [vmem:[%s14993_s3 + $0x148] sm:$0xff]  }
 0x1e7   : > { %v2985_v52 = vmax.f32 %v2879_v41, 0.0  ;;  %v2882_v29 = vadd.f32 %v13521_v56, %v2881_v38  ;;  %11075 = vmatprep.mubr.bf16.mxu1 %v6667_v36  ;;  %v3261_v56 = vshrl.u32 %v13876_v11, 4  ;;  %v3252_v41 = vsub.s32 %v13819_v50, %v3251_v14  ;;  %v11923_v50 = vld [vmem:[%s14993_s3 + $0x140] sm:$0xff]  }
 0x1e8   : > { %v3744_v48 = vsel %vm13862_vm11, %v2987_v58, 0.0  ;;  %v2988_v9 = vmax.f32 %v2890_v32, 0.0  ;;  %v13929_v58 = vsub.s32 %v13860_v2, %v3240_v59  ;;  %vm3458_vm6 = vcmp.ne.s32.totalorder %v13921_v8, 0  ;;  %11103 = vmatprep.subr.bf16.mxu1 %v11923_v50 }
 0x1e9   : > { %v10381_v53 = vpack.c.bf16 %v3744_v48, %v3744_v48  ;;  %v3742_v7 = vsel %vm13894_vm7, %v2985_v52, 0.0  ;;  %v2986_v12 = vmax.f32 %v2882_v29, 0.0  ;;  %v3262_v5 = vmul.u32 18, %v3261_v56  ;;  %11104 = vmatpush3.bf16.msra.mxu1 %v11923_v50 }
 0x1ea   : > { %v10379_v55 = vpack.c.bf16 %v3742_v7, %v3742_v7  ;;  %v3745_v15 = vsel %vm3637_vm15, %v2988_v9, 0.0  ;;  %vm3460_vm13 = vcmp.ne.s32.totalorder %v3252_v41, 0  ;;  %vm3496_vm14 = vcmp.lt.s32.totalorder %v3252_v41, 0  ;;  %11105 = vmatprep.subr.bf16.mxu1 %v11924_v43 }
 0x1eb   : > { %v4034_v63 = vshrl.u32 %v10381_v53, 16  ;;  %v4037_v25 = vshll.u32 %v10381_v53, 16  ;;  %v10382_v57 = vpack.c.bf16 %v3745_v15, %v3745_v15  ;;  %v3743_v46 = vsel %vm3635_vm10, %v2986_v12, 0.0  ;;  %vm13958_vm11 = vmand %vm3496_vm14, %vm3460_vm13 }
 0x1ec   : > { %v4014_v10 = vshrl.u32 %v10379_v55, 16  ;;  %v4017_v60 = vshll.u32 %v10379_v55, 16  ;;  %v10380_v6 = vpack.c.bf16 %v3743_v46, %v3743_v46  ;;  %v13924_v1 = vsub.s32 %v13841_v28, %v3262_v5 }
 0x1ed   : > { %v4036_v37 = vrot.slane %v4034_v63, 6  ;;  %v4039_v22 = vrot.slane %v4037_v25, 7  ;;  %v4044_v54 = vshrl.u32 %v10382_v57, 16  ;;  %v4047_v61 = vshll.u32 %v10382_v57, 16  ;;  %11106 = vmatpush3.bf16.msra.mxu1 %v11924_v43 }
 0x1ee   : > { %v4016_v35 = vrot.slane %v4014_v10, 6  ;;  %v4019_v18 = vrot.slane %v4017_v60, 7  ;;  %v4024_v34 = vshrl.u32 %v10380_v6, 16  ;;  %v4027_v21 = vshll.u32 %v10380_v6, 16 }
 0x1ef   : > { %v4040_v13 = vor.u32 %v4039_v22, %v4036_v37  ;;  %v4046_v19 = vrot.slane %v4044_v54, 6  ;;  %v4049_v24 = vrot.slane %v4047_v61, 7  ;;  %v3568_v28 = vadd.s32 18, %v3252_v41 }
 0x1f0   : > { %v4020_v45 = vor.u32 %v4019_v18, %v4016_v35  ;;  %v4026_v11 = vrot.slane %v4024_v34, 6  ;;  %v4029_v0 = vrot.slane %v4027_v21, 7  ;;  %vm3494_vm3 = vcmp.lt.s32.totalorder %v13921_v8, 0  ;;  %v11928_v18 = vld [vmem:[%s14993_s3 + $0x40] sm:$0xff]  }
 0x1f1   : > { %v4042_v62 = vrot.slane %v4040_v13, 4  ;;  %v13910_v39 = vor.u32 %v4049_v24, %v4046_v19  ;;  %v3566_v2 = vadd.s32 18, %v13921_v8  ;;  %vm3461_vm2 = vcmp.ne.s32.totalorder %v13924_v1, 0  ;;  %vm13974_vm12 = vmand %vm3494_vm3, %vm3458_vm6  ;;  %v14018_v24 = vld [vmem:[%s14992_s2] ss:$0 sm:$0xff]  ;;  %10895 = vmatprep.subr.bf16.mxu0 %v11928_v18 }
 0x1f2   : > { %v4021_v16 = vsel %vm13594_vm4, %v4012_v40, %v4020_v45  ;;  %v4022_v47 = vrot.slane %v4020_v45, 4  ;;  %v4030_v20 = vor.u32 %v4029_v0, %v4026_v11  ;;  %v13945_v32 = vadd.s32 160, %v13451_v3  ;;  %10896 = vmatpush3.bf16.msra.mxu0 %v11928_v18  ;;  %v11934_v11 = vld [vmem:[%s14993_s3 + $0x58] sm:$0xff]  }
 0x1f3   : > { %4304 = vst [vmem:[#allocation2 + $0x38] sm:$0xf] %v4021_v16  ;;  %v4051_v27 = vsel %vm13594_vm4, %v4042_v62, %v13910_v39  ;;  %vm3497_vm5 = vcmp.lt.s32.totalorder %v13924_v1, 0  ;;  %vm3459_vm1 = vcmp.ne.s32.totalorder %v13929_v58, 0  ;;  %v13954_v29 = vadd.s32 184, %v13451_v3 }
 0x1f4   : > { %4307 = vst [vmem:[#allocation2 + $0x44] sm:$0xf] %v4051_v27  ;;  %v4031_v30 = vsel %vm13594_vm4, %v4022_v47, %v4030_v20  ;;  %v4032_v51 = vrot.slane %v4030_v20, 4  ;;  %v13950_v38 = vmul.u32.u64.low 3817748708, %v13932_v31  ;;  %v13951_v4 = vmul.u32.u64.high 3817748708, %v13932_v31, %v13950_v38  ;;  %vm13986_vm7 = vmand %vm3497_vm5, %vm3461_vm2 }
 0x1f5   : > { %4305 = vst [vmem:[#allocation2 + $0x3c] sm:$0xf] %v4031_v30  ;;  %vm3495_vm8 = vcmp.lt.s32.totalorder %v13929_v58, 0  ;;  %v13964_v9 = vmul.u32.u64.low 3817748708, %v13945_v32  ;;  %v13965_v14 = vmul.u32.u64.high 3817748708, %v13945_v32, %v13964_v9  ;;  %v13968_v7 = vadd.s32 168, %v13451_v3 }
 0x1f6   : > { %v4041_v49 = vsel %vm13594_vm4, %v4032_v51, %v4040_v13  ;;  %v3569_v55 = vadd.s32 18, %v13924_v1  ;;  %v3567_v15 = vadd.s32 18, %v13929_v58  ;;  %v3604_v25 = vsel %vm13958_vm11, %v3568_v28, %v3252_v41  ;;  %vm13998_vm15 = vmand %vm3495_vm8, %vm3459_vm1 }
 0x1f7   : > { %4306 = vst [vmem:[#allocation2 + $0x40] sm:$0xf] %v4041_v49  ;;  %v13991_v46 = vmul.u32.u64.low 3817748708, %v13954_v29  ;;  %v13992_v10 = vmul.u32.u64.high 3817748708, %v13954_v29, %v13991_v46  ;;  %v3602_v54 = vsel %vm13974_vm12, %v3566_v2, %v13921_v8  ;;  %vm14021_vm0 = vcmp.lt.s32.totalorder %v3604_v25, 16 }
 0x1f8   : > { %v14006_v61 = vmul.u32.u64.low 3817748708, %v13968_v7  ;;  %v14007_v35 = vmul.u32.u64.high 3817748708, %v13968_v7, %v14006_v61  ;;  %v3605_v21 = vsel %vm13986_vm7, %v3569_v55, %v13924_v1  ;;  %v3603_v62 = vsel %vm13998_vm15, %v3567_v15, %v13929_v58 }
 0x1f9   : > { %v3294_v5 = vshrl.u32 %v13951_v4, 4  ;;  %vm15197_vm10 = vsmask.f32 6400  ;;  %v3272_v27 = vshrl.u32 %v13965_v14, 4  ;;  %vm14035_vm13 = vcmp.lt.s32.totalorder %v3602_v54, 16 }
 0x1fa   : > { %vm14040_vm14 = vcmp.lt.s32.totalorder %v3605_v21, 16  ;;  %vm14048_vm6 = vcmp.lt.s32.totalorder %v3603_v62, 16  ;;  %vm15204_vm3 = vmmov %vm15197_vm10  ;;  %v3305_v4 = vshrl.u32 %v13992_v10, 4  ;;  %v3283_v12 = vshrl.u32 %v14007_v35, 4  ;;  %v11933_v10 = vld [vmem:[%s14993_s3 + $0x50] sm:$0xff]  }
 0x1fb   : > { %v3295_v38 = vmul.u32 18, %v3294_v5  ;;  %v3273_v9 = vmul.u32 18, %v3272_v27  ;;  %v14095_v8 = vadd.s32 208, %v13451_v3 }
 0x1fc   : > { %v11907_v52 = vld [vmem:[#allocation2 + $0x38] sm:$0xff]   ;;  %v3284_v27 = vmul.u32 18, %v3283_v12 }
 0x1fd   : > { %v11909_v48 = vld [vmem:[#allocation2 + $0x38] sm:$0xff]   ;;  %10872 = vmatmul.mubr.bf16.gmra.mrb[48].mxu0 %v11907_v52  ;;  %v14065_v46 = vsub.s32 %v13932_v31, %v3295_v38  ;;  %v4052_v31 = vrot.slane %v13910_v39, 4 }
 0x1fe   : > { %v11908_v53 = vld [vmem:[#allocation2 + $0x40] sm:$0xff]   ;;  %v6669_v26 = vshrl.u32 %v11909_v48, 16  ;;  %v6672_v56 = vshll.u32 %v11909_v48, 16 }
 0x1ff   : > { %v11910_v63 = vld [vmem:[#allocation2 + $0x40] sm:$0xff]   ;;  %10875 = vmatprep.mubr.bf16.mxu0 %v11908_v53  ;;  %vm3464_vm2 = vcmp.ne.s32.totalorder %v14065_v46, 0  ;;  %vm3500_vm5 = vcmp.lt.s32.totalorder %v14065_v46, 0 }
 0x200   : > { %v6671_v6 = vrot.slane %v6669_v26, 1  ;;  %v6674_v44 = vrot.slane %v6672_v56, 2  ;;  %v6678_v37 = vshrl.u32 %v11910_v63, 16  ;;  %v6681_v22 = vshll.u32 %v11910_v63, 16  ;;  %vm14113_vm1 = vmand %vm3500_vm5, %vm3464_vm2 }
 0x201   : > { %vm15217_vm2 = vsmask.f32 6400 }
 0x202   : > { %v6675_v40 = vor.u32 %v6674_v44, %v6671_v6  ;;  %v6680_v13 = vrot.slane %v6678_v37, 1  ;;  %v6683_v19 = vrot.slane %v6681_v22, 2 }
 0x203   : > { %v10825_v34 = vpop.f32.mrb[16].mxu0 }
 0x204   : > { %v2903_v45 = vadd.f32 %v14018_v24, %v10825_v34  ;;  %v2894_v0 = vpop.f32.mrb[17].mxu0  ;;  %v6676_v20 = vsel %vm15197_vm10, %v13892_v33, %v6675_v40  ;;  %v14032_v59 = vor.u32 %v6683_v19, %v6680_v13  ;;  %v11930_v33 = vld [vmem:[%s14993_s3 + $0x48] sm:$0xff]  }
 0x205   : > { %v2895_v16 = vadd.f32 %v14018_v24, %v2894_v0  ;;  %v10826_v47 = vpop.f32.mrb[18].mxu0  ;;  %11076 = vmatmul.mubr.bf16.gmra.mrb[4].mxu1 %v6676_v20  ;;  %10897 = vmatprep.subr.bf16.mxu0 %v11930_v33  ;;  %v14079_v20 = vsub.s32 %v13945_v32, %v3273_v9 }
 0x206   : > { %v2991_v30 = vmax.f32 %v2903_v45, 0.0  ;;  %v2906_v41 = vadd.f32 %v14018_v24, %v10826_v47  ;;  %v2897_v1 = vpop.f32.mrb[19].mxu0  ;;  %v6685_v43 = vsel %vm15204_vm3, %v6675_v40, %v14032_v59  ;;  %10898 = vmatpush3.bf16.msra.mxu0 %v11930_v33  ;;  %v3306_v40 = vmul.u32 18, %v3305_v4  ;;  %v11936_v33 = vld [vmem:[%s14993_s3 + $0x60] sm:$0xff]  }
 0x207   : > { %v2989_v49 = vmax.f32 %v2895_v16, 0.0  ;;  %v2898_v58 = vadd.f32 %v14018_v24, %v2897_v1  ;;  %11079 = vmatprep.mubr.bf16.mxu1 %v6685_v43  ;;  %10899 = vmatprep.subr.bf16.mxu0 %v11933_v10  ;;  %v11932_v1 = vld [vmem:[%s14993_s3 + $0x158] sm:$0xff]   ;;  %vm3462_vm11 = vcmp.ne.s32.totalorder %v14079_v20, 0  ;;  %vm3498_vm8 = vcmp.lt.s32.totalorder %v14079_v20, 0 }
 0x208   : > { %v3748_v28 = vsel %vm14021_vm0, %v2991_v30, 0.0  ;;  %v2992_v2 = vmax.f32 %v2906_v41, 0.0  ;;  %v11927_v30 = vld [vmem:[%s14993_s3 + $0x150] sm:$0xff]   ;;  %v14092_v41 = vsub.s32 %v13954_v29, %v3306_v40  ;;  %v3570_v43 = vadd.s32 18, %v14079_v20  ;;  %vm14153_vm10 = vmand %vm3498_vm8, %vm3462_vm11 }
 0x209   : > { %v10385_v52 = vpack.c.bf16 %v3748_v28, %v3748_v28  ;;  %v3746_v36 = vsel %vm14035_vm13, %v2989_v49, 0.0  ;;  %v2990_v48 = vmax.f32 %v2898_v58, 0.0  ;;  %11107 = vmatprep.subr.bf16.mxu1 %v11927_v30  ;;  %v11937_v49 = vld [vmem:[%s14993_s3 + $0x68] sm:$0xff]   ;;  %v3572_v58 = vadd.s32 18, %v14065_v46  ;;  %v11935_v28 = vld [vmem:[%s14993_s3 + $0x160] sm:$0xff]  }
 0x20a   : > { %v10383_v14 = vpack.c.bf16 %v3746_v36, %v3746_v36  ;;  %v3749_v53 = vsel %vm14040_vm14, %v2992_v2, 0.0  ;;  %10900 = vmatpush3.bf16.msra.mxu0 %v11933_v10  ;;  %11108 = vmatpush3.bf16.msra.mxu1 %v11927_v30  ;;  %vm3465_vm12 = vcmp.ne.s32.totalorder %v14092_v41, 0  ;;  %v14125_v2 = vsub.s32 %v13968_v7, %v3284_v27  ;;  %v11938_v36 = vld [vmem:[%s14993_s3 + $0x168] sm:$0xff]   ;;  %v11940_v7 = vld [vmem:[%s14993_s3 + $0x70] sm:$0xff]   ;;  %v11949_v30 = vld [vmem:[%s14993_s3 + $0x178] sm:$0xff]  }
 0x20b   : > { %v4074_v55 = vshrl.u32 %v10385_v52, 16  ;;  %v4077_v15 = vshll.u32 %v10385_v52, 16  ;;  %v10386_v26 = vpack.c.bf16 %v3749_v53, %v3749_v53  ;;  %v3747_v56 = vsel %vm14048_vm6, %v2990_v48, 0.0  ;;  %10901 = vmatprep.subr.bf16.mxu0 %v11934_v11  ;;  %11109 = vmatprep.subr.bf16.mxu1 %v11932_v1 }
 0x20c   : > { %v4054_v63 = vshrl.u32 %v10383_v14, 16  ;;  %v4057_v25 = vshll.u32 %v10383_v14, 16  ;;  %v10384_v57 = vpack.c.bf16 %v3747_v56, %v3747_v56  ;;  %v14132_v52 = vadd.s32 192, %v13451_v3  ;;  %v11943_v56 = vld [vmem:[%s14993_s3 + $0x78] sm:$0xff]  }
 0x20d   : > { %v4076_v60 = vrot.slane %v4074_v55, 6  ;;  %v4079_v6 = vrot.slane %v4077_v15, 7  ;;  %v4084_v44 = vshrl.u32 %v10386_v26, 16  ;;  %v4087_v37 = vshll.u32 %v10386_v26, 16 }
 0x20e   : > { %v4056_v22 = vrot.slane %v4054_v63, 6  ;;  %v4059_v54 = vrot.slane %v4057_v25, 7  ;;  %v4064_v61 = vshrl.u32 %v10384_v57, 16  ;;  %v4067_v35 = vshll.u32 %v10384_v57, 16  ;;  %10902 = vmatpush3.bf16.msra.mxu0 %v11934_v11  ;;  %11110 = vmatpush3.bf16.msra.mxu1 %v11932_v1 }
 0x20f   : > { %v4080_v18 = vor.u32 %v4079_v6, %v4076_v60  ;;  %v4086_v34 = vrot.slane %v4084_v44, 6  ;;  %v4089_v21 = vrot.slane %v4087_v37, 7  ;;  %10903 = vmatprep.subr.bf16.mxu0 %v11936_v33  ;;  %v3608_v48 = vsel %vm14113_vm1, %v3572_v58, %v14065_v46  ;;  %11111 = vmatprep.subr.bf16.mxu1 %v11935_v28  ;;  %v11944_v60 = vld [vmem:[%s14993_s3 + $0x170] sm:$0xff]   ;;  %vm15218_vm1 = vmmov %vm15217_vm2 }
 0x210   : > { %v4060_v13 = vor.u32 %v4059_v54, %v4056_v22  ;;  %v4066_v19 = vrot.slane %v4064_v61, 6  ;;  %v4069_v45 = vrot.slane %v4067_v35, 7  ;;  %vm3501_vm7 = vcmp.lt.s32.totalorder %v14092_v41, 0 }
 0x211   : > { %v4082_v0 = vrot.slane %v4080_v18, 4  ;;  %v14074_v62 = vor.u32 %v4089_v21, %v4086_v34  ;;  %v14128_v38 = vmul.u32.u64.low 3817748708, %v14095_v8  ;;  %v14129_v4 = vmul.u32.u64.high 3817748708, %v14095_v8, %v14128_v38  ;;  %vm14181_vm14 = vmand %vm3501_vm7, %vm3465_vm12 }
 0x212   : > { %v4061_v5 = vsel %vm13594_vm4, %v4052_v31, %v4060_v13  ;;  %v4062_v16 = vrot.slane %v4060_v13, 4  ;;  %v4070_v47 = vor.u32 %v4069_v45, %v4066_v19  ;;  %10904 = vmatpush3.bf16.msra.mxu0 %v11936_v33  ;;  %vm3463_vm15 = vcmp.ne.s32.totalorder %v14125_v2, 0  ;;  %11112 = vmatpush3.bf16.msra.mxu1 %v11935_v28 }
 0x213   : > { %4308 = vst [vmem:[#allocation2 + $0x48] sm:$0xf] %v4061_v5  ;;  %v4091_v39 = vsel %vm13594_vm4, %v4082_v0, %v14074_v62  ;;  %10905 = vmatprep.subr.bf16.mxu0 %v11937_v49  ;;  %vm14145_vm0 = vcmp.lt.s32.totalorder %v3608_v48, 16  ;;  %vm3499_vm13 = vcmp.lt.s32.totalorder %v14125_v2, 0  ;;  %v14163_v26 = vadd.s32 216, %v13451_v3  ;;  %11113 = vmatprep.subr.bf16.mxu1 %v11938_v36 }
 0x214   : > { %4311 = vst [vmem:[#allocation2 + $0x54] sm:$0xf] %v4091_v39  ;;  %v4071_v32 = vsel %vm13594_vm4, %v4062_v16, %v4070_v47  ;;  %v4072_v51 = vrot.slane %v4070_v47, 4  ;;  %v14159_v55 = vmul.u32.u64.low 3817748708, %v14132_v52  ;;  %v14160_v15 = vmul.u32.u64.high 3817748708, %v14132_v52, %v14159_v55  ;;  %vm14191_vm6 = vmand %vm3499_vm13, %vm3463_vm15 }
 0x215   : > { %4309 = vst [vmem:[#allocation2 + $0x4c] sm:$0xf] %v4071_v32  ;;  %v14169_v25 = vadd.s32 200, %v13451_v3  ;;  %v3606_v6 = vsel %vm14153_vm10, %v3570_v43, %v14079_v20  ;;  %v3573_v37 = vadd.s32 18, %v14092_v41  ;;  %v3571_v22 = vadd.s32 18, %v14125_v2 }
 0x216   : > { %v4081_v29 = vsel %vm13594_vm4, %v4072_v51, %v4080_v18  ;;  %10906 = vmatpush3.bf16.msra.mxu0 %v11937_v49  ;;  %v14196_v21 = vmul.u32.u64.low 3817748708, %v14163_v26  ;;  %v14197_v40 = vmul.u32.u64.high 3817748708, %v14163_v26, %v14196_v21  ;;  %11114 = vmatpush3.bf16.msra.mxu1 %v11938_v36  ;;  %vm14203_vm3 = vcmp.lt.s32.totalorder %v3606_v6, 16  ;;  %v11955_v6 = vld [vmem:[%s14993_s3 + $0x180] sm:$0xff]  }
 0x217   : > { %4310 = vst [vmem:[#allocation2 + $0x50] sm:$0xf] %v4081_v29  ;;  %10907 = vmatprep.subr.bf16.mxu0 %v11940_v7  ;;  %v14200_v31 = vmul.u32.u64.low 3817748708, %v14169_v25  ;;  %v14201_v13 = vmul.u32.u64.high 3817748708, %v14169_v25, %v14200_v31  ;;  %11115 = vmatprep.subr.bf16.mxu1 %v11944_v60  ;;  %v3609_v20 = vsel %vm14181_vm14, %v3573_v37, %v14092_v41  ;;  %v3607_v39 = vsel %vm14191_vm6, %v3571_v22, %v14125_v2 }
 0x218   : > { %v3338_v27 = vshrl.u32 %v14129_v4, 4  ;;  %v3316_v41 = vshrl.u32 %v14160_v15, 4  ;;  %vm3645_vm5 = vcmp.lt.s32.totalorder %v3609_v20, 16  ;;  %vm3643_vm11 = vcmp.lt.s32.totalorder %v3607_v39, 16 }
 0x219   : > { %v3327_v55 = vshrl.u32 %v14201_v13, 4 }
 0x21a   : > { %10908 = vmatpush3.bf16.msra.mxu0 %v11940_v7  ;;  %11116 = vmatpush3.bf16.msra.mxu1 %v11944_v60  ;;  %v3339_v38 = vmul.u32 18, %v3338_v27  ;;  %v3317_v7 = vmul.u32 18, %v3316_v41 }
 0x21b   : > { %10909 = vmatprep.subr.bf16.mxu0 %v11943_v56  ;;  %11117 = vmatprep.subr.bf16.mxu1 %v11949_v30 }
 0x21c   : > { %v11911_v9 = vld [vmem:[#allocation2 + $0x48] sm:$0xff]   ;;  %v3340_v20 = vsub.s32 %v14095_v8, %v3339_v38 }
 0x21d   : > { %v11913_v12 = vld [vmem:[#allocation2 + $0x48] sm:$0xff]   ;;  %10876 = vmatmul.mubr.bf16.gmra.mrb[52].mxu0 %v11911_v9 }
 0x21e   : > { %v11912_v63 = vld [vmem:[#allocation2 + $0x50] sm:$0xff]   ;;  %v6687_v57 = vshrl.u32 %v11913_v12, 16  ;;  %v6690_v46 = vshll.u32 %v11913_v12, 16  ;;  %10910 = vmatpush3.bf16.msra.mxu0 %v11943_v56  ;;  %v3349_v12 = vshrl.u32 %v14197_v40, 4  ;;  %11118 = vmatpush3.bf16.msra.mxu1 %v11949_v30  ;;  %vm3468_vm8 = vcmp.ne.s32.totalorder %v3340_v20, 0 }
 0x21f   : > { %v11914_v10 = vld [vmem:[#allocation2 + $0x50] sm:$0xff]   ;;  %10879 = vmatprep.mubr.bf16.mxu0 %v11912_v63  ;;  %11155 = vmatprep.subr.bf16.mxu1 %v11955_v6  ;;  %vm3504_vm12 = vcmp.lt.s32.totalorder %v3340_v20, 0  ;;  %v3576_v41 = vadd.s32 18, %v3340_v20 }
 0x220   : > { %v6689_v61 = vrot.slane %v6687_v57, 1  ;;  %v6692_v35 = vrot.slane %v6690_v46, 2  ;;  %v6696_v18 = vshrl.u32 %v11914_v10, 16  ;;  %v6699_v34 = vshll.u32 %v11914_v10, 16 }
 0x221   : > { %v4092_v57 = vrot.slane %v14074_v62, 4 }
 0x222   : > { %v6693_v11 = vor.u32 %v6692_v35, %v6689_v61  ;;  %v6698_v0 = vrot.slane %v6696_v18, 1  ;;  %v6701_v5 = vrot.slane %v6699_v34, 2 }
 0x223   : > { %v10829_v19 = vpop.f32.mrb[20].mxu0 }
 0x224   : > { %v2919_v16 = vadd.f32 %v14018_v24, %v10829_v19  ;;  %v2910_v47 = vpop.f32.mrb[21].mxu0  ;;  %v6694_v1 = vsel %vm15217_vm2, %v14032_v59, %v6693_v11  ;;  %v14221_v33 = vor.u32 %v6701_v5, %v6698_v0  ;;  %v3350_v0 = vmul.u32 18, %v3349_v12 }
 0x225   : > { %v2911_v32 = vadd.f32 %v14018_v24, %v2910_v47  ;;  %v10830_v51 = vpop.f32.mrb[22].mxu0  ;;  %11080 = vmatmul.mubr.bf16.gmra.mrb[8].mxu1 %v6694_v1 }
 0x226   : > { %v2995_v49 = vmax.f32 %v2919_v16, 0.0  ;;  %v2922_v29 = vadd.f32 %v14018_v24, %v10830_v51  ;;  %v2913_v58 = vpop.f32.mrb[23].mxu0  ;;  %v6703_v28 = vsel %vm15218_vm1, %v6693_v11, %v14221_v33  ;;  %v3328_v51 = vmul.u32 18, %v3327_v55 }
 0x227   : > { %v2993_v50 = vmax.f32 %v2911_v32, 0.0  ;;  %v2914_v43 = vadd.f32 %v14018_v24, %v2913_v58  ;;  %11083 = vmatprep.mubr.bf16.mxu1 %v6703_v28  ;;  %v14249_v32 = vsub.s32 %v14132_v52, %v3317_v7  ;;  %v14252_v1 = vsub.s32 %v14163_v26, %v3350_v0 }
 0x228   : > { %v3752_v59 = vsel %vm14145_vm0, %v2995_v49, 0.0  ;;  %v2996_v2 = vmax.f32 %v2922_v29, 0.0  ;;  %v14257_v49 = vadd.s32 240, %v13451_v3  ;;  %v3329_v29 = vsub.s32 %v14169_v25, %v3328_v51  ;;  %vm14263_vm0 = vmand %vm3504_vm12, %vm3468_vm8 }
 0x229   : > { %v10389_v4 = vpack.c.bf16 %v3752_v59, %v3752_v59  ;;  %v3750_v36 = vsel %vm14203_vm3, %v2993_v50, 0.0  ;;  %v2994_v48 = vmax.f32 %v2914_v43, 0.0  ;;  %vm3466_vm7 = vcmp.ne.s32.totalorder %v14249_v32, 0 }
 0x22a   : > { %v10387_v9 = vpack.c.bf16 %v3750_v36, %v3750_v36  ;;  %v3753_v53 = vsel %vm3645_vm5, %v2996_v2, 0.0  ;;  %vm3502_vm15 = vcmp.lt.s32.totalorder %v14249_v32, 0  ;;  %v3574_v52 = vadd.s32 18, %v14249_v32 }
 0x22b   : > { %v4114_v15 = vshrl.u32 %v10389_v4, 16  ;;  %v4117_v14 = vshll.u32 %v10389_v4, 16  ;;  %v10390_v56 = vpack.c.bf16 %v3753_v53, %v3753_v53  ;;  %v3751_v63 = vsel %vm3643_vm11, %v2994_v48, 0.0  ;;  %vm14279_vm6 = vmand %vm3502_vm15, %vm3466_vm7 }
 0x22c   : > { %v4094_v46 = vshrl.u32 %v10387_v9, 16  ;;  %v4097_v10 = vshll.u32 %v10387_v9, 16  ;;  %v10388_v60 = vpack.c.bf16 %v3751_v63, %v3751_v63  ;;  %vm3469_vm10 = vcmp.ne.s32.totalorder %v14252_v1, 0 }
 0x22d   : > { %v4116_v44 = vrot.slane %v4114_v15, 6  ;;  %v4119_v37 = vrot.slane %v4117_v14, 7  ;;  %v4124_v22 = vshrl.u32 %v10390_v56, 16  ;;  %v4127_v54 = vshll.u32 %v10390_v56, 16 }
 0x22e   : > { %v4096_v61 = vrot.slane %v4094_v46, 6  ;;  %v4099_v35 = vrot.slane %v4097_v10, 7  ;;  %v4104_v18 = vshrl.u32 %v10388_v60, 16  ;;  %v4107_v34 = vshll.u32 %v10388_v60, 16 }
 0x22f   : > { %v4120_v21 = vor.u32 %v4119_v37, %v4116_v44  ;;  %v4126_v40 = vrot.slane %v4124_v22, 6  ;;  %v4129_v31 = vrot.slane %v4127_v54, 7  ;;  %vm3505_vm13 = vcmp.lt.s32.totalorder %v14252_v1, 0 }
 0x230   : > { %v4100_v62 = vor.u32 %v4099_v35, %v4096_v61  ;;  %v4106_v13 = vrot.slane %v4104_v18, 6  ;;  %v4109_v19 = vrot.slane %v4107_v34, 7  ;;  %v3577_v58 = vadd.s32 18, %v14252_v1  ;;  %vm14292_vm2 = vmand %vm3505_vm13, %vm3469_vm10 }
 0x231   : > { %v4122_v45 = vrot.slane %v4120_v21, 4  ;;  %v14238_v11 = vor.u32 %v4129_v31, %v4126_v40  ;;  %v14271_v50 = vadd.s32 224, %v13451_v3  ;;  %vm3467_vm14 = vcmp.ne.s32.totalorder %v3329_v29, 0 }
 0x232   : > { %v4101_v5 = vsel %vm13594_vm4, %v4092_v57, %v4100_v62  ;;  %v4102_v16 = vrot.slane %v4100_v62, 4  ;;  %v4110_v47 = vor.u32 %v4109_v19, %v4106_v13  ;;  %v3612_v25 = vsel %vm14263_vm0, %v3576_v41, %v3340_v20 }
 0x233   : > { %4312 = vst [vmem:[#allocation2 + $0x58] sm:$0xf] %v4101_v5  ;;  %v4131_v39 = vsel %vm13594_vm4, %v4122_v45, %v14238_v11  ;;  %v14274_v43 = vmul.u32.u64.low 3817748708, %v14257_v49  ;;  %v14275_v28 = vmul.u32.u64.high 3817748708, %v14257_v49, %v14274_v43  ;;  %vm3503_vm3 = vcmp.lt.s32.totalorder %v3329_v29, 0 }
 0x234   : > { %4315 = vst [vmem:[#allocation2 + $0x64] sm:$0xf] %v4131_v39  ;;  %v4111_v27 = vsel %vm13594_vm4, %v4102_v16, %v4110_v47  ;;  %v4112_v30 = vrot.slane %v4110_v47, 4  ;;  %v14284_v4 = vmul.u32.u64.low 3817748708, %v14271_v50  ;;  %v14285_v36 = vmul.u32.u64.high 3817748708, %v14271_v50, %v14284_v4  ;;  %vm14301_vm1 = vmand %vm3503_vm3, %vm3467_vm14 }
 0x235   : > { %4313 = vst [vmem:[#allocation2 + $0x5c] sm:$0xf] %v4111_v27  ;;  %v14288_v7 = vadd.s32 248, %v13451_v3  ;;  %v3575_v53 = vadd.s32 18, %v3329_v29  ;;  %vm14296_vm5 = vcmp.lt.s32.totalorder %v3612_v25, 16  ;;  %v14306_v63 = vadd.s32 232, %v13451_v3 }
 0x236   : > { %v4121_v8 = vsel %vm13594_vm4, %v4112_v30, %v4120_v21  ;;  %v3610_v6 = vsel %vm14279_vm6, %v3574_v52, %v14249_v32  ;;  %v3613_v44 = vsel %vm14292_vm2, %v3577_v58, %v14252_v1  ;;  %v3382_v31 = vshrl.u32 %v14275_v28, 4 }
 0x237   : > { %4314 = vst [vmem:[#allocation2 + $0x60] sm:$0xf] %v4121_v8  ;;  %v14315_v37 = vmul.u32.u64.low 3817748708, %v14288_v7  ;;  %v14316_v22 = vmul.u32.u64.high 3817748708, %v14288_v7, %v14315_v37  ;;  %v3611_v61 = vsel %vm14301_vm1, %v3575_v53, %v3329_v29  ;;  %vm15229_vm11 = vsmask.f32 6400 }
 0x238   : > { %v14323_v62 = vmul.u32.u64.low 3817748708, %v14306_v63  ;;  %v14324_v13 = vmul.u32.u64.high 3817748708, %v14306_v63, %v14323_v62  ;;  %v3360_v16 = vshrl.u32 %v14285_v36, 4  ;;  %vm14332_vm8 = vcmp.lt.s32.totalorder %v3610_v6, 16  ;;  %vm15232_vm7 = vmmov %vm15229_vm11 }
 0x239   : > { %vm3649_vm12 = vcmp.lt.s32.totalorder %v3613_v44, 16  ;;  %vm3647_vm15 = vcmp.lt.s32.totalorder %v3611_v61, 16  ;;  %v3383_v8 = vmul.u32 18, %v3382_v31  ;;  %v4132_v37 = vrot.slane %v14238_v11, 4 }
 0x23a   : > { %v3361_v26 = vmul.u32 18, %v3360_v16  ;;  %v3371_v9 = vshrl.u32 %v14324_v13, 4  ;;  %v14373_v16 = vadd.s32 256, %v13451_v3 }
 0x23b   : > { %v3384_v31 = vsub.s32 %v14257_v49, %v3383_v8  ;;  %v14370_v49 = vadd.s32 272, %v13451_v3 }
 0x23c   : > { %v11915_v59 = vld [vmem:[#allocation2 + $0x58] sm:$0xff]   ;;  %v14362_v11 = vsub.s32 %v14271_v50, %v3361_v26 }
 0x23d   : > { %v11917_v38 = vld [vmem:[#allocation2 + $0x58] sm:$0xff]   ;;  %10880 = vmatmul.mubr.bf16.gmra.mrb[56].mxu0 %v11915_v59  ;;  %vm3472_vm0 = vcmp.ne.s32.totalorder %v3384_v31, 0  ;;  %vm3508_vm10 = vcmp.lt.s32.totalorder %v3384_v31, 0 }
 0x23e   : > { %v11916_v48 = vld [vmem:[#allocation2 + $0x60] sm:$0xff]   ;;  %v6705_v12 = vshrl.u32 %v11917_v38, 16  ;;  %v6708_v55 = vshll.u32 %v11917_v38, 16  ;;  %vm3470_vm13 = vcmp.ne.s32.totalorder %v14362_v11, 0  ;;  %vm3506_vm14 = vcmp.lt.s32.totalorder %v14362_v11, 0  ;;  %vm14386_vm2 = vmand %vm3508_vm10, %vm3472_vm0 }
 0x23f   : > { %v11918_v15 = vld [vmem:[#allocation2 + $0x60] sm:$0xff]   ;;  %10883 = vmatprep.mubr.bf16.mxu0 %v11916_v48  ;;  %vm14398_vm1 = vmand %vm3506_vm14, %vm3470_vm13 }
 0x240   : > { %v6707_v57 = vrot.slane %v6705_v12, 1  ;;  %v6710_v46 = vrot.slane %v6708_v55, 2  ;;  %v6714_v10 = vshrl.u32 %v11918_v15, 16  ;;  %v6717_v60 = vshll.u32 %v11918_v15, 16  ;;  %v14348_v38 = vld [vmem:[%s14993_s3 + $0x80] sm:$0xff]  }
 0x241   : > { %10947 = vmatprep.subr.bf16.mxu0 %v14348_v38 }
 0x242   : > { %v6711_v35 = vor.u32 %v6710_v46, %v6707_v57  ;;  %v6716_v18 = vrot.slane %v6714_v10, 1  ;;  %v6719_v34 = vrot.slane %v6717_v60, 2 }
 0x243   : > { %v10833_v54 = vpop.f32.mrb[24].mxu0 }
 0x244   : > { %v2935_v21 = vadd.f32 %v14018_v24, %v10833_v54  ;;  %v2926_v40 = vpop.f32.mrb[25].mxu0  ;;  %v6712_v0 = vsel %vm15229_vm11, %v14221_v33, %v6711_v35  ;;  %v14329_v5 = vor.u32 %v6719_v34, %v6716_v18 }
 0x245   : > { %v2927_v19 = vadd.f32 %v14018_v24, %v2926_v40  ;;  %v10834_v45 = vpop.f32.mrb[26].mxu0  ;;  %11084 = vmatmul.mubr.bf16.gmra.mrb[12].mxu1 %v6712_v0  ;;  %v3372_v0 = vmul.u32 18, %v3371_v9 }
 0x246   : > { %v2999_v47 = vmax.f32 %v2935_v21, 0.0  ;;  %v2938_v39 = vadd.f32 %v14018_v24, %v10834_v45  ;;  %v2929_v27 = vpop.f32.mrb[27].mxu0  ;;  %v6721_v33 = vsel %vm15232_vm7, %v6711_v35, %v14329_v5 }
 0x247   : > { %v2997_v30 = vmax.f32 %v2927_v19, 0.0  ;;  %v2930_v32 = vadd.f32 %v14018_v24, %v2929_v27  ;;  %11087 = vmatprep.mubr.bf16.mxu1 %v6721_v33  ;;  %v3393_v24 = vshrl.u32 %v14316_v22, 4  ;;  %v3373_v20 = vsub.s32 %v14306_v63, %v3372_v0 }
 0x248   : > { %v3756_v51 = vsel %vm14296_vm5, %v2999_v47, 0.0  ;;  %v3000_v1 = vmax.f32 %v2938_v39, 0.0  ;;  %v3580_v47 = vadd.s32 18, %v3384_v31  ;;  %v14384_v39 = vadd.s32 280, %v13451_v3 }
 0x249   : > { %v10393_v41 = vpack.c.bf16 %v3756_v51, %v3756_v51  ;;  %v3754_v52 = vsel %vm14332_vm8, %v2997_v30, 0.0  ;;  %v2998_v29 = vmax.f32 %v2930_v32, 0.0  ;;  %v3394_v44 = vmul.u32 18, %v3393_v24 }
 0x24a   : > { %v10391_v58 = vpack.c.bf16 %v3754_v52, %v3754_v52  ;;  %v3757_v43 = vsel %vm3649_vm12, %v3000_v1, 0.0  ;;  %v14391_v30 = vmul.u32.u64.low 3817748708, %v14370_v49  ;;  %v14392_v32 = vmul.u32.u64.high 3817748708, %v14370_v49, %v14391_v30 }
 0x24b   : > { %v4154_v28 = vshrl.u32 %v10393_v41, 16  ;;  %v4157_v59 = vshll.u32 %v10393_v41, 16  ;;  %v10394_v25 = vpack.c.bf16 %v3757_v43, %v3757_v43  ;;  %v3755_v2 = vsel %vm3647_vm15, %v2998_v29, 0.0 }
 0x24c   : > { %v4134_v4 = vshrl.u32 %v10391_v58, 16  ;;  %v4137_v36 = vshll.u32 %v10391_v58, 16  ;;  %v10392_v48 = vpack.c.bf16 %v3755_v2, %v3755_v2  ;;  %v14367_v45 = vsub.s32 %v14288_v7, %v3394_v44 }
 0x24d   : > { %v4156_v53 = vrot.slane %v4154_v28, 6  ;;  %v4159_v12 = vrot.slane %v4157_v59, 7  ;;  %v4164_v55 = vshrl.u32 %v10394_v25, 16  ;;  %v4167_v15 = vshll.u32 %v10394_v25, 16 }
 0x24e   : > { %v4136_v14 = vrot.slane %v4134_v4, 6  ;;  %v4139_v56 = vrot.slane %v4137_v36, 7  ;;  %v4144_v57 = vshrl.u32 %v10392_v48, 16  ;;  %v4147_v46 = vshll.u32 %v10392_v48, 16 }
 0x24f   : > { %v4160_v10 = vor.u32 %v4159_v12, %v4156_v53  ;;  %v4166_v60 = vrot.slane %v4164_v55, 6  ;;  %v4169_v6 = vrot.slane %v4167_v15, 7  ;;  %v3578_v7 = vadd.s32 18, %v14362_v11 }
 0x250   : > { %v4140_v22 = vor.u32 %v4139_v56, %v4136_v14  ;;  %v4146_v54 = vrot.slane %v4144_v57, 6  ;;  %v4149_v61 = vrot.slane %v4147_v46, 7  ;;  %vm3473_vm6 = vcmp.ne.s32.totalorder %v14367_v45, 0 }
 0x251   : > { %v4162_v35 = vrot.slane %v4160_v10, 4  ;;  %v14353_v18 = vor.u32 %v4169_v6, %v4166_v60  ;;  %vm3509_vm3 = vcmp.lt.s32.totalorder %v14367_v45, 0  ;;  %vm3471_vm5 = vcmp.ne.s32.totalorder %v3373_v20, 0 }
 0x252   : > { %v4141_v34 = vsel %vm13594_vm4, %v4132_v37, %v4140_v22  ;;  %v4142_v21 = vrot.slane %v4140_v22, 4  ;;  %v4150_v40 = vor.u32 %v4149_v61, %v4146_v54  ;;  %vm3507_vm11 = vcmp.lt.s32.totalorder %v3373_v20, 0  ;;  %vm14413_vm8 = vmand %vm3509_vm3, %vm3473_vm6 }
 0x253   : > { %4316 = vst [vmem:[#allocation2 + $0x68] sm:$0xf] %v4141_v34  ;;  %v4171_v62 = vsel %vm13594_vm4, %v4162_v35, %v14353_v18  ;;  %v14395_v33 = vmul.u32.u64.low 3817748708, %v14373_v16  ;;  %v14396_v51 = vmul.u32.u64.high 3817748708, %v14373_v16, %v14395_v33  ;;  %v3581_v26 = vadd.s32 18, %v14367_v45  ;;  %vm14418_vm12 = vmand %vm3507_vm11, %vm3471_vm5 }
 0x254   : > { %4319 = vst [vmem:[#allocation2 + $0x74] sm:$0xf] %v4171_v62  ;;  %v4151_v13 = vsel %vm13594_vm4, %v4142_v21, %v4150_v40  ;;  %v4152_v19 = vrot.slane %v4150_v40, 4  ;;  %v14403_v41 = vmul.u32.u64.low 3817748708, %v14384_v39  ;;  %v14404_v52 = vmul.u32.u64.high 3817748708, %v14384_v39, %v14403_v41 }
 0x255   : > { %4317 = vst [vmem:[#allocation2 + $0x6c] sm:$0xf] %v4151_v13  ;;  %v3616_v58 = vsel %vm14386_vm2, %v3580_v47, %v3384_v31  ;;  %v3579_v24 = vadd.s32 18, %v3373_v20  ;;  %v14423_v4 = vadd.s32 264, %v13451_v3  ;;  %v3614_v55 = vsel %vm14398_vm1, %v3578_v7, %v14362_v11 }
 0x256   : > { %v4161_v50 = vsel %vm13594_vm4, %v4152_v19, %v4160_v10  ;;  %vm14425_vm7 = vcmp.lt.s32.totalorder %v3616_v58, 16  ;;  %v3617_v15 = vsel %vm14413_vm8, %v3581_v26, %v14367_v45  ;;  %v14440_v10 = vld [vmem:[%s14992_s2] ss:$0 sm:$0xff]  ;;  %v3426_v44 = vshrl.u32 %v14392_v32, 4 }
 0x257   : > { %4318 = vst [vmem:[#allocation2 + $0x70] sm:$0xf] %v4161_v50  ;;  %v3615_v3 = vsel %vm14418_vm12, %v3579_v24, %v3373_v20  ;;  %v14445_v37 = vmul.u32.u64.low 3817748708, %v14423_v4  ;;  %v14446_v22 = vmul.u32.u64.high 3817748708, %v14423_v4, %v14445_v37  ;;  %vm15243_vm15 = vsmask.f32 6400 }
 0x258   : > { %v3404_v21 = vshrl.u32 %v14396_v51, 4  ;;  %vm14454_vm0 = vcmp.lt.s32.totalorder %v3614_v55, 16  ;;  %v3437_v13 = vshrl.u32 %v14404_v52, 4  ;;  %vm3653_vm10 = vcmp.lt.s32.totalorder %v3617_v15, 16  ;;  %vm15246_vm13 = vmmov %vm15243_vm15 }
 0x259   : > { %vm3651_vm14 = vcmp.lt.s32.totalorder %v3615_v3, 16  ;;  %v3427_v47 = vmul.u32 18, %v3426_v44  ;;  %v3415_v58 = vshrl.u32 %v14446_v22, 4  ;;  %v4172_v15 = vrot.slane %v14353_v18, 4 }
 0x25a   : > { %v3405_v30 = vmul.u32 18, %v3404_v21  ;;  %v3438_v51 = vmul.u32 18, %v3437_v13 }
 0x25b   : > { %v3428_v55 = vsub.s32 %v14370_v49, %v3427_v47 }
 0x25c   : > { %v11919_v1 = vld [vmem:[#allocation2 + $0x68] sm:$0xff]  }
 0x25d   : > { %v11921_v63 = vld [vmem:[#allocation2 + $0x68] sm:$0xff]   ;;  %10884 = vmatmul.mubr.bf16.gmra.mrb[60].mxu0 %v11919_v1  ;;  %vm3476_vm6 = vcmp.ne.s32.totalorder %v3428_v55, 0  ;;  %vm3512_vm3 = vcmp.lt.s32.totalorder %v3428_v55, 0  ;;  %v3584_v21 = vadd.s32 18, %v3428_v55 }
 0x25e   : > { %v11920_v29 = vld [vmem:[#allocation2 + $0x70] sm:$0xff]   ;;  %v6723_v28 = vshrl.u32 %v11921_v63, 16  ;;  %v6726_v59 = vshll.u32 %v11921_v63, 16  ;;  %vm14484_vm8 = vmand %vm3512_vm3, %vm3476_vm6 }
 0x25f   : > { %v11922_v25 = vld [vmem:[#allocation2 + $0x70] sm:$0xff]   ;;  %10887 = vmatprep.mubr.bf16.mxu0 %v11920_v29 }
 0x260   : > { %v6725_v36 = vrot.slane %v6723_v28, 1  ;;  %v6728_v48 = vrot.slane %v6726_v59, 2  ;;  %v6732_v9 = vshrl.u32 %v11922_v25, 16  ;;  %v6735_v53 = vshll.u32 %v11922_v25, 16 }
 0x262   : > { %v6729_v56 = vor.u32 %v6728_v48, %v6725_v36  ;;  %v6734_v57 = vrot.slane %v6732_v9, 1  ;;  %v6737_v46 = vrot.slane %v6735_v53, 2 }
 0x263   : > { %v10837_v14 = vpop.f32.mrb[28].mxu0 }
 0x264   : > { %v2951_v60 = vadd.f32 %v14440_v10, %v10837_v14  ;;  %v2942_v6 = vpop.f32.mrb[29].mxu0  ;;  %v6730_v35 = vsel %vm15243_vm15, %v14329_v5, %v6729_v56  ;;  %v14451_v34 = vor.u32 %v6737_v46, %v6734_v57 }
 0x265   : > { %v2943_v54 = vadd.f32 %v14440_v10, %v2942_v6  ;;  %v10838_v61 = vpop.f32.mrb[30].mxu0  ;;  %11088 = vmatmul.mubr.bf16.gmra.mrb[16].mxu1 %v6730_v35  ;;  %v3416_v6 = vmul.u32 18, %v3415_v58 }
 0x266   : > { %v3003_v40 = vmax.f32 %v2951_v60, 0.0  ;;  %v2954_v62 = vadd.f32 %v14440_v10, %v10838_v61  ;;  %v2945_v11 = vpop.f32.mrb[31].mxu0  ;;  %v6739_v5 = vsel %vm15246_vm13, %v6729_v56, %v14451_v34  ;;  %v3406_v60 = vsub.s32 %v14373_v16, %v3405_v30 }
 0x267   : > { %v3001_v19 = vmax.f32 %v2943_v54, 0.0  ;;  %v2946_v45 = vadd.f32 %v14440_v10, %v2945_v11  ;;  %11091 = vmatprep.mubr.bf16.mxu1 %v6739_v5  ;;  %v3439_v54 = vsub.s32 %v14384_v39, %v3438_v51  ;;  %v3417_v16 = vsub.s32 %v14423_v4, %v3416_v6 }
 0x268   : > { %v3760_v0 = vsel %vm14425_vm7, %v3003_v40, 0.0  ;;  %v3004_v50 = vmax.f32 %v2954_v62, 0.0  ;;  %vm3474_vm2 = vcmp.ne.s32.totalorder %v3406_v60, 0  ;;  %vm3510_vm5 = vcmp.lt.s32.totalorder %v3406_v60, 0 }
 0x269   : > { %v10397_v7 = vpack.c.bf16 %v3760_v0, %v3760_v0  ;;  %v3758_v20 = vsel %vm14454_vm0, %v3001_v19, 0.0  ;;  %v3002_v27 = vmax.f32 %v2946_v45, 0.0  ;;  %vm3477_vm1 = vcmp.ne.s32.totalorder %v3439_v54, 0  ;;  %vm14488_vm12 = vmand %vm3510_vm5, %vm3474_vm2 }
 0x26a   : > { %v10395_v32 = vpack.c.bf16 %v3758_v20, %v3758_v20  ;;  %v3761_v33 = vsel %vm3653_vm10, %v3004_v50, 0.0  ;;  %vm3513_vm11 = vcmp.lt.s32.totalorder %v3439_v54, 0  ;;  %v3582_v31 = vadd.s32 18, %v3406_v60 }
 0x26b   : > { %v4194_v1 = vshrl.u32 %v10397_v7, 16  ;;  %v4197_v8 = vshll.u32 %v10397_v7, 16  ;;  %v10398_v63 = vpack.c.bf16 %v3761_v33, %v3761_v33  ;;  %v3759_v41 = vsel %vm3651_vm14, %v3002_v27, 0.0  ;;  %vm14492_vm7 = vmand %vm3513_vm11, %vm3477_vm1 }
 0x26c   : > { %v4174_v52 = vshrl.u32 %v10395_v32, 16  ;;  %v4177_v29 = vshll.u32 %v10395_v32, 16  ;;  %v10396_v26 = vpack.c.bf16 %v3759_v41, %v3759_v41  ;;  %v3585_v4 = vadd.s32 18, %v3439_v54 }
 0x26d   : > { %v4196_v43 = vrot.slane %v4194_v1, 6  ;;  %v4199_v24 = vrot.slane %v4197_v8, 7  ;;  %v4204_v28 = vshrl.u32 %v10398_v63, 16  ;;  %v4207_v59 = vshll.u32 %v10398_v63, 16 }
 0x26e   : > { %v4176_v25 = vrot.slane %v4174_v52, 6  ;;  %v4179_v2 = vrot.slane %v4177_v29, 7  ;;  %v4184_v36 = vshrl.u32 %v10396_v26, 16  ;;  %v4187_v48 = vshll.u32 %v10396_v26, 16 }
 0x26f   : > { %v4200_v9 = vor.u32 %v4199_v24, %v4196_v43  ;;  %v4206_v53 = vrot.slane %v4204_v28, 6  ;;  %v4209_v12 = vrot.slane %v4207_v59, 7  ;;  %vm3475_vm15 = vcmp.ne.s32.totalorder %v3417_v16, 0 }
 0x270   : > { %v4180_v14 = vor.u32 %v4179_v2, %v4176_v25  ;;  %v4186_v3 = vrot.slane %v4184_v36, 6  ;;  %v4189_v56 = vrot.slane %v4187_v48, 7  ;;  %vm3511_vm0 = vcmp.lt.s32.totalorder %v3417_v16, 0 }
 0x271   : > { %v4202_v57 = vrot.slane %v4200_v9, 4  ;;  %v14470_v46 = vor.u32 %v4209_v12, %v4206_v53  ;;  %v3583_v13 = vadd.s32 18, %v3417_v16  ;;  %v3620_v19 = vsel %vm14484_vm8, %v3584_v21, %v3428_v55  ;;  %vm14498_vm10 = vmand %vm3511_vm0, %vm3475_vm15 }
 0x272   : > { %v4181_v44 = vsel %vm13594_vm4, %v4172_v15, %v4180_v14  ;;  %v4182_v37 = vrot.slane %v4180_v14, 4  ;;  %v4190_v22 = vor.u32 %v4189_v56, %v4186_v3  ;;  %v3618_v50 = vsel %vm14488_vm12, %v3582_v31, %v3406_v60 }
 0x273   : > { %4320 = vst [vmem:[#allocation2 + $0x78] sm:$0xf] %v4181_v44  ;;  %v4211_v18 = vsel %vm13594_vm4, %v4202_v57, %v14470_v46  ;;  %v3621_v47 = vsel %vm14492_vm7, %v3585_v4, %v3439_v54  ;;  %vm14506_vm13 = vcmp.lt.s32.totalorder %v3620_v19, 16  ;;  %v3619_v33 = vsel %vm14498_vm10, %v3583_v13, %v3417_v16 }
 0x274   : > { %4323 = vst [vmem:[#allocation2 + $0x84] sm:$0xf] %v4211_v18  ;;  %v4191_v49 = vsel %vm13594_vm4, %v4182_v37, %v4190_v22  ;;  %v4192_v61 = vrot.slane %v4190_v22, 4  ;;  %vm14514_vm14 = vcmp.lt.s32.totalorder %v3618_v50, 16  ;;  %vm14518_vm6 = vcmp.lt.s32.totalorder %v3621_v47, 16 }
 0x275   : > { %4321 = vst [vmem:[#allocation2 + $0x7c] sm:$0xf] %v4191_v49  ;;  %vm3655_vm3 = vcmp.lt.s32.totalorder %v3619_v33, 16  ;;  %vm15261_vm2 = vsmask.f32 6400  ;;  %v11941_v49 = vld [vmem:[#allocation2] sm:$0xff]  }
 0x276   : > { %v4201_v39 = vsel %vm13594_vm4, %v4192_v61, %v4200_v9  ;;  %vm15262_vm5 = vmmov %vm15261_vm2  ;;  %v4212_v4 = vrot.slane %v14470_v46, 4  ;;  %v4902_v33 = vshll.u32 %v11941_v49, 16  ;;  %vm15270_vm15 = vcmask 1045504  }
 0x277   : > { %4322 = vst [vmem:[#allocation2 + $0x80] sm:$0xf] %v4201_v39  ;;  %vm15267_vm8 = vmmov %vm15261_vm2 }
 0x278   : > { %v4904_v58 = vrot.slane %v4902_v33, 1  ;;  %v11959_v33 = vld [vmem:[#allocation2 + $0x38] sm:$0xff]   ;;  %vm15268_vm12 = vmmov %vm15261_vm2 }
 0x279   : > { %vm15272_vm10 = vmmov %vm15270_vm15 }
 0x27c   : > { %v11925_v11 = vld [vmem:[#allocation2 + $0x78] sm:$0xff]  }
 0x27d   : > { %v11929_v5 = vld [vmem:[#allocation2 + $0x78] sm:$0xff]   ;;  %10888 = vmatmul.mubr.bf16.gmra.mrb[64].mxu0 %v11925_v11 }
 0x27e   : > { %v11926_v0 = vld [vmem:[#allocation2 + $0x80] sm:$0xff]   ;;  %v6741_v7 = vshrl.u32 %v11929_v5, 16  ;;  %v6744_v20 = vshll.u32 %v11929_v5, 16 }
 0x27f   : > { %v11931_v27 = vld [vmem:[#allocation2 + $0x80] sm:$0xff]   ;;  %10891 = vmatprep.mubr.bf16.mxu0 %v11926_v0 }
 0x280   : > { %v10841_v30 = vpop.f32.mrb[32].mxu0  ;;  %v6743_v8 = vrot.slane %v6741_v7, 1  ;;  %v6746_v63 = vrot.slane %v6744_v20, 2  ;;  %v6750_v41 = vshrl.u32 %v11931_v27, 16  ;;  %v6753_v43 = vshll.u32 %v11931_v27, 16  ;;  %v11942_v20 = vld [vmem:[#allocation2 + $0x8] sm:$0xff]  }
 0x281   : > { %v2967_v51 = vadd.f32 %v14440_v10, %v10841_v30  ;;  %v2958_v1 = vpop.f32.mrb[33].mxu0  ;;  %v4328_v7 = vld [vmem:[#allocation2 + $0x98] sm:$0x3] }
 0x282   : > { %v2959_v52 = vadd.f32 %v14440_v10, %v2958_v1  ;;  %v10842_v26 = vpop.f32.mrb[34].mxu0  ;;  %v6747_v25 = vor.u32 %v6746_v63, %v6743_v8  ;;  %v6752_v2 = vrot.slane %v6750_v41, 1  ;;  %v6755_v9 = vrot.slane %v6753_v43, 2 }
 0x283   : > { %v3007_v24 = vmax.f32 %v2967_v51, 0.0  ;;  %v2970_v28 = vadd.f32 %v14440_v10, %v10842_v26  ;;  %v2961_v59 = vpop.f32.mrb[35].mxu0  ;;  %v4907_v41 = vshll.u32 %v11942_v20, 16  ;;  %v4900_v26 = vshrl.u32 %v11941_v49, 16 }
 0x284   : > { %v3005_v36 = vmax.f32 %v2959_v52, 0.0  ;;  %v2962_v48 = vadd.f32 %v14440_v10, %v2961_v59  ;;  %v6748_v55 = vsel %vm15261_vm2, %v14451_v34, %v6747_v25  ;;  %v14530_v56 = vor.u32 %v6755_v9, %v6752_v2  ;;  %v11946_v52 = vld [vmem:[#allocation2 + $0x10] sm:$0xff]  }
 0x285   : > { %v3764_v53 = vsel %vm14506_vm13, %v3007_v24, 0.0  ;;  %v3008_v12 = vmax.f32 %v2970_v28, 0.0  ;;  %11092 = vmatmul.mubr.bf16.gmra.mrb[20].mxu1 %v6748_v55  ;;  %v4909_v43 = vrot.slane %v4907_v41, 1  ;;  %v4915_v24 = vshll.u32 %v11946_v52, 16  ;;  %v11947_v28 = vld [vmem:[#allocation2 + $0x18] sm:$0xff]  }
 0x286   : > { %v10401_v15 = vpack.c.bf16 %v3764_v53, %v3764_v53  ;;  %v3762_v14 = vsel %vm14514_vm14, %v3005_v36, 0.0  ;;  %v3006_v3 = vmax.f32 %v2962_v48, 0.0  ;;  %v6757_v34 = vsel %vm15262_vm5, %v6747_v25, %v14530_v56  ;;  %vm15274_vm14 = vmmov %vm15272_vm10 }
 0x287   : > { %v10399_v57 = vpack.c.bf16 %v3762_v14, %v3762_v14  ;;  %v3765_v10 = vsel %vm14518_vm6, %v3008_v12, 0.0  ;;  %11095 = vmatprep.mubr.bf16.mxu1 %v6757_v34  ;;  %v4905_v59 = vor.u32 %v4904_v58, %v4900_v26  ;;  %v4911_v2 = vshrl.u32 %v11942_v20, 16  ;;  %v11954_v34 = vld [vmem:[#allocation2 + $0x28] sm:$0xff]   ;;  %v11956_v20 = vld [vmem:[#allocation2 + $0x18] sm:$0xff]  }
 0x288   : > { %v4234_v60 = vshrl.u32 %v10401_v15, 16  ;;  %v4237_v6 = vshll.u32 %v10401_v15, 16  ;;  %v10402_v44 = vpack.c.bf16 %v3765_v10, %v3765_v10  ;;  %v3763_v37 = vsel %vm3655_vm3, %v3006_v3, 0.0  ;;  %v11951_v15 = vld [vmem:[#allocation2 + $0x20] sm:$0xff]   ;;  %vm15276_vm3 = vmmov %vm15272_vm10 }
 0x289   : > { %v4214_v22 = vshrl.u32 %v10399_v57, 16  ;;  %v4217_v54 = vshll.u32 %v10399_v57, 16  ;;  %v10400_v18 = vpack.c.bf16 %v3763_v37, %v3763_v37  ;;  %v4923_v9 = vshll.u32 %v11947_v28, 16  ;;  %vm15278_vm5 = vmmov %vm15276_vm3 }
 0x28a   : > { %v4236_v61 = vrot.slane %v4234_v60, 6  ;;  %v4239_v16 = vrot.slane %v4237_v6, 7  ;;  %v4244_v39 = vshrl.u32 %v10402_v44, 16  ;;  %v4247_v35 = vshll.u32 %v10402_v44, 16 }
 0x28b   : > { %v4216_v21 = vrot.slane %v4214_v22, 6  ;;  %v4219_v40 = vrot.slane %v4217_v54, 7  ;;  %v4224_v31 = vshrl.u32 %v10400_v18, 16  ;;  %v4227_v62 = vshll.u32 %v10400_v18, 16 }
 0x28c   : > { %v4240_v11 = vor.u32 %v4239_v16, %v4236_v61  ;;  %v4246_v13 = vrot.slane %v4244_v39, 6  ;;  %v4249_v19 = vrot.slane %v4247_v35, 7  ;;  %v4917_v55 = vrot.slane %v4915_v24, 1  ;;  %v11953_v35 = vld [vmem:[#allocation2 + $0x10] sm:$0xff]   ;;  %v11962_v24 = vld [vmem:[#allocation2 + $0x40] sm:$0xff]  }
 0x28d   : > { %v4220_v45 = vor.u32 %v4219_v40, %v4216_v21  ;;  %v4226_v5 = vrot.slane %v4224_v31, 6  ;;  %v4229_v0 = vrot.slane %v4227_v62, 7  ;;  %v4913_v14 = vor.u32 %v4911_v2, %v4909_v43  ;;  %v11976_v21 = vld [vmem:[%s14993_s3 + $0x88] sm:$0xff]  }
 0x28e   : > { %v4242_v50 = vrot.slane %v4240_v11, 4  ;;  %v4250_v47 = vor.u32 %v4249_v19, %v4246_v13  ;;  %v4919_v37 = vshrl.u32 %v11946_v52, 16  ;;  %v4925_v22 = vrot.slane %v4923_v9, 1  ;;  %v11961_v9 = vld [vmem:[%s14993_s3 + $0x188] sm:$0xff]  }
 0x28f   : > { %v4221_v27 = vsel %vm13594_vm4, %v4212_v4, %v4220_v45  ;;  %v4222_v30 = vrot.slane %v4220_v45, 4  ;;  %v4230_v32 = vor.u32 %v4229_v0, %v4226_v5  ;;  %v4931_v39 = vshll.u32 %v11951_v15, 16  ;;  %v11952_v5 = vld [vmem:[#allocation2 + $0x8] sm:$0xfc]  }
 0x290   : > { %4324 = vst [vmem:[#allocation2 + $0x88] sm:$0xf] %v4221_v27  ;;  %v4251_v46 = vsel %vm13594_vm4, %v4242_v50, %v4250_v47  ;;  %v4252_v51 = vrot.slane %v4250_v47, 4  ;;  %v4921_v61 = vor.u32 %v4919_v37, %v4917_v55  ;;  %v4939_v19 = vshll.u32 %v11954_v34, 16  ;;  %v11957_v50 = vld [vmem:[#allocation2 + $0x30] sm:$0xff]  }
 0x291   : > { %4327 = vst [vmem:[#allocation2 + $0x94] sm:$0xf] %v4251_v46  ;;  %v4231_v1 = vsel %vm13594_vm4, %v4222_v30, %v4230_v32  ;;  %v4232_v8 = vrot.slane %v4230_v32, 4  ;;  %v4927_v45 = vshrl.u32 %v11947_v28, 16  ;;  %v4933_v0 = vrot.slane %v4931_v39, 1  ;;  %v11979_v27 = vld [vmem:[%s14993_s3 + $0x90] sm:$0xff]  }
 0x292   : > { %v4329_v63 = vsel %vm12537_vm9, %v4252_v51, %v4328_v7  ;;  %4325 = vst [vmem:[#allocation2 + $0x8c] sm:$0xf] %v4231_v1  ;;  %vm15263_vm9 = vsmask.f32 7424  ;;  %v7284_v7 = vrot.slane %v11953_v35, 2  ;;  %v4935_v30 = vshrl.u32 %v11951_v15, 16 }
 0x293   : > { %4330 = vst [vmem:[#allocation2 + $0x98] sm:$0x3] %v4329_v63  ;;  %v4241_v29 = vsel %vm13594_vm4, %v4232_v8, %v4240_v11  ;;  %v4910_v42 = vsel %vm15263_vm9, %v4905_v59, %v4909_v43  ;;  %vm15264_vm4 = vmmov %vm15261_vm2  ;;  %v4929_v47 = vor.u32 %v4927_v45, %v4925_v22  ;;  %v4941_v32 = vrot.slane %v4939_v19, 1  ;;  %v11983_v63 = vld [vmem:[%s14993_s3 + $0x98] sm:$0xff]   ;;  %v11986_v59 = vld [vmem:[%s14993_s3 + $0xa0] sm:$0xff]  }
 0x294   : > { %4326 = vst [vmem:[#allocation2 + $0x90] sm:$0xf] %v4241_v29  ;;  %vm15265_vm1 = vmmov %vm15263_vm9  ;;  %v7283_v46 = vrot.slane %v11952_v5, 2  ;;  %v4937_v51 = vor.u32 %v4935_v30, %v4933_v0  ;;  %v4947_v1 = vshll.u32 %v11957_v50, 16  ;;  %v11958_v29 = vld [vmem:[#allocation2 + $0x20] sm:$0xff]   ;;  %v7286_v26 = vrot.slane %v11956_v20, 2 }
 0x295   : > { %v4918_v31 = vsel %vm15265_vm1, %v4913_v14, %v4917_v55  ;;  %vm15266_vm11 = vmmov %vm15265_vm1  ;;  %v4943_v58 = vshrl.u32 %v11954_v34, 16  ;;  %v4955_v43 = vshll.u32 %v11959_v33, 16  ;;  %v7288_v2 = vrot.slane %v11958_v29, 2  ;;  %v11960_v15 = vld [vmem:[#allocation2 + $0x28] sm:$0xff]   ;;  %v11969_v39 = vld [vmem:[#allocation2 + $0x58] sm:$0xff]  }
 0x296   : > { %v4926_v11 = vsel %vm15266_vm11, %v4921_v61, %v4925_v22  ;;  %vm15269_vm7 = vmmov %vm15265_vm1  ;;  %v7285_v41 = vsel %vm15270_vm15, %v7283_v46, %v7284_v7  ;;  %v4949_v28 = vrot.slane %v4947_v1, 1  ;;  %v11966_v22 = vld [vmem:[#allocation2 + $0x50] sm:$0xff]   ;;  %v4967_v61 = vshrl.u32 %v11962_v24, 16  ;;  %v11967_v45 = vld [vmem:[#allocation2 + $0x40] sm:$0xff]  }
 0x297   : > { %vm15271_vm0 = vmmov %vm15265_vm1  ;;  %v7289_v14 = vsel %vm15274_vm14, %v7286_v26, %v7288_v2  ;;  %v4987_v5 = vshll.u32 %v11969_v39, 16  ;;  %v7296_v30 = vrot.slane %v11967_v45, 2  ;;  %v11974_v46 = vld [vmem:[#allocation2 + $0x68] sm:$0xff]  }
 0x298   : > { %v4942_v52 = vsel %vm15271_vm0, %v4937_v51, %v4941_v32  ;;  %vm15273_vm13 = vmmov %vm15271_vm0 }
 0x299   : > { %v11939_v25 = vld [vmem:[#allocation2 + $0x88] sm:$0xff]   ;;  %vm15275_vm6 = vmmov %vm15271_vm0 }
 0x29a   : > { %v11945_v36 = vld [vmem:[#allocation2 + $0x88] sm:$0xff]   ;;  %v11950_v48 = vld [vmem:[#allocation2 + $0x98] ss:$0 sps:$4 sm:$0x33]   ;;  %10892 = vmatmul.mubr.bf16.gmra.mrb[68].mxu0 %v11939_v25  ;;  %v4945_v25 = vor.u32 %v4943_v58, %v4941_v32  ;;  %vm15277_vm2 = vmmov %vm15271_vm0  ;;  %v4983_v32 = vshrl.u32 %v11966_v22, 16 }
 0x29b   : > { %v11948_v53 = vld [vmem:[#allocation2 + $0x90] sm:$0xff]   ;;  %10911 = vmatprep.mubr.bf16.mxu0 %v4910_v42  ;;  %v6759_v12 = vshrl.u32 %v11945_v36, 16  ;;  %v6762_v23 = vshll.u32 %v11945_v36, 16  ;;  %v6777_v6 = vshrl.u32 %v11950_v48, 16  ;;  %v6780_v44 = vshll.u32 %v11950_v48, 16  ;;  %v11964_v36 = vld [vmem:[#allocation2 + $0x48] sm:$0xff]   ;;  %vm15279_vm9 = vmmov %vm15271_vm0 }
 0x29c   : > { %v6768_v3 = vshrl.u32 %v11948_v53, 16  ;;  %v6771_v57 = vshll.u32 %v11948_v53, 16  ;;  %v4951_v48 = vshrl.u32 %v11957_v50, 16  ;;  %v4957_v42 = vrot.slane %v4955_v43, 1  ;;  %vm15281_vm1 = vmmov %vm15271_vm0  ;;  %v11973_v58 = vld [vmem:[#allocation2 + $0x50] sm:$0xff]  }
 0x29d   : > { %v6761_v10 = vrot.slane %v6759_v12, 1  ;;  %v6764_v60 = vrot.slane %v6762_v23, 2  ;;  %v6779_v62 = vrot.slane %v6777_v6, 1  ;;  %v6782_v4 = vrot.slane %v6780_v44, 2  ;;  %vm15282_vm11 = vmmov %vm15276_vm3 }
 0x29e   : > { %v6770_v54 = vrot.slane %v6768_v3, 1  ;;  %v6773_v18 = vrot.slane %v6771_v57, 2  ;;  %v4963_v53 = vshll.u32 %v11962_v24, 16  ;;  %v7287_v12 = vsel %vm15272_vm10, %v7284_v7, %v7286_v26  ;;  %v11963_v3 = vld [vmem:[#allocation2 + $0x30] sm:$0xff]   ;;  %vm15286_vm15 = vmmov %vm15276_vm3 }
 0x29f   : > { %v6765_v49 = vor.u32 %v6764_v60, %v6761_v10  ;;  %v4950_v23 = vsel %vm15273_vm13, %v4945_v25, %v4949_v28  ;;  %v4953_v55 = vor.u32 %v4951_v48, %v4949_v28  ;;  %v4971_v57 = vshll.u32 %v11964_v36, 16  ;;  %v11990_v10 = vld [vmem:[%s14993_s3 + $0xa8] sm:$0xff]   ;;  %v12124_v60 = vld [vmem:[%s14993_s3 + $0x180] sm:$0xff]   ;;  %vm15287_vm10 = vmmov %vm15276_vm3 }
 0x2a0   : > { %v6774_v16 = vor.u32 %v6773_v18, %v6770_v54  ;;  %v4959_v44 = vshrl.u32 %v11959_v33, 16  ;;  %v4965_v37 = vrot.slane %v4963_v53, 1  ;;  %v11968_v54 = vld [vmem:[%s14993_s3 + $0x190] sm:$0xff]   ;;  %v7290_v18 = vrot.slane %v11960_v15, 2  ;;  %v11981_v53 = vld [vmem:[#allocation2 + $0x78] sm:$0xff]   ;;  %vm15288_vm13 = vmmov %vm15271_vm0 }
 0x2a1   : > { %v6766_v40 = vsel %vm15264_vm4, %v14530_v56, %v6765_v49  ;;  %v6783_v56 = vor.u32 %v6782_v4, %v6779_v62  ;;  %v4958_v6 = vsel %vm15275_vm6, %v4953_v55, %v4957_v42  ;;  %v11965_v4 = vld [vmem:[#allocation2 + $0x38] sm:$0xff]   ;;  %v4975_v50 = vshrl.u32 %v11964_v36, 16  ;;  %vm15280_vm4 = vmmov %vm15276_vm3  ;;  %v11998_v36 = vld [vmem:[%s14993_s3 + $0x1b0] sm:$0xff]  }
 0x2a2   : > { %11096 = vmatmul.mubr.bf16.gmra.mrb[24].mxu1 %v6766_v40  ;;  %10912 = vmatmul.mubr.bf16.vlgmr.msra.gmra.mrb[36].mxu0 %v4918_v31  ;;  %v6775_v13 = vsel %vm15267_vm8, %v6765_v49, %v6774_v16  ;;  %v4961_v34 = vor.u32 %v4959_v44, %v4957_v42  ;;  %v7292_v49 = vrot.slane %v11963_v3, 2  ;;  %v4969_v35 = vor.u32 %v4967_v61, %v4965_v37  ;;  %v11993_v40 = vld [vmem:[%s14993_s3 + $0xb0] sm:$0xff]   ;;  %vm15283_vm8 = vmmov %vm15271_vm0  ;;  %v12003_v3 = vld [vmem:[%s14993_s3 + $0x1b8] sm:$0xff]  }
 0x2a3   : > { %10915 = vmatprep.mubr.bf16.mxu0 %v4926_v11  ;;  %11099 = vmatprep.mubr.bf16.mxu1 %v6775_v13  ;;  %v6784_v8 = vsel %vm15268_vm12, %v6774_v16, %v6783_v56  ;;  %v4973_v16 = vrot.slane %v4971_v57, 1  ;;  %v7291_v31 = vsel %vm15276_vm3, %v7288_v2, %v7290_v18  ;;  %v11975_v11 = vld [vmem:[%s14993_s3 + $0x198] sm:$0xff]   ;;  %v7294_v7 = vrot.slane %v11965_v4, 2  ;;  %vm15284_vm12 = vmmov %vm15276_vm3 }
 0x2a4   : > { %10948 = vmatpush3.bf16.msra.mxu0 %v14348_v38  ;;  %v4934_v38 = vsel %vm15269_vm7, %v4929_v47, %v4933_v0  ;;  %v4966_v62 = vsel %vm15277_vm2, %v4961_v34, %v4965_v37  ;;  %v7293_v13 = vsel %vm15278_vm5, %v7290_v18, %v7292_v49  ;;  %v11997_v0 = vld [vmem:[%s14993_s3 + $0xb8] sm:$0xff]   ;;  %v11971_v47 = vld [vmem:[#allocation2 + $0x60] sm:$0xff]   ;;  %v4989_v33 = vrot.slane %v4987_v5, 1  ;;  %vm15285_vm7 = vmmov %vm15271_vm0 }
 0x2a5   : > { %10949 = vmatprep.subr.bf16.mxu0 %v11976_v21  ;;  %v4974_v19 = vsel %vm15279_vm9, %v4969_v35, %v4973_v16  ;;  %v4977_v20 = vor.u32 %v4975_v50, %v4973_v16  ;;  %v4995_v1 = vshll.u32 %v11971_v47, 16  ;;  %v7297_v29 = vsel %vm15282_vm11, %v7294_v7, %v7296_v30  ;;  %v14628_v34 = vld [vmem:[%s14993_s3 + $0x1c0] sm:$0xff]   ;;  %vm15289_vm14 = vmmov %vm15276_vm3 }
 0x2a6   : > { %v5003_v43 = vshll.u32 %v11974_v46, 16  ;;  %v4991_v24 = vshrl.u32 %v11969_v39, 16  ;;  %v7300_v48 = vrot.slane %v11973_v58, 2  ;;  %v4999_v42 = vshrl.u32 %v11971_v47, 16  ;;  %v11988_v39 = vld [vmem:[#allocation2 + $0x88] sm:$0xff]   ;;  %vm15290_vm6 = vmmov %vm15271_vm0 }
 0x2a7   : > { %v4997_v28 = vrot.slane %v4995_v1, 1  ;;  %v5007_v44 = vshrl.u32 %v11974_v46, 16  ;;  %v5023_v45 = vshrl.u32 %v11981_v53, 16  ;;  %vm15291_vm2 = vmmov %vm15271_vm0 }
 0x2a8   : > { %10950 = vmatpush3.bf16.msra.mxu0 %v11976_v21  ;;  %v4979_v21 = vshll.u32 %v11966_v22, 16  ;;  %v4993_v2 = vor.u32 %v4991_v24, %v4989_v33  ;;  %v11985_v22 = vld [vmem:[#allocation2 + $0x80] sm:$0xff]   ;;  %vm15292_vm5 = vmmov %vm15276_vm3 }
 0x2a9   : > { %10951 = vmatprep.subr.bf16.mxu0 %v11979_v27  ;;  %vm15293_vm9 = vmmov %vm15271_vm0 }
 0x2aa   : > { %11100 = vmatmul.mubr.bf16.gmra.mrb[28].mxu1 %v6784_v8  ;;  %10916 = vmatmul.mubr.bf16.gmra.mrb[40].mxu0 %v4934_v38  ;;  %v4981_v56 = vrot.slane %v4979_v21, 1  ;;  %v14605_v8 = vld [vmem:[%s14993_s3 + $0xc0] sm:$0xff]   ;;  %v7295_v38 = vsel %vm15280_vm4, %v7292_v49, %v7294_v7  ;;  %v4998_v15 = vsel %vm15285_vm7, %v4993_v2, %v4997_v28  ;;  %v5027_v21 = vshll.u32 %v11985_v22, 16  ;;  %vm15294_vm4 = vmmov %vm15276_vm3  ;;  %v11999_v2 = vld [vmem:[#allocation2 + $0x88] sm:$0xff]  }
 0x2ab   : > { %11119 = vmatprep.mubr.bf16.mxu1 %v7285_v41  ;;  %10919 = vmatprep.mubr.bf16.mxu0 %v4942_v52  ;;  %v11970_v41 = vld [vmem:[#allocation2 + $0x48] sm:$0xff]   ;;  %v5031_v7 = vshrl.u32 %v11985_v22, 16  ;;  %vm15296_vm11 = vmmov %vm15276_vm3 }
 0x2ac   : > { %10952 = vmatpush3.bf16.msra.mxu0 %v11979_v27  ;;  %v11982_v27 = vld [vmem:[%s14993_s3 + $0x1a0] sm:$0xff]   ;;  %v4985_v51 = vor.u32 %v4983_v32, %v4981_v56  ;;  %v11989_v52 = vld [vmem:[%s14993_s3 + $0x1a8] sm:$0xff]   ;;  %v7298_v25 = vrot.slane %v11970_v41, 2  ;;  %v5029_v5 = vrot.slane %v5027_v21, 1 }
 0x2ad   : > { %10953 = vmatprep.subr.bf16.mxu0 %v11983_v63  ;;  %v11996_v41 = vld [vmem:[#allocation2 + $0x8] sm:$0xff]  }
 0x2ae   : > { %v4990_v26 = vsel %vm15283_vm8, %v4985_v51, %v4989_v33  ;;  %v7299_v55 = vsel %vm15284_vm12, %v7296_v30, %v7298_v25  ;;  %v7301_v57 = vsel %vm15286_vm15, %v7298_v25, %v7300_v48  ;;  %v11991_v33 = vld [vmem:[#allocation2 + $0x78] sm:$0xff]   ;;  %vm15297_vm8 = vcmask 1046528   ;;  %vm15298_vm12 = vmmov %vm15276_vm3  ;;  %v12008_v22 = vld [vmem:[#allocation2 + $0x28] sm:$0xff]  }
 0x2af   : > { %vm15299_vm7 = vmmov %vm15297_vm8 }
 0x2b0   : > { %10954 = vmatpush3.bf16.msra.mxu0 %v11983_v63  ;;  %v4982_v63 = vsel %vm15281_vm1, %v4977_v20, %v4981_v56  ;;  %v11992_v56 = vld [vmem:[#allocation2 + $0x90] ss:$0 sps:$4 sm:$0x11]   ;;  %vm15295_vm1 = vmmov %vm15271_vm0 }
 0x2b1   : > { %10955 = vmatprep.subr.bf16.mxu0 %v11986_v59  ;;  %v5043_v46 = vshll.u32 %v11992_v56, 16  ;;  %vm15300_vm15 = vmmov %vm15276_vm3 }
 0x2b2   : > { %11120 = vmatmul.mubr.bf16.vlgmr.msra.gmra.mrb[32].mxu1 %v7287_v12  ;;  %10920 = vmatmul.mubr.bf16.gmra.mrb[44].mxu0 %v4950_v23  ;;  %v5001_v12 = vor.u32 %v4999_v42, %v4997_v28  ;;  %v5546_v28 = vrot.slane %v11996_v41, 1 }
 0x2b3   : > { %11156 = vmatpush3.bf16.msra.mxu1 %v12124_v60  ;;  %11123 = vmatprep.mubr.bf16.mxu1 %v7289_v14  ;;  %v11977_v14 = vld [vmem:[#allocation2 + $0x58] sm:$0xff]   ;;  %v11980_v60 = vld [vmem:[#allocation2 + $0x60] sm:$0xff]   ;;  %v5045_v58 = vrot.slane %v5043_v46, 1  ;;  %v12018_v46 = vld [vmem:[#allocation2 + $0x48] sm:$0xff]  }
 0x2b4   : > { %10923 = vmatprep.mubr.bf16.mxu0 %v4958_v6  ;;  %11157 = vmatprep.subr.bf16.mxu1 %v11961_v9  ;;  %v5019_v6 = vshll.u32 %v11981_v53, 16  ;;  %v7304_v49 = vrot.slane %v11980_v60, 2  ;;  %v12002_v53 = vld [vmem:[#allocation2 + $0x18] sm:$0xff]   ;;  %v12030_v60 = vld [vmem:[%s14993_s3 + $0xc8] sm:$0xff]  }
 0x2b5   : > { %10956 = vmatpush3.bf16.msra.mxu0 %v11986_v59  ;;  %v11978_v59 = vld [vmem:[#allocation2 + $0x70] sm:$0xff]  }
 0x2b6   : > { %10957 = vmatprep.subr.bf16.mxu0 %v11990_v10  ;;  %v5011_v23 = vshll.u32 %v11978_v59, 16  ;;  %v5015_v61 = vshrl.u32 %v11978_v59, 16  ;;  %v5021_v16 = vrot.slane %v5019_v6, 1 }
 0x2b7   : > { %11158 = vmatpush3.bf16.msra.mxu1 %v11961_v9  ;;  %v5005_v9 = vrot.slane %v5003_v43, 1 }
 0x2b8   : > { %11159 = vmatprep.subr.bf16.mxu1 %v11968_v54  ;;  %v5013_v37 = vrot.slane %v5011_v23, 1  ;;  %v5025_v50 = vor.u32 %v5023_v45, %v5021_v16 }
 0x2b9   : > { %10958 = vmatpush3.bf16.msra.mxu0 %v11990_v10  ;;  %v5006_v10 = vsel %vm15271_vm0, %v5001_v12, %v5005_v9  ;;  %v5009_v18 = vor.u32 %v5007_v44, %v5005_v9  ;;  %v12001_v9 = vld [vmem:[#allocation2 + $0x90] sm:$0xff]   ;;  %v7314_v12 = vrot.slane %v11999_v2, 2  ;;  %vm15301_vm0 = vmmov %vm15299_vm7  ;;  %v12021_v2 = vld [vmem:[#allocation2 + $0x48] sm:$0xff]  }
 0x2ba   : > { %11124 = vmatmul.mubr.bf16.gmra.mrb[0].mxu1 %v7291_v31  ;;  %10924 = vmatmul.mubr.bf16.gmra.mrb[48].mxu0 %v4966_v62  ;;  %v5017_v35 = vor.u32 %v5015_v61, %v5013_v37  ;;  %v11984_v62 = vld [vmem:[#allocation2 + $0x68] sm:$0xff]   ;;  %v5030_v32 = vsel %vm15291_vm2, %v5025_v50, %v5029_v5  ;;  %v12033_v61 = vld [vmem:[%s14993_s3 + $0xd0] sm:$0xff]   ;;  %vm15306_vm2 = vmmov %vm15301_vm0 }
 0x2bb   : > { %11127 = vmatprep.mubr.bf16.mxu1 %v7293_v13  ;;  %10927 = vmatprep.mubr.bf16.mxu0 %v4974_v19  ;;  %v5014_v31 = vsel %vm15288_vm13, %v5009_v18, %v5013_v37  ;;  %v11987_v13 = vld [vmem:[#allocation2 + $0x70] sm:$0xff]   ;;  %v5035_v19 = vshll.u32 %v11988_v39, 16  ;;  %v12007_v37 = vld [vmem:[#allocation2 + $0x18] sm:$0xff]   ;;  %vm15303_vm13 = vmmov %vm15301_vm0 }
 0x2bc   : > { %11160 = vmatpush3.bf16.msra.mxu1 %v11968_v54  ;;  %10959 = vmatprep.subr.bf16.mxu0 %v11993_v40  ;;  %v7302_v54 = vrot.slane %v11977_v14, 2  ;;  %v7308_v47 = vrot.slane %v11987_v13, 2  ;;  %v12012_v13 = vld [vmem:[#allocation2 + $0x28] sm:$0xff]  }
 0x2bd   : > { %11161 = vmatprep.subr.bf16.mxu1 %v11975_v11  ;;  %10960 = vmatpush3.bf16.msra.mxu0 %v11993_v40  ;;  %v5037_v20 = vrot.slane %v5035_v19, 1  ;;  %v12013_v19 = vld [vmem:[#allocation2 + $0x38] sm:$0xff]   ;;  %v7823_v50 = vrot.slane %v12012_v13, 2 }
 0x2be   : > { %10961 = vmatprep.subr.bf16.mxu0 %v11997_v0  ;;  %v7303_v40 = vsel %vm15287_vm10, %v7300_v48, %v7302_v54  ;;  %v7305_v4 = vsel %vm15289_vm14, %v7302_v54, %v7304_v49  ;;  %v12006_v54 = vld [vmem:[#allocation2 + $0x10] sm:$0xfc]   ;;  %vm15302_vm10 = vmmov %vm15276_vm3  ;;  %v5558_v56 = vrot.slane %v12013_v19, 1  ;;  %v14720_v19 = vld [vmem:[%s14993_s3 + $0x200] sm:$0xff]  }
 0x2bf   : > { %vm15304_vm14 = vmmov %vm15276_vm3 }
 0x2c0   : > { %11162 = vmatpush3.bf16.msra.mxu1 %v11975_v11  ;;  %v5022_v11 = vsel %vm15290_vm6, %v5017_v35, %v5021_v16  ;;  %v7819_v16 = vrot.slane %v12007_v37, 2  ;;  %v7818_v35 = vrot.slane %v12006_v54, 2  ;;  %vm15305_vm6 = vmmov %vm15301_vm0  ;;  %v14704_v37 = vld [vmem:[%s14993_s3 + $0x100] sm:$0xff]  }
 0x2c1   : > { %11163 = vmatprep.subr.bf16.mxu1 %v11982_v27  ;;  %10962 = vmatpush3.bf16.msra.mxu0 %v11997_v0  ;;  %v7306_v0 = vrot.slane %v11984_v62, 2  ;;  %v12011_v62 = vld [vmem:[#allocation2 + $0x30] sm:$0xff]  }
 0x2c2   : > { %11128 = vmatmul.mubr.bf16.gmra.mrb[4].mxu1 %v7295_v38  ;;  %10928 = vmatmul.mubr.bf16.gmra.mrb[52].mxu0 %v4982_v63  ;;  %v11994_v38 = vld [vmem:[#allocation2 + $0x80] sm:$0xff]  }
 0x2c3   : > { %11131 = vmatprep.mubr.bf16.mxu1 %v7297_v29  ;;  %10931 = vmatprep.mubr.bf16.mxu0 %v4990_v26  ;;  %v7307_v30 = vsel %vm15276_vm3, %v7304_v49, %v7306_v0  ;;  %v7309_v51 = vsel %vm15292_vm5, %v7306_v0, %v7308_v47  ;;  %v11995_v63 = vld [vmem:[#allocation2] sm:$0xfe]   ;;  %v7310_v29 = vrot.slane %v11991_v33, 2  ;;  %v7312_v43 = vrot.slane %v11994_v38, 2  ;;  %vm15307_vm5 = vmmov %vm15276_vm3  ;;  %v12017_v33 = vld [vmem:[#allocation2 + $0x38] sm:$0xff]  }
 0x2c4   : > { %11164 = vmatpush3.bf16.msra.mxu1 %v11982_v27  ;;  %10999 = vmatprep.subr.bf16.mxu0 %v14605_v8  ;;  %v5033_v27 = vor.u32 %v5031_v7, %v5029_v5  ;;  %v5545_v24 = vrot.slane %v11995_v63, 1  ;;  %v5556_v5 = vrot.slane %v12011_v62, 1  ;;  %v12040_v0 = vld [vmem:[%s14993_s3 + $0xe0] sm:$0xff]   ;;  %v12022_v38 = vld [vmem:[%s14993_s3 + $0x1d0] sm:$0xff]  }
 0x2c5   : > { %11165 = vmatprep.subr.bf16.mxu1 %v11989_v52  ;;  %v7311_v59 = vsel %vm15294_vm4, %v7308_v47, %v7310_v29  ;;  %v7313_v48 = vsel %vm15296_vm11, %v7310_v29, %v7312_v43  ;;  %v7315_v14 = vsel %vm15298_vm12, %v7312_v43, %v7314_v12  ;;  %v12015_v47 = vld [vmem:[%s14993_s3 + $0x1c8] sm:$0xff]   ;;  %v5562_v29 = vrot.slane %v12018_v46, 1  ;;  %vm15309_vm4 = vmmov %vm15276_vm3  ;;  %v12019_v43 = vld [vmem:[#allocation2 + $0x40] sm:$0xff]  }
 0x2c6   : > { %v5038_v1 = vsel %vm15293_vm9, %v5033_v27, %v5037_v20  ;;  %v5547_v42 = vsel %vm15297_vm8, %v5545_v24, %v5546_v28  ;;  %v12014_v27 = vld [vmem:[#allocation2 + $0x30] sm:$0xff]   ;;  %vm15308_vm9 = vmmov %vm15301_vm0 }
 0x2c7   : > { %v7825_v63 = vrot.slane %v12014_v27, 2  ;;  %v12020_v24 = vld [vmem:[#allocation2 + $0x50] sm:$0xff]   ;;  %vm15311_vm11 = vmmov %vm15276_vm3  ;;  %v12041_v27 = vld [vmem:[#allocation2 + $0x78] sm:$0xff]  }
 0x2c8   : > { %11166 = vmatpush3.bf16.msra.mxu1 %v11989_v52  ;;  %v5039_v52 = vshrl.u32 %v11988_v39, 16  ;;  %v5554_v39 = vrot.slane %v12008_v22, 1  ;;  %vm15312_vm8 = vmmov %vm15301_vm0  ;;  %v7843_v46 = vrot.slane %v12041_v27, 2 }
 0x2c9   : > { %11167 = vmatprep.subr.bf16.mxu1 %v11998_v36  ;;  %vm15313_vm12 = vmmov %vm15276_vm3 }
 0x2ca   : > { %11132 = vmatmul.mubr.bf16.gmra.mrb[8].mxu1 %v7299_v55  ;;  %10932 = vmatmul.mubr.bf16.gmra.mrb[56].mxu0 %v4998_v15  ;;  %v5041_v26 = vor.u32 %v5039_v52, %v5037_v20  ;;  %v7316_v55 = vrot.slane %v12001_v9, 2  ;;  %v5550_v15 = vrot.slane %v12002_v53, 1  ;;  %v5557_v20 = vsel %vm15306_vm2, %v5554_v39, %v5556_v5  ;;  %v12036_v53 = vld [vmem:[%s14993_s3 + $0x1e0] sm:$0xff]   ;;  %vm15320_vm2 = vmmov %vm15301_vm0 }
 0x2cb   : > { %11135 = vmatprep.mubr.bf16.mxu1 %v7301_v57  ;;  %10935 = vmatprep.mubr.bf16.mxu0 %v5006_v10  ;;  %v12004_v57 = vld [vmem:[#allocation2 + $0x98] ss:$0 sps:$4 sm:$0x33]   ;;  %v12005_v10 = vld [vmem:[#allocation2 + $0x20] sm:$0xff]   ;;  %v7827_v52 = vrot.slane %v12017_v33, 2  ;;  %v5564_v9 = vrot.slane %v12020_v24, 1 }
 0x2cc   : > { %11168 = vmatpush3.bf16.msra.mxu1 %v11998_v36  ;;  %v5046_v25 = vsel %vm15295_vm1, %v5041_v26, %v5045_v58  ;;  %v12000_v36 = vld [vmem:[#allocation2 + $0x10] sm:$0xff]   ;;  %v7317_v6 = vsel %vm15300_vm15, %v7314_v12, %v7316_v55  ;;  %v7318_v18 = vrot.slane %v12004_v57, 2  ;;  %v5552_v49 = vrot.slane %v12005_v10, 1  ;;  %vm15310_vm1 = vmmov %vm15301_vm0  ;;  %v12043_v57 = vld [vmem:[%s14993_s3 + $0x1e8] sm:$0xff]  }
 0x2cd   : > { %11169 = vmatprep.subr.bf16.mxu1 %v12003_v3  ;;  %v5548_v23 = vrot.slane %v12000_v36, 1  ;;  %v7826_v26 = vsel %vm15309_vm4, %v7823_v50, %v7825_v63  ;;  %v12023_v36 = vld [vmem:[#allocation2 + $0x58] sm:$0xff]   ;;  %v7831_v12 = vrot.slane %v12021_v2, 2  ;;  %vm15315_vm15 = vmmov %vm15276_vm3 }
 0x2ce   : > { %v7319_v21 = vsel %vm15302_vm10, %v7316_v55, %v7318_v18  ;;  %v12052_v18 = vld [vmem:[%s14993_s3 + $0x1f0] sm:$0xff]   ;;  %vm15316_vm10 = vmmov %vm15276_vm3 }
 0x2cf   : > { %v5551_v44 = vsel %vm15301_vm0, %v5548_v23, %v5550_v15  ;;  %vm15323_vm4 = vmmov %vm15276_vm3 }
 0x2d0   : > { %11170 = vmatpush3.bf16.msra.mxu1 %v12003_v3  ;;  %v5549_v3 = vsel %vm15299_vm7, %v5546_v28, %v5548_v23  ;;  %v12029_v28 = vld [vmem:[%s14993_s3 + $0x1d8] sm:$0xff]   ;;  %v5566_v23 = vrot.slane %v12023_v36, 1  ;;  %vm15314_vm7 = vmmov %vm15301_vm0 }
 0x2d1   : > { %11207 = vmatprep.subr.bf16.mxu1 %v14628_v34 }
 0x2d2   : > { %11136 = vmatmul.mubr.bf16.gmra.mrb[12].mxu1 %v7303_v40  ;;  %10936 = vmatmul.mubr.bf16.gmra.mrb[60].mxu0 %v5014_v31  ;;  %v5553_v40 = vsel %vm15303_vm13, %v5550_v15, %v5552_v49  ;;  %v12010_v31 = vld [vmem:[#allocation2 + $0x20] sm:$0xff]   ;;  %v5565_v15 = vsel %vm15314_vm7, %v5562_v29, %v5564_v9  ;;  %vm15317_vm13 = vmmov %vm15301_vm0 }
 0x2d3   : > { %11139 = vmatprep.mubr.bf16.mxu1 %v7305_v4  ;;  %10939 = vmatprep.mubr.bf16.mxu0 %v5022_v11  ;;  %v7820_v4 = vsel %vm15304_vm14, %v7818_v35, %v7819_v16  ;;  %v5555_v11 = vsel %vm15305_vm6, %v5552_v49, %v5554_v39  ;;  %v7821_v45 = vrot.slane %v12010_v31, 2  ;;  %v12031_v35 = vld [vmem:[#allocation2 + $0x60] sm:$0xff]   ;;  %vm15318_vm14 = vmmov %vm15276_vm3 }
 0x2d4   : > { %vm15319_vm6 = vmmov %vm15301_vm0 }
 0x2d5   : > { %v7822_v7 = vsel %vm15276_vm3, %v7819_v16, %v7821_v45  ;;  %vm15328_vm7 = vmmov %vm15301_vm0 }
 0x2da   : > { %11140 = vmatmul.mubr.bf16.gmra.mrb[16].mxu1 %v7307_v30  ;;  %10940 = vmatmul.mubr.bf16.gmra.mrb[64].mxu0 %v5030_v32  ;;  %v12016_v30 = vld [vmem:[#allocation2 + $0x40] sm:$0xff]   ;;  %v7824_v32 = vsel %vm15307_vm5, %v7821_v45, %v7823_v50  ;;  %vm15321_vm5 = vmmov %vm15276_vm3 }
 0x2db   : > { %11143 = vmatprep.mubr.bf16.mxu1 %v7309_v51  ;;  %10943 = vmatprep.mubr.bf16.mxu0 %v5038_v1  ;;  %v12044_v51 = vld [vmem:[%s14993_s3 + $0xe8] sm:$0xff]   ;;  %v5559_v1 = vsel %vm15308_vm9, %v5556_v5, %v5558_v56  ;;  %v5560_v41 = vrot.slane %v12016_v30, 1  ;;  %vm15322_vm9 = vmmov %vm15301_vm0 }
 0x2dc   : > { %v12042_v30 = vld [vmem:[#allocation2 + $0x88] sm:$0xff]  }
 0x2dd   : > { %v5561_v58 = vsel %vm15310_vm1, %v5558_v56, %v5560_v41  ;;  %v12038_v56 = vld [vmem:[#allocation2 + $0x70] sm:$0xff]   ;;  %vm15324_vm1 = vmmov %vm15301_vm0 }
 0x2e2   : > { %11144 = vmatmul.mubr.bf16.gmra.mrb[20].mxu1 %v7311_v59  ;;  %10944 = vmatmul.mubr.bf16.gmra.mrb[68].mxu0 %v5046_v25  ;;  %v7828_v59 = vsel %vm15311_vm11, %v7825_v63, %v7827_v52  ;;  %v5563_v25 = vsel %vm15312_vm8, %v5560_v41, %v5562_v29  ;;  %v12045_v63 = vld [vmem:[#allocation2 + $0x80] sm:$0xff]   ;;  %v12046_v41 = vld [vmem:[#allocation2 + $0x90] ss:$0 sps:$4 sm:$0x11]   ;;  %vm15325_vm11 = vmmov %vm15276_vm3 }
 0x2e3   : > { %11147 = vmatprep.mubr.bf16.mxu1 %v7313_v48  ;;  %10963 = vmatprep.mubr.bf16.mxu0 %v5547_v42  ;;  %v12051_v48 = vld [vmem:[%s14993_s3 + $0xf8] sm:$0xff]   ;;  %v7829_v42 = vrot.slane %v12019_v43, 2  ;;  %vm15326_vm8 = vmmov %vm15301_vm0  ;;  %v7845_v43 = vrot.slane %v12045_v63, 2  ;;  %v5580_v24 = vrot.slane %v12046_v41, 1 }
 0x2e5   : > { %v7830_v55 = vsel %vm15313_vm12, %v7827_v52, %v7829_v42  ;;  %v7832_v10 = vsel %vm15315_vm15, %v7829_v42, %v7831_v12  ;;  %vm15327_vm12 = vmmov %vm15276_vm3  ;;  %v12054_v42 = vld [vmem:[#allocation2 + $0x18] sm:$0xff]  }
 0x2e6   : > { %v7846_v2 = vsel %vm15327_vm12, %v7843_v46, %v7845_v43  ;;  %vm15329_vm15 = vmmov %vm15276_vm3 }
 0x2ea   : > { %11148 = vmatmul.mubr.bf16.gmra.mrb[24].mxu1 %v7315_v14  ;;  %10964 = vmatmul.mubr.bf16.vlgmr.msra.gmra.mrb[36].mxu0 %v5549_v3  ;;  %v12024_v14 = vld [vmem:[#allocation2 + $0x50] sm:$0xff]   ;;  %v12025_v3 = vld [vmem:[#allocation2 + $0x60] sm:$0xff]  }
 0x2eb   : > { %11151 = vmatprep.mubr.bf16.mxu1 %v7317_v6  ;;  %10967 = vmatprep.mubr.bf16.mxu0 %v5551_v44  ;;  %v12027_v6 = vld [vmem:[#allocation2 + $0x58] sm:$0xff]   ;;  %v12028_v44 = vld [vmem:[#allocation2 + $0x68] sm:$0xff]   ;;  %v7833_v22 = vrot.slane %v12024_v14, 2  ;;  %v5568_v54 = vrot.slane %v12025_v3, 1  ;;  %v6083_v3 = vrot.slane %v12054_v42, 1 }
 0x2ec   : > { %11000 = vmatpush3.bf16.msra.mxu0 %v14605_v8  ;;  %v12037_v8 = vld [vmem:[%s14993_s3 + $0xd8] sm:$0xff]   ;;  %v7835_v49 = vrot.slane %v12027_v6, 2 }
 0x2ed   : > { %11001 = vmatprep.subr.bf16.mxu0 %v12030_v60  ;;  %v7834_v16 = vsel %vm15316_vm10, %v7831_v12, %v7833_v22  ;;  %v5569_v39 = vsel %vm15317_vm13, %v5566_v23, %v5568_v54  ;;  %v12055_v12 = vld [vmem:[#allocation2 + $0x98] sm:$0xff]   ;;  %vm15330_vm10 = vmmov %vm15276_vm3 }
 0x2ee   : > { %v7836_v31 = vsel %vm15318_vm14, %v7833_v22, %v7835_v49  ;;  %vm15331_vm13 = vmmov %vm15301_vm0 }
 0x2ef   : > { %vm15332_vm14 = vmmov %vm15276_vm3 }
 0x2f0   : > { %11002 = vmatpush3.bf16.msra.mxu0 %v12030_v60  ;;  %v5567_v60 = vsel %vm15301_vm0, %v5564_v9, %v5566_v23  ;;  %v12056_v23 = vld [vmem:[#allocation2 + $0x20] sm:$0xff]  }
 0x2f1   : > { %11003 = vmatprep.subr.bf16.mxu0 %v12033_v61 }
 0x2f2   : > { %11152 = vmatmul.mubr.bf16.gmra.mrb[28].mxu1 %v7319_v21  ;;  %10968 = vmatmul.mubr.bf16.gmra.mrb[40].mxu0 %v5553_v40  ;;  %v12032_v21 = vld [vmem:[#allocation2 + $0x70] sm:$0xff]   ;;  %v12057_v40 = vld [vmem:[%s14993_s3 + $0x1f8] sm:$0xff]  }
 0x2f3   : > { %11171 = vmatprep.mubr.bf16.mxu1 %v7820_v4  ;;  %10971 = vmatprep.mubr.bf16.mxu0 %v5555_v11  ;;  %v12035_v4 = vld [vmem:[#allocation2 + $0x78] sm:$0xff]   ;;  %v7837_v11 = vrot.slane %v12031_v35, 2  ;;  %v5572_v13 = vrot.slane %v12032_v21, 1 }
 0x2f4   : > { %11004 = vmatpush3.bf16.msra.mxu0 %v12033_v61  ;;  %v5570_v61 = vrot.slane %v12028_v44, 1  ;;  %v5574_v5 = vrot.slane %v12035_v4, 1 }
 0x2f5   : > { %11005 = vmatprep.subr.bf16.mxu0 %v12037_v8 }
 0x2f6   : > { %v5571_v62 = vsel %vm15319_vm6, %v5568_v54, %v5570_v61  ;;  %v5573_v50 = vsel %vm15320_vm2, %v5570_v61, %v5572_v13  ;;  %v12059_v61 = vld [vmem:[#allocation2 + $0x28] sm:$0xff]   ;;  %vm15333_vm6 = vmmov %vm15301_vm0 }
 0x2f7   : > { %vm15334_vm2 = vmmov %vm15301_vm0 }
 0x2f8   : > { %11006 = vmatpush3.bf16.msra.mxu0 %v12037_v8  ;;  %v12034_v8 = vld [vmem:[#allocation2 + $0x68] sm:$0xff]  }
 0x2f9   : > { %11007 = vmatprep.subr.bf16.mxu0 %v12040_v0  ;;  %v7839_v45 = vrot.slane %v12034_v8, 2 }
 0x2fa   : > { %11172 = vmatmul.mubr.bf16.vlgmr.msra.gmra.mrb[32].mxu1 %v7822_v7  ;;  %10972 = vmatmul.mubr.bf16.gmra.mrb[44].mxu0 %v5557_v20  ;;  %v5575_v20 = vsel %vm15322_vm9, %v5572_v13, %v5574_v5  ;;  %v6087_v13 = vrot.slane %v12059_v61, 1  ;;  %vm15336_vm9 = vmmov %vm15301_vm0 }
 0x2fb   : > { %11208 = vmatpush3.bf16.msra.mxu1 %v14628_v34  ;;  %11175 = vmatprep.mubr.bf16.mxu1 %v7824_v32  ;;  %v12047_v34 = vld [vmem:[%s14993_s3 + $0xf0] sm:$0xff]   ;;  %v7840_v7 = vsel %vm15321_vm5, %v7837_v11, %v7839_v45  ;;  %v7841_v32 = vrot.slane %v12038_v56, 2  ;;  %vm15335_vm5 = vsmask.f32 5376 }
 0x2fc   : > { %10975 = vmatprep.mubr.bf16.mxu0 %v5559_v1  ;;  %11209 = vmatprep.subr.bf16.mxu1 %v12015_v47 }
 0x2fd   : > { %11008 = vmatpush3.bf16.msra.mxu0 %v12040_v0  ;;  %v7838_v0 = vsel %vm15276_vm3, %v7835_v49, %v7837_v11  ;;  %v7842_v1 = vsel %vm15323_vm4, %v7839_v45, %v7841_v32  ;;  %v7844_v52 = vsel %vm15325_vm11, %v7841_v32, %v7843_v46  ;;  %v12058_v49 = vld [vmem:[#allocation2 + $0xa0] ss:$0 sps:$4 sm:$0x33]   ;;  %v12068_v46 = vld [vmem:[#allocation2 + $0x30] sm:$0xff]   ;;  %vm15337_vm4 = vmmov %vm15335_vm5 }
 0x2fe   : > { %11009 = vmatprep.subr.bf16.mxu0 %v12044_v51  ;;  %v7853_v11 = vrot.slane %v12058_v49, 2  ;;  %vm15339_vm11 = vmmov %vm15337_vm4 }
 0x2ff   : > { %11210 = vmatpush3.bf16.msra.mxu1 %v12015_v47  ;;  %v12039_v47 = vld [vmem:[#allocation2 + $0x80] sm:$0xff]   ;;  %vm15341_vm12 = vmmov %vm15337_vm4 }
 0x300   : > { %11211 = vmatprep.subr.bf16.mxu1 %v12022_v38  ;;  %v5576_v33 = vrot.slane %v12039_v47, 1 }
 0x301   : > { %11010 = vmatpush3.bf16.msra.mxu0 %v12044_v51  ;;  %v5578_v51 = vrot.slane %v12042_v30, 1 }
 0x302   : > { %11176 = vmatmul.mubr.bf16.gmra.mrb[0].mxu1 %v7826_v26  ;;  %10976 = vmatmul.mubr.bf16.gmra.mrb[48].mxu0 %v5561_v58  ;;  %v12050_v26 = vld [vmem:[#allocation2 + $0x10] sm:$0xff]   ;;  %v12049_v58 = vld [vmem:[#allocation2 + $0x8] sm:$0xfe]  }
 0x303   : > { %11179 = vmatprep.mubr.bf16.mxu1 %v7828_v59  ;;  %10979 = vmatprep.mubr.bf16.mxu0 %v5563_v25  ;;  %v5579_v29 = vsel %vm15326_vm8, %v5576_v33, %v5578_v51  ;;  %v6081_v59 = vrot.slane %v12050_v26, 1  ;;  %v6080_v25 = vrot.slane %v12049_v58, 1  ;;  %v5581_v36 = vsel %vm15328_vm7, %v5578_v51, %v5580_v24  ;;  %v12127_v51 = vld [vmem:[%s14993_s3 + $0x110] sm:$0xff]   ;;  %v12128_v24 = vld [vmem:[%s14993_s3 + $0x118] sm:$0xff]   ;;  %vm15340_vm8 = vmmov %vm15301_vm0 }
 0x304   : > { %11212 = vmatpush3.bf16.msra.mxu1 %v12022_v38  ;;  %11011 = vmatprep.subr.bf16.mxu0 %v12047_v34  ;;  %v5577_v38 = vsel %vm15324_vm1, %v5574_v5, %v5576_v33  ;;  %v12065_v33 = vld [vmem:[#allocation2 + $0x38] sm:$0xff]   ;;  %v8389_v58 = vshrl.u32 %v12068_v46, 16  ;;  %vm15338_vm1 = vmmov %vm15301_vm0 }
 0x305   : > { %11213 = vmatprep.subr.bf16.mxu1 %v12029_v28  ;;  %11012 = vmatpush3.bf16.msra.mxu0 %v12047_v34  ;;  %v12048_v34 = vld [vmem:[#allocation2 + $0x88] sm:$0xff]   ;;  %v6091_v26 = vrot.slane %v12065_v33, 1  ;;  %vm15342_vm7 = vmmov %vm15301_vm0 }
 0x306   : > { %11013 = vmatprep.subr.bf16.mxu0 %v12051_v48 }
 0x308   : > { %11214 = vmatpush3.bf16.msra.mxu1 %v12029_v28  ;;  %v7847_v28 = vrot.slane %v12048_v34, 2 }
 0x309   : > { %11215 = vmatprep.subr.bf16.mxu1 %v12036_v53  ;;  %11014 = vmatpush3.bf16.msra.mxu0 %v12051_v48  ;;  %v12053_v48 = vld [vmem:[#allocation2 + $0x90] sm:$0xff]  }
 0x30a   : > { %11180 = vmatmul.mubr.bf16.gmra.mrb[4].mxu1 %v7830_v55  ;;  %10980 = vmatmul.mubr.bf16.gmra.mrb[52].mxu0 %v5565_v15  ;;  %v7848_v9 = vsel %vm15329_vm15, %v7845_v43, %v7847_v28  ;;  %v12061_v55 = vld [vmem:[#allocation2 + $0x18] sm:$0xff]   ;;  %v12060_v15 = vld [vmem:[#allocation2 + $0x10] sm:$0xfc]   ;;  %v7849_v14 = vrot.slane %v12053_v48, 2  ;;  %v8392_v43 = vshll.u32 %v12068_v46, 16  ;;  %vm15343_vm15 = vmmov %vm15337_vm4 }
 0x30b   : > { %11183 = vmatprep.mubr.bf16.mxu1 %v7832_v10  ;;  %10983 = vmatprep.mubr.bf16.mxu0 %v5567_v60  ;;  %v6085_v10 = vrot.slane %v12056_v23, 1  ;;  %v8362_v60 = vshrl.u32 %v12061_v55, 16  ;;  %v8365_v6 = vshll.u32 %v12061_v55, 16  ;;  %v8354_v44 = vshrl.u32 %v12060_v15, 16  ;;  %v12073_v23 = vld [vmem:[#allocation2 + $0x40] sm:$0xff]  }
 0x30c   : > { %11216 = vmatpush3.bf16.msra.mxu1 %v12036_v53  ;;  %11051 = vmatprep.subr.bf16.mxu0 %v14704_v37  ;;  %v6082_v53 = vsel %vm15301_vm0, %v6080_v25, %v6081_v59  ;;  %v8357_v22 = vshll.u32 %v12060_v15, 16  ;;  %v7850_v54 = vsel %vm15330_vm10, %v7847_v28, %v7849_v14  ;;  %v12129_v55 = vld [vmem:[%s14993_s3 + $0x120] sm:$0xff]   ;;  %vm15344_vm10 = vmmov %vm15337_vm4 }
 0x30d   : > { %11217 = vmatprep.subr.bf16.mxu1 %v12043_v57  ;;  %v6086_v35 = vsel %vm15333_vm6, %v6083_v3, %v6085_v10  ;;  %v8364_v21 = vrot.slane %v8362_v60, 2  ;;  %v8356_v8 = vrot.slane %v8354_v44, 2  ;;  %v6088_v30 = vsel %vm15334_vm2, %v6085_v10, %v6087_v13  ;;  %v12075_v10 = vld [vmem:[#allocation2 + $0x48] sm:$0xff]   ;;  %vm15347_vm6 = vmmov %vm15301_vm0 }
 0x30e   : > { %v8359_v4 = vrot.slane %v8357_v22, 3  ;;  %vm15349_vm2 = vmmov %vm15301_vm0 }
 0x310   : > { %11218 = vmatpush3.bf16.msra.mxu1 %v12043_v57  ;;  %v7851_v57 = vrot.slane %v12055_v12, 2  ;;  %v12070_v12 = vld [vmem:[#allocation2 + $0x48] sm:$0xff]  }
 0x311   : > { %11219 = vmatprep.subr.bf16.mxu1 %v12052_v18  ;;  %v6095_v22 = vrot.slane %v12070_v12, 1 }
 0x312   : > { %11184 = vmatmul.mubr.bf16.gmra.mrb[8].mxu1 %v7834_v16  ;;  %10984 = vmatmul.mubr.bf16.gmra.mrb[56].mxu0 %v5569_v39  ;;  %v12064_v16 = vld [vmem:[#allocation2 + $0x20] sm:$0xff]   ;;  %v7852_v39 = vsel %vm15332_vm14, %v7849_v14, %v7851_v57  ;;  %v7854_v27 = vsel %vm15276_vm3, %v7851_v57, %v7853_v11  ;;  %v12072_v57 = vld [vmem:[#allocation2 + $0x50] sm:$0xff]   ;;  %vm15346_vm14 = vmmov %vm15337_vm4 }
 0x313   : > { %11187 = vmatprep.mubr.bf16.mxu1 %v7836_v31  ;;  %10987 = vmatprep.mubr.bf16.mxu0 %v5571_v62  ;;  %v12062_v31 = vld [vmem:[#allocation2 + $0x30] sm:$0xff]   ;;  %v12066_v62 = vld [vmem:[#allocation2 + $0x28] sm:$0xff]   ;;  %v8371_v45 = vshrl.u32 %v12064_v16, 16  ;;  %v8374_v5 = vshll.u32 %v12064_v16, 16  ;;  %v6097_v61 = vrot.slane %v12072_v57, 1  ;;  %v8416_v16 = vshrl.u32 %v12075_v10, 16  ;;  %vm15348_vm3 = vmmov %vm15337_vm4 }
 0x314   : > { %11220 = vmatpush3.bf16.msra.mxu1 %v12052_v18  ;;  %v6084_v18 = vsel %vm15331_vm13, %v6081_v59, %v6083_v3  ;;  %v6089_v56 = vrot.slane %v12062_v31, 1  ;;  %v8380_v47 = vshrl.u32 %v12066_v62, 16  ;;  %vm15345_vm13 = vmmov %vm15301_vm0  ;;  %v12084_v57 = vld [vmem:[#allocation2 + $0x78] sm:$0xff]  }
 0x315   : > { %11221 = vmatprep.subr.bf16.mxu1 %v12057_v40  ;;  %v8376_v32 = vrot.slane %v8374_v5, 3 }
 0x316   : > { %v8382_v63 = vrot.slane %v8380_v47, 2  ;;  %v6092_v42 = vsel %vm15338_vm1, %v6089_v56, %v6091_v26  ;;  %vm15353_vm1 = vmmov %vm15301_vm0 }
 0x318   : > { %11222 = vmatpush3.bf16.msra.mxu1 %v12057_v40  ;;  %v8367_v40 = vrot.slane %v8365_v6, 3  ;;  %v12076_v6 = vld [vmem:[%s14993_s3 + $0x210] sm:$0xff]  }
 0x319   : > { %11259 = vmatprep.subr.bf16.mxu1 %v14720_v19 }
 0x31a   : > { %11188 = vmatmul.mubr.bf16.gmra.mrb[12].mxu1 %v7838_v0  ;;  %10988 = vmatmul.mubr.bf16.gmra.mrb[60].mxu0 %v5573_v50  ;;  %v12126_v0 = vld [vmem:[%s14993_s3 + $0x108] sm:$0xff]   ;;  %v8368_v50 = vor.u32 %v8367_v40, %v8364_v21 }
 0x31b   : > { %11191 = vmatprep.mubr.bf16.mxu1 %v7840_v7  ;;  %10991 = vmatprep.mubr.bf16.mxu0 %v5575_v20  ;;  %v8383_v7 = vshll.u32 %v12066_v62, 16  ;;  %v8360_v20 = vor.u32 %v8359_v4, %v8356_v8  ;;  %v12074_v62 = vld [vmem:[#allocation2 + $0x58] sm:$0xff]   ;;  %v12078_v8 = vld [vmem:[#allocation2 + $0x50] sm:$0xff]  }
 0x31c   : > { %v12082_v4 = vld [vmem:[%s14993_s3 + $0x218] sm:$0xff]  }
 0x31d   : > { %v8385_v41 = vrot.slane %v8383_v7, 3  ;;  %v6099_v7 = vrot.slane %v12074_v62, 1  ;;  %v12097_v62 = vld [vmem:[#allocation2 + $0x10] sm:$0xff]  }
 0x31f   : > { %v8386_v28 = vor.u32 %v8385_v41, %v8382_v63 }
 0x322   : > { %11192 = vmatmul.mubr.bf16.gmra.mrb[16].mxu1 %v7842_v1  ;;  %10992 = vmatmul.mubr.bf16.gmra.mrb[64].mxu0 %v5577_v38  ;;  %v8369_v1 = vsel %vm15335_vm5, %v8360_v20, %v8368_v50  ;;  %v6090_v38 = vsel %vm15336_vm9, %v6087_v13, %v6089_v56  ;;  %v6098_v13 = vsel %vm15301_vm0, %v6095_v22, %v6097_v61  ;;  %v12131_v56 = vld [vmem:[%s14993_s3 + $0x130] sm:$0xff]   ;;  %v8425_v20 = vshrl.u32 %v12078_v8, 16  ;;  %vm15350_vm5 = vmmov %vm15348_vm3 }
 0x323   : > { %11195 = vmatprep.mubr.bf16.mxu1 %v7844_v52  ;;  %10995 = vmatprep.mubr.bf16.mxu0 %v5579_v29  ;;  %v12071_v52 = vld [vmem:[#allocation2 + $0x38] sm:$0xff]   ;;  %v12067_v29 = vld [vmem:[#allocation2 + $0x40] sm:$0xff]   ;;  %vm15351_vm9 = vmmov %vm15301_vm0 }
 0x324   : > { %v8398_v59 = vshrl.u32 %v12071_v52, 16  ;;  %v8401_v25 = vshll.u32 %v12071_v52, 16  ;;  %v8427_v63 = vrot.slane %v8425_v20, 2  ;;  %v12079_v52 = vld [vmem:[#allocation2 + $0x68] sm:$0xff]  }
 0x325   : > { %v12095_v20 = vld [vmem:[#allocation2 + $0x88] sm:$0xff]  }
 0x326   : > { %v8400_v14 = vrot.slane %v8398_v59, 2  ;;  %v8403_v3 = vrot.slane %v8401_v25, 3  ;;  %v12085_v59 = vld [vmem:[#allocation2 + $0x68] sm:$0xff]  }
 0x327   : > { %v8452_v12 = vshrl.u32 %v12085_v59, 16 }
 0x328   : > { %v8404_v49 = vor.u32 %v8403_v3, %v8400_v14 }
 0x32a   : > { %11196 = vmatmul.mubr.bf16.gmra.mrb[20].mxu1 %v7846_v2  ;;  %10996 = vmatmul.mubr.bf16.gmra.mrb[68].mxu0 %v5581_v36  ;;  %v6093_v2 = vrot.slane %v12067_v29, 1  ;;  %v12069_v36 = vld [vmem:[%s14993_s3 + $0x208] sm:$0xff]   ;;  %v12083_v29 = vld [vmem:[#allocation2 + $0x60] sm:$0xff]  }
 0x32b   : > { %11199 = vmatprep.mubr.bf16.mxu1 %v7848_v9  ;;  %11015 = vmatprep.mubr.bf16.mxu0 %v6082_v53  ;;  %v8391_v9 = vrot.slane %v8389_v58, 2  ;;  %v8394_v53 = vrot.slane %v8392_v43, 3 }
 0x32c   : > { %v6094_v60 = vsel %vm15340_vm8, %v6091_v26, %v6093_v2  ;;  %v6096_v21 = vsel %vm15342_vm7, %v6093_v2, %v6095_v22  ;;  %v6103_v2 = vrot.slane %v12079_v52, 1  ;;  %v8454_v22 = vrot.slane %v8452_v12, 2  ;;  %vm15355_vm8 = vmmov %vm15301_vm0 }
 0x32d   : > { %v8395_v44 = vor.u32 %v8394_v53, %v8391_v9  ;;  %vm15357_vm7 = vmmov %vm15301_vm0 }
 0x32f   : > { %v8405_v11 = vsel %vm15343_vm15, %v8395_v44, %v8404_v49  ;;  %vm15358_vm15 = vmmov %vm15348_vm3 }
 0x332   : > { %11200 = vmatmul.mubr.bf16.gmra.mrb[24].mxu1 %v7850_v54  ;;  %11016 = vmatmul.mubr.bf16.vlgmr.msra.gmra.mrb[36].mxu0 %v6084_v18  ;;  %v8407_v54 = vshrl.u32 %v12073_v23, 16  ;;  %v8410_v18 = vshll.u32 %v12073_v23, 16  ;;  %v8455_v23 = vshll.u32 %v12085_v59, 16  ;;  %v12094_v59 = vld [vmem:[#allocation2 + $0x98] ss:$0 sps:$4 sm:$0x11]  }
 0x333   : > { %11203 = vmatprep.mubr.bf16.mxu1 %v7852_v39  ;;  %11019 = vmatprep.mubr.bf16.mxu0 %v6086_v35  ;;  %v8419_v39 = vshll.u32 %v12075_v10, 16  ;;  %v8396_v35 = vsel %vm15341_vm12, %v8386_v28, %v8395_v44  ;;  %v12088_v10 = vld [vmem:[#allocation2 + $0x70] sm:$0xff]   ;;  %vm15356_vm12 = vmmov %vm15348_vm3 }
 0x334   : > { %11052 = vmatpush3.bf16.msra.mxu0 %v14704_v37  ;;  %v8373_v37 = vrot.slane %v8371_v45, 2  ;;  %v8409_v40 = vrot.slane %v8407_v54, 2  ;;  %v8412_v31 = vrot.slane %v8410_v18, 3  ;;  %v8418_v45 = vrot.slane %v8416_v16, 2  ;;  %v12086_v18 = vld [vmem:[#allocation2 + $0x80] sm:$0xff]  }
 0x335   : > { %11053 = vmatprep.subr.bf16.mxu0 %v12126_v0  ;;  %v8421_v5 = vrot.slane %v8419_v39, 3  ;;  %v8457_v54 = vrot.slane %v8455_v23, 3  ;;  %v6107_v16 = vrot.slane %v12084_v57, 1  ;;  %v8461_v39 = vshrl.u32 %v12088_v10, 16 }
 0x336   : > { %v8377_v34 = vor.u32 %v8376_v32, %v8373_v37  ;;  %v8413_v47 = vor.u32 %v8412_v31, %v8409_v40 }
 0x337   : > { %v8422_v37 = vor.u32 %v8421_v5, %v8418_v45  ;;  %v12089_v45 = vld [vmem:[#allocation2 + $0x88] sm:$0xff]   ;;  %v12093_v5 = vld [vmem:[#allocation2 + $0x80] sm:$0xff]  }
 0x338   : > { %11054 = vmatpush3.bf16.msra.mxu0 %v12126_v0  ;;  %v8378_v48 = vsel %vm15337_vm4, %v8368_v50, %v8377_v34  ;;  %v8387_v15 = vsel %vm15339_vm11, %v8377_v34, %v8386_v28  ;;  %v12077_v0 = vld [vmem:[#allocation2 + $0x60] sm:$0xff]   ;;  %v12080_v50 = vld [vmem:[#allocation2 + $0x58] sm:$0xff]   ;;  %v12092_v34 = vld [vmem:[%s14993_s3 + $0x228] sm:$0xff]  }
 0x339   : > { %11055 = vmatprep.subr.bf16.mxu0 %v12127_v51  ;;  %v6101_v32 = vrot.slane %v12077_v0, 1  ;;  %v8434_v33 = vshrl.u32 %v12080_v50, 16  ;;  %v8437_v46 = vshll.u32 %v12080_v50, 16  ;;  %v8423_v26 = vsel %vm15346_vm14, %v8413_v47, %v8422_v37  ;;  %v12081_v28 = vld [vmem:[#allocation2 + $0x70] sm:$0xff]   ;;  %vm15352_vm4 = vmmov %vm15348_vm3 }
 0x33a   : > { %11204 = vmatmul.mubr.bf16.gmra.mrb[28].mxu1 %v7854_v27  ;;  %11020 = vmatmul.mubr.bf16.gmra.mrb[40].mxu0 %v6088_v30  ;;  %v8428_v27 = vshll.u32 %v12078_v8, 16  ;;  %v12087_v30 = vld [vmem:[%s14993_s3 + $0x220] sm:$0xff]   ;;  %v6105_v53 = vrot.slane %v12081_v28, 1  ;;  %vm15354_vm11 = vmmov %vm15348_vm3 }
 0x33b   : > { %11223 = vmatprep.mubr.bf16.mxu1 %v8369_v1  ;;  %11023 = vmatprep.mubr.bf16.mxu0 %v6090_v38  ;;  %v8414_v1 = vsel %vm15344_vm10, %v8404_v49, %v8413_v47  ;;  %v6100_v38 = vsel %vm15345_vm13, %v6097_v61, %v6099_v7  ;;  %v6102_v58 = vsel %vm15347_vm6, %v6099_v7, %v6101_v32  ;;  %v8436_v43 = vrot.slane %v8434_v33, 2  ;;  %v12090_v49 = vld [vmem:[#allocation2 + $0x78] sm:$0xff]   ;;  %v12091_v7 = vld [vmem:[#allocation2 + $0x90] sm:$0xff]   ;;  %vm15359_vm10 = vmmov %vm15348_vm3 }
 0x33c   : > { %11056 = vmatpush3.bf16.msra.mxu0 %v12127_v51  ;;  %v12132_v51 = vld [vmem:[%s14993_s3 + $0x138] sm:$0xff]   ;;  %v8430_v41 = vrot.slane %v8428_v27, 3  ;;  %v6106_v44 = vsel %vm15351_vm9, %v6103_v2, %v6105_v53  ;;  %v8470_v40 = vshrl.u32 %v12090_v49, 16  ;;  %v8473_v31 = vshll.u32 %v12090_v49, 16  ;;  %v12096_v27 = vld [vmem:[#allocation2 + $0x8] sm:$0xfe]   ;;  %vm15360_vm13 = vmmov %vm15301_vm0 }
 0x33d   : > { %11057 = vmatprep.subr.bf16.mxu0 %v12128_v24  ;;  %v6111_v33 = vrot.slane %v12089_v45, 1  ;;  %v6616_v52 = vshrl.u32 %v12096_v27, 16  ;;  %v12102_v49 = vld [vmem:[#allocation2 + $0xa0] ss:$0 sps:$4 sm:$0x77]   ;;  %vm15361_vm14 = vmmov %vm15348_vm3  ;;  %v12104_v45 = vld [vmem:[#allocation2 + $0x18] sm:$0xff]  }
 0x33e   : > { %v8431_v25 = vor.u32 %v8430_v41, %v8427_v63  ;;  %v8475_v47 = vrot.slane %v8473_v31, 3  ;;  %v8488_v63 = vshrl.u32 %v12095_v20, 16  ;;  %v8491_v41 = vshll.u32 %v12095_v20, 16  ;;  %vm15365_vm9 = vmmov %vm15348_vm3 }
 0x33f   : > { %vm15362_vm6 = vsmask.f32 6400 }
 0x340   : > { %11058 = vmatpush3.bf16.msra.mxu0 %v12128_v24  ;;  %v8439_v24 = vrot.slane %v8437_v46, 3  ;;  %v8479_v46 = vshrl.u32 %v12093_v5, 16 }
 0x341   : > { %11059 = vmatprep.subr.bf16.mxu0 %v12129_v55 }
 0x342   : > { %11224 = vmatmul.mubr.bf16.vlgmr.msra.gmra.mrb[32].mxu1 %v8378_v48  ;;  %11024 = vmatmul.mubr.bf16.gmra.mrb[44].mxu0 %v6092_v42  ;;  %v8446_v48 = vshll.u32 %v12083_v29, 16  ;;  %v12098_v42 = vld [vmem:[%s14993_s3 + $0x230] sm:$0xff]   ;;  %v8440_v9 = vor.u32 %v8439_v24, %v8436_v43  ;;  %v8481_v24 = vrot.slane %v8479_v46, 2  ;;  %v12108_v46 = vld [vmem:[#allocation2 + $0x38] sm:$0xff]  }
 0x343   : > { %11260 = vmatpush3.bf16.msra.mxu1 %v14720_v19  ;;  %11227 = vmatprep.mubr.bf16.mxu1 %v8387_v15  ;;  %v12130_v19 = vld [vmem:[%s14993_s3 + $0x128] sm:$0xff]   ;;  %v6104_v15 = vsel %vm15349_vm2, %v6101_v32, %v6103_v2  ;;  %vm15363_vm2 = vmmov %vm15362_vm6 }
 0x344   : > { %11027 = vmatprep.mubr.bf16.mxu0 %v6094_v60  ;;  %11261 = vmatprep.subr.bf16.mxu1 %v12069_v36  ;;  %v8448_v3 = vrot.slane %v8446_v48, 3  ;;  %v12101_v60 = vld [vmem:[%s14993_s3 + $0x238] sm:$0xff]   ;;  %v8490_v48 = vrot.slane %v8488_v63, 2  ;;  %v12109_v63 = vld [vmem:[#allocation2 + $0x40] sm:$0xff]  }
 0x345   : > { %11060 = vmatpush3.bf16.msra.mxu0 %v12129_v55  ;;  %v8432_v55 = vsel %vm15348_vm3, %v8422_v37, %v8431_v25  ;;  %v6627_v37 = vshll.u32 %v12097_v62, 16 }
 0x346   : > { %11061 = vmatprep.subr.bf16.mxu0 %v12130_v19 }
 0x347   : > { %11262 = vmatpush3.bf16.msra.mxu1 %v12069_v36  ;;  %v8443_v36 = vshrl.u32 %v12083_v29, 16  ;;  %v6619_v29 = vshll.u32 %v12096_v27, 16  ;;  %v12106_v27 = vld [vmem:[#allocation2 + $0x28] sm:$0xff]  }
 0x348   : > { %11263 = vmatprep.subr.bf16.mxu1 %v12076_v6 }
 0x349   : > { %11062 = vmatpush3.bf16.msra.mxu0 %v12130_v19  ;;  %v8445_v14 = vrot.slane %v8443_v36, 2  ;;  %v8464_v19 = vshll.u32 %v12088_v10, 16  ;;  %v6621_v12 = vrot.slane %v6619_v29, 2  ;;  %v9032_v29 = vrot.slane %v12109_v63, 3 }
 0x34a   : > { %11228 = vmatmul.mubr.bf16.gmra.mrb[0].mxu1 %v8396_v35  ;;  %11028 = vmatmul.mubr.bf16.gmra.mrb[48].mxu0 %v6096_v21  ;;  %v8458_v35 = vor.u32 %v8457_v54, %v8454_v22  ;;  %v6109_v21 = vrot.slane %v12086_v18, 1 }
 0x34b   : > { %11231 = vmatprep.mubr.bf16.mxu1 %v8405_v11  ;;  %11031 = vmatprep.mubr.bf16.mxu0 %v6098_v13  ;;  %v8449_v61 = vor.u32 %v8448_v3, %v8445_v14  ;;  %v8463_v11 = vrot.slane %v8461_v39, 2  ;;  %v8466_v13 = vrot.slane %v8464_v19, 3 }
 0x34c   : > { %11264 = vmatpush3.bf16.msra.mxu1 %v12076_v6  ;;  %11063 = vmatprep.subr.bf16.mxu0 %v12131_v56  ;;  %v8441_v6 = vsel %vm15350_vm5, %v8431_v25, %v8440_v9  ;;  %v6110_v50 = vsel %vm15355_vm8, %v6107_v16, %v6109_v21  ;;  %v6112_v43 = vsel %vm15357_vm7, %v6109_v21, %v6111_v33  ;;  %v12099_v25 = vld [vmem:[#allocation2 + $0x90] sm:$0xff]   ;;  %v8515_v21 = vshrl.u32 %v12102_v49, 16  ;;  %vm15364_vm5 = vmmov %vm15348_vm3 }
 0x34d   : > { %11265 = vmatprep.subr.bf16.mxu1 %v12082_v4  ;;  %11064 = vmatpush3.bf16.msra.mxu0 %v12131_v56  ;;  %v8450_v8 = vsel %vm15352_vm4, %v8440_v9, %v8449_v61  ;;  %v8459_v0 = vsel %vm15354_vm11, %v8449_v61, %v8458_v35  ;;  %v8472_v56 = vrot.slane %v8470_v40, 2  ;;  %v8467_v32 = vor.u32 %v8466_v13, %v8463_v11  ;;  %v12100_v9 = vld [vmem:[#allocation2 + $0x98] sm:$0xff]  }
 0x34e   : > { %11065 = vmatprep.subr.bf16.mxu0 %v12132_v51  ;;  %v8500_v14 = vshll.u32 %v12099_v25, 16  ;;  %v8506_v10 = vshrl.u32 %v12100_v9, 16  ;;  %v8518_v40 = vshll.u32 %v12102_v49, 16  ;;  %vm15366_vm4 = vcmask 1044480   ;;  %v12120_v49 = vld [vmem:[#allocation2 + $0x98] sm:$0xff]  }
 0x350   : > { %11266 = vmatpush3.bf16.msra.mxu1 %v12082_v4  ;;  %v6108_v4 = vsel %vm15353_vm1, %v6105_v53, %v6107_v16  ;;  %v6618_v53 = vrot.slane %v6616_v52, 1  ;;  %v8502_v18 = vrot.slane %v8500_v14, 3  ;;  %v8508_v39 = vrot.slane %v8506_v10, 2  ;;  %vm15367_vm1 = vmmov %vm15366_vm4  ;;  %v12110_v52 = vld [vmem:[#allocation2 + $0x48] sm:$0xff]  }
 0x351   : > { %11267 = vmatprep.subr.bf16.mxu1 %v12087_v30  ;;  %11066 = vmatpush3.bf16.msra.mxu0 %v12132_v51  ;;  %v8482_v51 = vshll.u32 %v12093_v5, 16  ;;  %v8520_v11 = vrot.slane %v8518_v40, 3  ;;  %v12103_v5 = vld [vmem:[#allocation2 + $0x10] sm:$0xf8]   ;;  %vm15368_vm11 = vmmov %vm15367_vm1 }
 0x352   : > { %11232 = vmatmul.mubr.bf16.gmra.mrb[4].mxu1 %v8414_v1  ;;  %11032 = vmatmul.mubr.bf16.gmra.mrb[52].mxu0 %v6100_v38  ;;  %v8476_v1 = vor.u32 %v8475_v47, %v8472_v56  ;;  %v6113_v38 = vrot.slane %v12091_v7, 1  ;;  %v9021_v56 = vrot.slane %v12103_v5, 3  ;;  %v12105_v7 = vld [vmem:[#allocation2 + $0x20] sm:$0xff]   ;;  %vm15369_vm8 = vmmov %vm15367_vm1 }
 0x353   : > { %11235 = vmatprep.mubr.bf16.mxu1 %v8423_v26  ;;  %11035 = vmatprep.mubr.bf16.mxu0 %v6102_v58  ;;  %v6629_v26 = vrot.slane %v6627_v37, 2  ;;  %v8468_v58 = vsel %vm15356_vm12, %v8458_v35, %v8467_v32  ;;  %v8484_v28 = vrot.slane %v8482_v51, 3  ;;  %vm15370_vm12 = vmmov %vm15367_vm1 }
 0x354   : > { %11268 = vmatpush3.bf16.msra.mxu1 %v12087_v30  ;;  %v6624_v30 = vshrl.u32 %v12097_v62, 16  ;;  %v8477_v2 = vsel %vm15358_vm15, %v8467_v32, %v8476_v1  ;;  %v6114_v36 = vsel %vm15301_vm0, %v6111_v33, %v6113_v38  ;;  %v12107_v32 = vld [vmem:[#allocation2 + $0x30] sm:$0xff]   ;;  %vm15371_vm7 = vmmov %vm15367_vm1 }
 0x355   : > { %11269 = vmatprep.subr.bf16.mxu1 %v12092_v34  ;;  %v8485_v23 = vor.u32 %v8484_v28, %v8481_v24  ;;  %v9028_v51 = vrot.slane %v12107_v32, 3  ;;  %vm15372_vm15 = vmmov %vm15367_vm1  ;;  %v12112_v24 = vld [vmem:[#allocation2 + $0x58] sm:$0xff]  }
 0x356   : > { %vm15373_vm0 = vmmov %vm15367_vm1 }
 0x358   : > { %11270 = vmatpush3.bf16.msra.mxu1 %v12092_v34  ;;  %v6626_v34 = vrot.slane %v6624_v30, 1  ;;  %v9026_v30 = vrot.slane %v12106_v27, 3 }
 0x359   : > { %11271 = vmatprep.subr.bf16.mxu1 %v12098_v42 }
 0x35a   : > { %11236 = vmatmul.mubr.bf16.gmra.mrb[8].mxu1 %v8432_v55  ;;  %11036 = vmatmul.mubr.bf16.gmra.mrb[56].mxu0 %v6104_v15  ;;  %v6115_v55 = vrot.slane %v12094_v59, 1  ;;  %v8497_v15 = vshrl.u32 %v12099_v25, 16  ;;  %v6630_v57 = vor.u32 %v6629_v26, %v6626_v34  ;;  %v9034_v34 = vrot.slane %v12110_v52, 3 }
 0x35b   : > { %11239 = vmatprep.mubr.bf16.mxu1 %v8441_v6  ;;  %11039 = vmatprep.mubr.bf16.mxu0 %v6106_v44  ;;  %v6622_v6 = vor.u32 %v6621_v12, %v6618_v53  ;;  %v8486_v44 = vsel %vm15359_vm10, %v8476_v1, %v8485_v23  ;;  %v9030_v1 = vrot.slane %v12108_v46, 3  ;;  %v9038_v59 = vrot.slane %v12112_v24, 3  ;;  %vm15374_vm10 = vmmov %vm15373_vm0  ;;  %v12115_v12 = vld [vmem:[#allocation2 + $0x70] sm:$0xff]  }
 0x35c   : > { %11272 = vmatpush3.bf16.msra.mxu1 %v12098_v42  ;;  %v8493_v42 = vrot.slane %v8491_v41, 3  ;;  %v6116_v22 = vsel %vm15360_vm13, %v6113_v38, %v6115_v55  ;;  %v8499_v54 = vrot.slane %v8497_v15, 2  ;;  %v9029_v38 = vsel %vm15369_vm8, %v9026_v30, %v9028_v51  ;;  %vm15375_vm13 = vmmov %vm15373_vm0  ;;  %v12116_v55 = vld [vmem:[#allocation2 + $0x78] sm:$0xff]  }
 0x35d   : > { %11273 = vmatprep.subr.bf16.mxu1 %v12101_v60  ;;  %v6631_v16 = vsel %vm15362_vm6, %v6622_v6, %v6630_v57  ;;  %v9031_v41 = vsel %vm15370_vm12, %v9028_v51, %v9030_v1  ;;  %v9033_v26 = vsel %vm15371_vm7, %v9030_v1, %v9032_v29  ;;  %v9044_v15 = vrot.slane %v12115_v12, 3  ;;  %vm15377_vm6 = vmmov %vm15373_vm0 }
 0x35e   : > { %v8494_v3 = vor.u32 %v8493_v42, %v8490_v48  ;;  %v8503_v35 = vor.u32 %v8502_v18, %v8499_v54  ;;  %v12114_v48 = vld [vmem:[#allocation2 + $0x68] sm:$0xff]   ;;  %v9046_v14 = vrot.slane %v12116_v55, 3  ;;  %v12119_v54 = vld [vmem:[#allocation2 + $0x90] sm:$0xff]  }
 0x360   : > { %11274 = vmatpush3.bf16.msra.mxu1 %v12101_v60  ;;  %v8509_v60 = vshll.u32 %v12100_v9, 16  ;;  %v8495_v61 = vsel %vm15361_vm14, %v8485_v23, %v8494_v3  ;;  %v8504_v62 = vsel %vm15348_vm3, %v8494_v3, %v8503_v35  ;;  %v9042_v9 = vrot.slane %v12114_v48, 3  ;;  %vm15376_vm14 = vmmov %vm15373_vm0 }
 0x361   : > { %vm15378_vm3 = vmmov %vm15373_vm0 }
 0x362   : > { %11240 = vmatmul.mubr.bf16.gmra.mrb[12].mxu1 %v8450_v8  ;;  %11040 = vmatmul.mubr.bf16.gmra.mrb[60].mxu0 %v6108_v4  ;;  %v8511_v19 = vrot.slane %v8509_v60, 3  ;;  %v6640_v8 = vsel %vm15363_vm2, %v6630_v57, %v13786_v17  ;;  %v8517_v4 = vrot.slane %v8515_v21, 2  ;;  %v9024_v17 = vrot.slane %v12105_v7, 3  ;;  %v12117_v57 = vld [vmem:[#allocation2 + $0x80] sm:$0xff]   ;;  %v12118_v60 = vld [vmem:[#allocation2 + $0x88] sm:$0xff]   ;;  %vm15379_vm2 = vmmov %vm15373_vm0 }
 0x363   : > { %11243 = vmatprep.mubr.bf16.mxu1 %v8459_v0  ;;  %11043 = vmatprep.mubr.bf16.mxu0 %v6110_v50  ;;  %v9022_v50 = vrot.slane %v12104_v45, 3  ;;  %v9045_v3 = vsel %vm15377_vm6, %v9042_v9, %v9044_v15  ;;  %v9047_v10 = vsel %vm15378_vm3, %v9044_v15, %v9046_v14  ;;  %v9048_v6 = vrot.slane %v12117_v57, 3 }
 0x364   : > { %v8512_v31 = vor.u32 %v8511_v19, %v8508_v39  ;;  %v8521_v0 = vor.u32 %v8520_v11, %v8517_v4  ;;  %v9027_v33 = vsel %vm15368_vm11, %v9024_v17, %v9026_v30  ;;  %v12121_v19 = vld [vmem:[#allocation2 + $0xa0] ss:$0 sps:$4 sm:$0x77]  }
 0x365   : > { %v9023_v20 = vsel %vm15366_vm4, %v9021_v56, %v9022_v50  ;;  %v9025_v37 = vsel %vm15367_vm1, %v9022_v50, %v9024_v17  ;;  %vm15382_vm4 = vmmov %vm15373_vm0  ;;  %v9056_v21 = vrot.slane %v12121_v19, 3 }
 0x366   : > { %v8513_v13 = vsel %vm15364_vm5, %v8503_v35, %v8512_v31  ;;  %v8522_v47 = vsel %vm15365_vm9, %v8512_v31, %v8521_v0  ;;  %vm15380_vm5 = vmmov %vm15373_vm0 }
 0x367   : > { %vm15381_vm9 = vmmov %vm15373_vm0 }
 0x368   : > { %vm15383_vm1 = vmmov %vm15373_vm0 }
 0x36a   : > { %11244 = vmatmul.mubr.bf16.gmra.mrb[16].mxu1 %v8468_v58  ;;  %11044 = vmatmul.mubr.bf16.gmra.mrb[64].mxu0 %v6112_v43  ;;  %v12111_v58 = vld [vmem:[#allocation2 + $0x50] sm:$0xff]   ;;  %v9035_v43 = vsel %vm15372_vm15, %v9032_v29, %v9034_v34 }
 0x36b   : > { %11247 = vmatprep.mubr.bf16.mxu1 %v8477_v2  ;;  %11047 = vmatprep.mubr.bf16.mxu0 %v6114_v36  ;;  %v9036_v28 = vrot.slane %v12111_v58, 3  ;;  %v12113_v2 = vld [vmem:[#allocation2 + $0x60] sm:$0xff]  }
 0x36c   : > { %v9040_v42 = vrot.slane %v12113_v2, 3 }
 0x36d   : > { %v9037_v25 = vsel %vm15373_vm0, %v9034_v34, %v9036_v28  ;;  %v9039_v36 = vsel %vm15374_vm10, %v9036_v28, %v9038_v59 }
 0x36e   : > { %v9041_v53 = vsel %vm15375_vm13, %v9038_v59, %v9040_v42  ;;  %v9043_v23 = vsel %vm15376_vm14, %v9040_v42, %v9042_v9  ;;  %v14897_v42 = vld [vmem:[%s14994_s4] ss:$0 sm:$0xff] }
 0x372   : > { %11248 = vmatmul.mubr.bf16.gmra.mrb[20].mxu1 %v8486_v44  ;;  %11048 = vmatmul.mubr.bf16.gmra.mrb[68].mxu0 %v6116_v22  ;;  %v9050_v44 = vrot.slane %v12118_v60, 3  ;;  %v9049_v22 = vsel %vm15379_vm2, %v9046_v14, %v9048_v6 }
 0x373   : > { %11251 = vmatprep.mubr.bf16.mxu1 %v8495_v61  ;;  %11067 = vmatprep.mubr.bf16.mxu0 %v6631_v16  ;;  %v9052_v61 = vrot.slane %v12119_v54, 3  ;;  %v9054_v16 = vrot.slane %v12120_v49, 3 }
 0x374   : > { %v9051_v18 = vsel %vm15380_vm5, %v9048_v6, %v9050_v44 }
 0x375   : > { %v9053_v39 = vsel %vm15381_vm9, %v9050_v44, %v9052_v61  ;;  %v9055_v35 = vsel %vm15382_vm4, %v9052_v61, %v9054_v16  ;;  %v9057_v40 = vsel %vm15383_vm1, %v9054_v16, %v9056_v21 }
 0x37a   : > { %11252 = vmatmul.mubr.bf16.gmra.mrb[24].mxu1 %v8504_v62  ;;  %11068 = vmatmul.mubr.bf16.vlgmr.msra.gmra.mrb[36].mxu0 %v6640_v8 }
 0x37b   : > { %11255 = vmatprep.mubr.bf16.mxu1 %v8513_v13 }
 0x382   : > { %11256 = vmatmul.mubr.bf16.gmra.mrb[28].mxu1 %v8522_v47 }
 0x383   : > { %11275 = vmatprep.mubr.bf16.mxu1 %v9023_v20 }
 0x38a   : > { %11276 = vmatmul.mubr.bf16.vlgmr.msra.gmra.mrb[32].mxu1 %v9025_v37 }
 0x38b   : > { %11279 = vmatprep.mubr.bf16.mxu1 %v9027_v33 }
 0x392   : > { %11280 = vmatmul.mubr.bf16.gmra.mrb[0].mxu1 %v9029_v38 }
 0x393   : > { %11283 = vmatprep.mubr.bf16.mxu1 %v9031_v41 }
 0x39a   : > { %11284 = vmatmul.mubr.bf16.gmra.mrb[4].mxu1 %v9033_v26 }
 0x39b   : > { %11287 = vmatprep.mubr.bf16.mxu1 %v9035_v43 }
 0x3a2   : > { %11288 = vmatmul.mubr.bf16.gmra.mrb[8].mxu1 %v9037_v25 }
 0x3a3   : > { %11291 = vmatprep.mubr.bf16.mxu1 %v9039_v36 }
 0x3aa   : > { %11292 = vmatmul.mubr.bf16.gmra.mrb[12].mxu1 %v9041_v53 }
 0x3ab   : > { %11295 = vmatprep.mubr.bf16.mxu1 %v9043_v23 }
 0x3b2   : > { %11296 = vmatmul.mubr.bf16.gmra.mrb[16].mxu1 %v9045_v3 }
 0x3b3   : > { %11299 = vmatprep.mubr.bf16.mxu1 %v9047_v10 }
 0x3ba   : > { %11300 = vmatmul.mubr.bf16.gmra.mrb[20].mxu1 %v9049_v22 }
 0x3bb   : > { %11303 = vmatprep.mubr.bf16.mxu1 %v9051_v18 }
 0x3c2   : > { %11304 = vmatmul.mubr.bf16.gmra.mrb[24].mxu1 %v9053_v39 }
 0x3c3   : > { %11307 = vmatprep.mubr.bf16.mxu1 %v9055_v35 }
 0x3ca   : > { %11308 = vmatmul.mubr.bf16.gmra.mrb[28].mxu1 %v9057_v40 }
 0x40d   : > { %v11021_v31 = vpop.f32.mrb[40].mxu0 }
 0x40e   : > { %v6233_v62 = vpop.f32.mrb[41].mxu0 }
 0x40f   : > { %v11022_v8 = vpop.f32.mrb[42].mxu0 }
 0x410   : > { %v6236_v4 = vpop.f32.mrb[43].mxu0 }
 0x415   : > { %v14838_v11 = vpop.f32.mrb[44].mxu0 }
 0x416   : > { %v14840_v13 = vpop.f32.mrb[45].mxu0 }
 0x417   : > { %v14842_v45 = vpop.f32.mrb[46].mxu0 }
 0x418   : > { %v14844_v5 = vpop.f32.mrb[47].mxu0 }
 0x41d   : > { %v14846_v0 = vpop.f32.mrb[48].mxu0 }
 0x41e   : > { %v14848_v50 = vpop.f32.mrb[49].mxu0 }
 0x41f   : > { %v14850_v56 = vpop.f32.mrb[50].mxu0 }
 0x420   : > { %v14852_v47 = vpop.f32.mrb[51].mxu0 }
 0x425   : > { %v14854_v7 = vpop.f32.mrb[52].mxu0 }
 0x426   : > { %v14856_v20 = vpop.f32.mrb[53].mxu0 }
 0x427   : > { %v14858_v27 = vpop.f32.mrb[54].mxu0 }
 0x428   : > { %v14860_v17 = vpop.f32.mrb[55].mxu0 }
 0x42d   : > { %v14862_v30 = vpop.f32.mrb[56].mxu0 }
 0x42e   : > { %v14864_v37 = vpop.f32.mrb[57].mxu0 }
 0x42f   : > { %v14866_v32 = vpop.f32.mrb[58].mxu0 }
 0x430   : > { %v14868_v33 = vpop.f32.mrb[59].mxu0 }
 0x435   : > { %v14870_v46 = vpop.f32.mrb[60].mxu0 }
 0x436   : > { %v14872_v51 = vpop.f32.mrb[61].mxu0 }
 0x437   : > { %v14874_v1 = vpop.f32.mrb[62].mxu0 }
 0x438   : > { %v14876_v38 = vpop.f32.mrb[63].mxu0 }
 0x43d   : > { %v14878_v63 = vpop.f32.mrb[64].mxu0 }
 0x43e   : > { %v14880_v41 = vpop.f32.mrb[65].mxu0 }
 0x43f   : > { %v14882_v52 = vpop.f32.mrb[66].mxu0 }
 0x440   : > { %v14884_v29 = vpop.f32.mrb[67].mxu0 }
 0x445   : > { %v14886_v34 = vpop.f32.mrb[68].mxu0 }
 0x446   : > { %v14888_v26 = vpop.f32.mrb[69].mxu0 }
 0x447   : > { %v14890_v58 = vpop.f32.mrb[70].mxu0 }
 0x448   : > { %v14892_v43 = vpop.f32.mrb[71].mxu0 }
 0x44d   : > { %v11069_v24 = vpop.f32.mrb[36].mxu0 }
 0x44e   : > { %v6885_v28 = vpop.f32.mrb[37].mxu0 }
 0x44f   : > { %v11070_v59 = vpop.f32.mrb[38].mxu0 }
 0x450   : > { %v6888_v25 = vpop.f32.mrb[39].mxu0 }
 0x45d   : > { %v11277_v2 = vpop.f32.mrb[32].mxu1 }
 0x45e   : > { %v11327_v36 = vadd.f32 %v11277_v2, %v11069_v24  ;;  %v9158_v48 = vpop.f32.mrb[33].mxu1 }
 0x45f   : > { %v11328_v9 = vadd.f32 %v9158_v48, %v6885_v28  ;;  %v11278_v53 = vpop.f32.mrb[34].mxu1 }
 0x460   : > { %v11329_v12 = vadd.f32 %v11278_v53, %v11070_v59  ;;  %v9161_v23 = vpop.f32.mrb[35].mxu1  ;;  %v9454_v15 = vadd.f32 %v11327_v36, %v14897_v42 }
 0x461   : > { %v11330_v55 = vadd.f32 %v9161_v23, %v6888_v25  ;;  %v9452_v3 = vadd.f32 %v11328_v9, %v14897_v42 }
 0x462   : > { %v9455_v14 = vadd.f32 %v11329_v12, %v14897_v42 }
 0x463   : > { %v9453_v57 = vadd.f32 %v11330_v55, %v14897_v42 }
 0x464   : > { %v10447_v10 = vpack.c.bf16 %v9455_v14, %v9454_v15 }
 0x465   : > { %v10442_v60 = vpack.c.bf16 %v9453_v57, %v9452_v3  ;;  %v11281_v6 = vpop.f32.mrb[0].mxu1 }
 0x466   : > { %10529 = vst [vmem:[%s14906_s23 + $0x8] sm:$0xff] %v10447_v10   ;;  %v11331_v44 = vadd.f32 %v11281_v6, %v11021_v31  ;;  %v9174_v22 = vpop.f32.mrb[1].mxu1 }
 0x467   : > { %10443 = vst [vmem:[%s14906_s23] sm:$0xff] %v10442_v60   ;;  %v11332_v54 = vadd.f32 %v9174_v22, %v6233_v62  ;;  %v11282_v18 = vpop.f32.mrb[2].mxu1 }
 0x468   : > { %v11333_v49 = vadd.f32 %v11282_v18, %v11022_v8  ;;  %v9177_v61 = vpop.f32.mrb[3].mxu1  ;;  %v9458_v39 = vadd.f32 %v11331_v44, %v14897_v42 }
 0x469   : > { %v11334_v16 = vadd.f32 %v9177_v61, %v6236_v4  ;;  %v9456_v35 = vadd.f32 %v11332_v54, %v14897_v42 }
 0x46a   : > { %v9459_v19 = vadd.f32 %v11333_v49, %v14897_v42 }
 0x46b   : > { %v9457_v21 = vadd.f32 %v11334_v16, %v14897_v42 }
 0x46c   : > { %v10457_v40 = vpack.c.bf16 %v9459_v19, %v9458_v39 }
 0x46d   : > { %v10452_v24 = vpack.c.bf16 %v9457_v21, %v9456_v35  ;;  %v11285_v28 = vpop.f32.mrb[4].mxu1 }
 0x46e   : > { %10531 = vst [vmem:[%s14906_s23 + $0x18] sm:$0xff] %v10457_v40   ;;  %v11335_v31 = vadd.f32 %v11285_v28, %v14838_v11  ;;  %v9190_v62 = vpop.f32.mrb[5].mxu1 }
 0x46f   : > { %10530 = vst [vmem:[%s14906_s23 + $0x10] sm:$0xff] %v10452_v24   ;;  %v11336_v8 = vadd.f32 %v9190_v62, %v14840_v13  ;;  %v11286_v4 = vpop.f32.mrb[6].mxu1 }
 0x470   : > { %v11337_v59 = vadd.f32 %v11286_v4, %v14842_v45  ;;  %v9193_v25 = vpop.f32.mrb[7].mxu1  ;;  %v9462_v36 = vadd.f32 %v11335_v31, %v14897_v42 }
 0x471   : > { %v11338_v2 = vadd.f32 %v9193_v25, %v14844_v5  ;;  %v9460_v9 = vadd.f32 %v11336_v8, %v14897_v42 }
 0x472   : > { %v9463_v48 = vadd.f32 %v11337_v59, %v14897_v42 }
 0x473   : > { %v9461_v53 = vadd.f32 %v11338_v2, %v14897_v42 }
 0x474   : > { %v10467_v11 = vpack.c.bf16 %v9463_v48, %v9462_v36 }
 0x475   : > { %v10462_v12 = vpack.c.bf16 %v9461_v53, %v9460_v9  ;;  %v11289_v23 = vpop.f32.mrb[8].mxu1 }
 0x476   : > { %10533 = vst [vmem:[%s14906_s23 + $0x28] sm:$0xff] %v10467_v11   ;;  %v11339_v13 = vadd.f32 %v11289_v23, %v14846_v0  ;;  %v9206_v55 = vpop.f32.mrb[9].mxu1 }
 0x477   : > { %10532 = vst [vmem:[%s14906_s23 + $0x20] sm:$0xff] %v10462_v12   ;;  %v11340_v45 = vadd.f32 %v9206_v55, %v14848_v50  ;;  %v11290_v5 = vpop.f32.mrb[10].mxu1 }
 0x478   : > { %v11341_v15 = vadd.f32 %v11290_v5, %v14850_v56  ;;  %v9209_v14 = vpop.f32.mrb[11].mxu1  ;;  %v9466_v57 = vadd.f32 %v11339_v13, %v14897_v42 }
 0x479   : > { %v11342_v3 = vadd.f32 %v9209_v14, %v14852_v47  ;;  %v9464_v60 = vadd.f32 %v11340_v45, %v14897_v42 }
 0x47a   : > { %v9467_v10 = vadd.f32 %v11341_v15, %v14897_v42 }
 0x47b   : > { %v9465_v6 = vadd.f32 %v11342_v3, %v14897_v42 }
 0x47c   : > { %v10477_v0 = vpack.c.bf16 %v9467_v10, %v9466_v57 }
 0x47d   : > { %v10472_v44 = vpack.c.bf16 %v9465_v6, %v9464_v60  ;;  %v11293_v22 = vpop.f32.mrb[12].mxu1 }
 0x47e   : > { %10535 = vst [vmem:[%s14906_s23 + $0x38] sm:$0xff] %v10477_v0   ;;  %v11343_v50 = vadd.f32 %v11293_v22, %v14854_v7  ;;  %v9222_v54 = vpop.f32.mrb[13].mxu1 }
 0x47f   : > { %10534 = vst [vmem:[%s14906_s23 + $0x30] sm:$0xff] %v10472_v44   ;;  %v11344_v56 = vadd.f32 %v9222_v54, %v14856_v20  ;;  %v11294_v47 = vpop.f32.mrb[14].mxu1 }
 0x480   : > { %v11345_v18 = vadd.f32 %v11294_v47, %v14858_v27  ;;  %v9225_v49 = vpop.f32.mrb[15].mxu1  ;;  %v9470_v16 = vadd.f32 %v11343_v50, %v14897_v42 }
 0x481   : > { %v11346_v61 = vadd.f32 %v9225_v49, %v14860_v17  ;;  %v9468_v19 = vadd.f32 %v11344_v56, %v14897_v42 }
 0x482   : > { %v9471_v39 = vadd.f32 %v11345_v18, %v14897_v42 }
 0x483   : > { %v9469_v35 = vadd.f32 %v11346_v61, %v14897_v42 }
 0x484   : > { %v10487_v7 = vpack.c.bf16 %v9471_v39, %v9470_v16 }
 0x485   : > { %v10482_v21 = vpack.c.bf16 %v9469_v35, %v9468_v19  ;;  %v11297_v40 = vpop.f32.mrb[16].mxu1 }
 0x486   : > { %10537 = vst [vmem:[%s14906_s23 + $0x48] sm:$0xff] %v10487_v7   ;;  %v11347_v20 = vadd.f32 %v11297_v40, %v14862_v30  ;;  %v9238_v24 = vpop.f32.mrb[17].mxu1 }
 0x487   : > { %10536 = vst [vmem:[%s14906_s23 + $0x40] sm:$0xff] %v10482_v21   ;;  %v11348_v27 = vadd.f32 %v9238_v24, %v14864_v37  ;;  %v11298_v17 = vpop.f32.mrb[18].mxu1 }
 0x488   : > { %v11349_v28 = vadd.f32 %v11298_v17, %v14866_v32  ;;  %v9241_v31 = vpop.f32.mrb[19].mxu1  ;;  %v9474_v8 = vadd.f32 %v11347_v20, %v14897_v42 }
 0x489   : > { %v11350_v62 = vadd.f32 %v9241_v31, %v14868_v33  ;;  %v9472_v59 = vadd.f32 %v11348_v27, %v14897_v42 }
 0x48a   : > { %v9475_v4 = vadd.f32 %v11349_v28, %v14897_v42 }
 0x48b   : > { %v9473_v25 = vadd.f32 %v11350_v62, %v14897_v42 }
 0x48c   : > { %v10497_v30 = vpack.c.bf16 %v9475_v4, %v9474_v8 }
 0x48d   : > { %v10492_v2 = vpack.c.bf16 %v9473_v25, %v9472_v59  ;;  %v11301_v36 = vpop.f32.mrb[20].mxu1 }
 0x48e   : > { %10539 = vst [vmem:[%s14906_s23 + $0x58] sm:$0xff] %v10497_v30   ;;  %v11351_v37 = vadd.f32 %v11301_v36, %v14870_v46  ;;  %v9254_v48 = vpop.f32.mrb[21].mxu1 }
 0x48f   : > { %10538 = vst [vmem:[%s14906_s23 + $0x50] sm:$0xff] %v10492_v2   ;;  %v11352_v32 = vadd.f32 %v9254_v48, %v14872_v51  ;;  %v11302_v33 = vpop.f32.mrb[22].mxu1 }
 0x490   : > { %v11353_v9 = vadd.f32 %v11302_v33, %v14874_v1  ;;  %v9257_v53 = vpop.f32.mrb[23].mxu1  ;;  %v9478_v12 = vadd.f32 %v11351_v37, %v14897_v42 }
 0x491   : > { %v11354_v11 = vadd.f32 %v9257_v53, %v14876_v38  ;;  %v9476_v13 = vadd.f32 %v11352_v32, %v14897_v42 }
 0x492   : > { %v9479_v23 = vadd.f32 %v11353_v9, %v14897_v42 }
 0x493   : > { %v9477_v55 = vadd.f32 %v11354_v11, %v14897_v42 }
 0x494   : > { %v10507_v46 = vpack.c.bf16 %v9479_v23, %v9478_v12 }
 0x495   : > { %v10502_v45 = vpack.c.bf16 %v9477_v55, %v9476_v13  ;;  %v11305_v5 = vpop.f32.mrb[24].mxu1 }
 0x496   : > { %10541 = vst [vmem:[%s14906_s23 + $0x68] sm:$0xff] %v10507_v46   ;;  %v11355_v51 = vadd.f32 %v11305_v5, %v14878_v63  ;;  %v9270_v15 = vpop.f32.mrb[25].mxu1 }
 0x497   : > { %10540 = vst [vmem:[%s14906_s23 + $0x60] sm:$0xff] %v10502_v45   ;;  %v11356_v1 = vadd.f32 %v9270_v15, %v14880_v41  ;;  %v11306_v38 = vpop.f32.mrb[26].mxu1 }
 0x498   : > { %v11357_v14 = vadd.f32 %v11306_v38, %v14882_v52  ;;  %v9273_v3 = vpop.f32.mrb[27].mxu1  ;;  %v9482_v10 = vadd.f32 %v11355_v51, %v14897_v42 }
 0x499   : > { %v11358_v57 = vadd.f32 %v9273_v3, %v14884_v29  ;;  %v9480_v6 = vadd.f32 %v11356_v1, %v14897_v42 }
 0x49a   : > { %v9483_v60 = vadd.f32 %v11357_v14, %v14897_v42 }
 0x49b   : > { %v9481_v0 = vadd.f32 %v11358_v57, %v14897_v42 }
 0x49c   : > { %v10517_v63 = vpack.c.bf16 %v9483_v60, %v9482_v10 }
 0x49d   : > { %v10512_v44 = vpack.c.bf16 %v9481_v0, %v9480_v6  ;;  %v11309_v22 = vpop.f32.mrb[28].mxu1 }
 0x49e   : > { %10543 = vst [vmem:[%s14906_s23 + $0x78] sm:$0xff] %v10517_v63   ;;  %v11359_v41 = vadd.f32 %v11309_v22, %v14886_v34  ;;  %v9286_v52 = vpop.f32.mrb[29].mxu1 }
 0x49f   : > { %10542 = vst [vmem:[%s14906_s23 + $0x70] sm:$0xff] %v10512_v44   ;;  %v11360_v29 = vadd.f32 %v9286_v52, %v14888_v26  ;;  %v11310_v50 = vpop.f32.mrb[30].mxu1 }
 0x4a0   : > { %v11361_v54 = vadd.f32 %v11310_v50, %v14890_v58  ;;  %v9289_v56 = vpop.f32.mrb[31].mxu1  ;;  %v9486_v18 = vadd.f32 %v11359_v41, %v14897_v42 }
 0x4a1   : > { %v11362_v47 = vadd.f32 %v9289_v56, %v14892_v43  ;;  %v9484_v61 = vadd.f32 %v11360_v29, %v14897_v42 }
 0x4a2   : > { %v9487_v49 = vadd.f32 %v11361_v54, %v14897_v42 }
 0x4a3   : > { %v9485_v16 = vadd.f32 %v11362_v47, %v14897_v42 }
 0x4a4   : > { %v10527_v39 = vpack.c.bf16 %v9487_v49, %v9486_v18 }
 0x4a5   : > { %v10522_v34 = vpack.c.bf16 %v9485_v16, %v9484_v61 }
 0x4a6   : > { %10545 = vst [vmem:[%s14906_s23 + $0x88] sm:$0xff] %v10527_v39  }
 0x4a7   : > { %10544 = vst [vmem:[%s14906_s23 + $0x80] sm:$0xff] %v10522_v34  }
 0x4a8 PF: > { %s15_s18 = sadd.s32 1, %s12139_s18  }
 0x4a9   : > { %p12_p4 = scmp.ge.s32.totalorder %s15_s18, 4  }
 0x4ab   :  { %14 = sbr.rel (!%p12_p4) target bundleno = 1 (0x1), region = 78 }

</bundles_post_ra>
